<compile_context>
chip_gen: v6e
topology: v6e:2x2x1
jax: 0.10.0
libtpu: 0.0.40
codegen_flags: <defaults>
</compile_context>

<pallas_src>
import functools

import numpy as np

import jax
import jax.numpy as jnp
from jax.experimental import pallas as pl
from jax.experimental.pallas import tpu as pltpu


_TAPS3x3 = tuple((dy, dx) for dy in (-1, 0, 1) for dx in (-1, 0, 1))


# ----------------------------------------------------------------------------
# Fused cell kernel (everything unrolled at trace time from the static genotype)
# ----------------------------------------------------------------------------
def _make_cell_kernel(C, H, W, B, op_names, indices, concat, weight_slot):
    HW = H * W
    PAD = max(128, ((W + 1 + 127) // 128) * 128)   # aligned halo >= max |dy*W+dx|
    BC = B * C
    steps = len(op_names) // 2 + 1
    n_weights = sum(s is not None for s in weight_slot)

    # Destination plan: a state that is concatenated but never consumed by a
    # later op is written straight into its out_ref channel slab.
    produced_dest = {}
    direct_out = set()
    concat_l = list(concat)
    for s in range(1, steps + 1):
        if (s in concat_l) and (concat_l.count(s) == 1) and (s not in indices):
            produced_dest[s] = ("out", concat_l.index(s))
            direct_out.add(s)
        else:
            produced_dest[s] = ("state", s)

    def kernel(*refs):
        aux_ref = refs[0]                     # (3, HW): mask dx=-1, mask dx=+1, 1/count
        x_ref = refs[1]                       # (B, C, HW) current image block
        w_refs = refs[2:2 + n_weights]        # per conv op: (C, n_taps*C + 1) VMEM
        out_ref = refs[2 + n_weights]         # (B, ncat*C, HW)
        st_ref = refs[3 + n_weights]          # (steps+1, BC, HW) resident states
        hal_ref = refs[4 + n_weights]         # (BC, PAD + HW + PAD) zero-halo staging
        tap_ref = refs[5 + n_weights]         # (9, BC, HW) current op tap slab

        # Zero ONLY the halo columns (aligned, tiny).  Interiors are always
        # fully overwritten before being read, so no full-scratch zeroing.
        hal_ref[:, 0:PAD] = jnp.zeros((BC, PAD), jnp.float32)
        hal_ref[:, PAD + HW:PAD + HW + PAD] = jnp.zeros((BC, PAD), jnp.float32)

        mask_l = aux_ref[0:1, :]              # (1, HW): dx = -1 tap in-bounds
        mask_r = aux_ref[1:2, :]              # (1, HW): dx = +1 tap in-bounds
        inv_cnt = aux_ref[2:3, :]             # (1, HW): count_include_pad=False

        def read_state(s):
            return st_ref[s, :, :]            # (BC, HW)

        def dest_store(dest, b, val, accumulate):
            kind, idx = dest
            lo = b * C
            if kind == "state":
                if accumulate:
                    st_ref[idx, lo:lo + C, :] += val
                else:
                    st_ref[idx, lo:lo + C, :] = val
            else:                              # direct write into the concat slab
                if accumulate:
                    out_ref[b, idx * C:(idx + 1) * C, :] += val
                else:
                    out_ref[b, idx * C:(idx + 1) * C, :] = val

        def dest_store_all(dest, val_bc, accumulate):
            for b in range(B):
                dest_store(dest, b, val_bc[b * C:(b + 1) * C, :], accumulate)

        def tap_window(dy, dx):
            off = dy * W + dx
            sl = hal_ref[:, PAD + off:PAD + off + HW]         # (BC, HW)
            if dx == -1:
                sl = sl * mask_l
            elif dx == 1:
                sl = sl * mask_r
            return sl

        def build_taps_3x3(val_bc):
            # Stage once (ReLU already applied by caller; halo stays zero),
            # then materialize the 9 masked taps into the lane-dense tap slab.
            hal_ref[:, PAD:PAD + HW] = val_bc
            for t, (dy, dx) in enumerate(_TAPS3x3):
                tap_ref[t, :, :] = tap_window(dy, dx)

        def conv_from_taps(n_taps, w_ref, dest, accumulate):
            # acc[co, :] = sum_{t,ci} w[co, t*C+ci] * tap[t, ci, :] + bias[co]
            # vectorized over co; 4 partial accumulators break the FMA chain.
            K = n_taps * C
            bias = w_ref[:, K:K + 1]                           # (C, 1)
            wcols = [w_ref[:, k:k + 1] for k in range(K)]      # (C, 1) each, hoisted
            n_part = min(4, K)
            for b in range(B):
                parts = [None] * n_part
                for k in range(K):
                    t, ci = divmod(k, C)
                    r = b * C + ci
                    trow = tap_ref[t, r:r + 1, :]              # (1, HW)
                    prod = wcols[k] * trow                     # (C, HW) broadcast FMA
                    p = k % n_part
                    parts[p] = prod if parts[p] is None else parts[p] + prod
                while len(parts) > 1:
                    nxt = [parts[i] + parts[i + 1]
                           for i in range(0, len(parts) - 1, 2)]
                    if len(parts) % 2:
                        nxt.append(parts[-1])
                    parts = nxt
                dest_store(dest, b, parts[0] + bias, accumulate)

        def avg_pool(val_bc, dest, accumulate):
            hal_ref[:, PAD:PAD + HW] = val_bc                  # raw (no ReLU)
            parts = [None, None, None]
            for t, (dy, dx) in enumerate(_TAPS3x3):
                sl = tap_window(dy, dx)
                p = t % 3
                parts[p] = sl if parts[p] is None else parts[p] + sl
            tot = (parts[0] + parts[1]) + parts[2]
            dest_store_all(dest, tot * inv_cnt, accumulate)

        def apply_op(name, s_in, w_ref, dest, accumulate):
            sval = read_state(s_in)
            if name == "skip_connect":
                dest_store_all(dest, sval, accumulate)
            elif name == "avg_pool_3x3":
                avg_pool(sval, dest, accumulate)
            elif name == "conv_1x1":
                tap_ref[0, :, :] = jnp.maximum(sval, 0.0)      # ReLU hoisted
                conv_from_taps(1, w_ref, dest, accumulate)
            elif name == "conv_3x3":
                build_taps_3x3(jnp.maximum(sval, 0.0))         # ReLU hoisted (once)
                conv_from_taps(9, w_ref, dest, accumulate)
            else:
                raise ValueError(f"unknown op {name}")

        def op_weight(j):                     # j indexes [preprocess] + genotype ops
            s = weight_slot[j]
            return None if s is None else w_refs[s]

        # preprocess0: ReLUConvBN(C, C, 1, 1, 0) on the raw input block.
        for b in range(B):
            tap_ref[0, b * C:(b + 1) * C, :] = jnp.maximum(x_ref[b], 0.0)
        conv_from_taps(1, op_weight(0), ("state", 0), False)

        # Genotype steps; the branch add of each step is fused via accumulate=True.
        for i in range(steps):
            dest = produced_dest[i + 1]
            if i == 0:
                apply_op(op_names[0], indices[0], op_weight(1), dest, False)
            else:
                k1, k2 = 2 * i - 1, 2 * i
                apply_op(op_names[k1], indices[k1], op_weight(1 + k1), dest, False)
                apply_op(op_names[k2], indices[k2], op_weight(1 + k2), dest, True)

        # torch.cat(dim=1): copy the remaining concat states into their slabs.
        for j, s in enumerate(concat):
            if s in direct_out:
                continue
            for b in range(B):
                out_ref[b, j * C:(j + 1) * C, :] = st_ref[s, b * C:(b + 1) * C, :]

    return kernel, PAD


# ----------------------------------------------------------------------------
# Wrapper
# ----------------------------------------------------------------------------
def _make_aux(H, W):
    hh, ww = np.meshgrid(np.arange(H), np.arange(W), indexing="ij")
    mask_l = (ww >= 1).astype(np.float32)
    mask_r = (ww <= W - 2).astype(np.float32)
    cnt = (1.0 + (hh >= 1) + (hh <= H - 2)) * (1.0 + (ww >= 1) + (ww <= W - 2))
    return jnp.asarray(
        np.stack([mask_l.reshape(-1), mask_r.reshape(-1), (1.0 / cnt).reshape(-1)]),
        dtype=jnp.float32)


def _pick_images_per_block(N):
    # Keep >= 2 grid steps (both v7x TensorCores busy) while batching images per
    # block for sublane fill / per-step-overhead amortization on v5e/v6e.
    B = max(1, min(8, N // 2))
    while N % B:
        B -= 1
    return B


def cell_mif_forward(x_nchw, params, genotype, concat):
    """Fused CellMIF forward; returns (N, len(concat)*C, H, W) like torch."""
    op_names, indices = zip(*genotype)
    N, C, H, W = x_nchw.shape
    HW = H * W                                 # layout assumes H*W % 128 == 0
    steps = len(op_names) // 2 + 1
    ncat = len(concat)
    B = _pick_images_per_block(N)

    # Per conv op, folded (w, b) packed as a (Cout, n_taps*Cin + 1) VMEM matrix
    # so that w[:, k:k+1] is a direct (C, 1) weight-column slice in the kernel.
    weight_arrays, weight_slot = [], []
    for p in [params["pre"]] + list(params["ops"]):
        if p is None:
            weight_slot.append(None)
        else:
            w, b = p
            weight_slot.append(len(weight_arrays))
            weight_arrays.append(
                jnp.concatenate([w.T, b[:, None]], axis=1).astype(jnp.float32))

    kernel, PAD = _make_cell_kernel(C, H, W, B, op_names, indices, tuple(concat),
                                    tuple(weight_slot))

    in_specs = [
        pl.BlockSpec((3, HW), lambda n: (0, 0)),            # masks / 1-over-count
        pl.BlockSpec((B, C, HW), lambda n: (n, 0, 0)),      # B images per grid step
    ] + [pl.BlockSpec(tuple(w.shape), lambda n: (0, 0)) for w in weight_arrays]

    out = pl.pallas_call(
        kernel,
        out_shape=jax.ShapeDtypeStruct((N, ncat * C, HW), jnp.float32),
        grid=(N // B,),
        in_specs=in_specs,
        out_specs=pl.BlockSpec((B, ncat * C, HW), lambda n: (n, 0, 0)),
        scratch_shapes=[
            pltpu.VMEM((steps + 1, B * C, HW), jnp.float32),        # resident states
            pltpu.VMEM((B * C, PAD + HW + PAD), jnp.float32),       # zero-halo staging
            pltpu.VMEM((9, B * C, HW), jnp.float32),                # tap slab
        ],
        compiler_params=pltpu.CompilerParams(
            dimension_semantics=("parallel",)),
    )(_make_aux(H, W), x_nchw.reshape(N, C, HW).astype(jnp.float32),
      *weight_arrays)

    return out.reshape(N, ncat * C, H, W)


# ----------------------------------------------------------------------------
# Deterministic parameter construction (ReLUConvBN with BN folded in)
# ----------------------------------------------------------------------------
def _make_relu_conv_bn_params(key, cin, cout, ksize):
    k1, k2, k3, k4, k5 = jax.random.split(key, 5)
    w = 0.1 * jax.random.normal(k1, (ksize * ksize * cin, cout), jnp.float32)
    gamma = 1.0 + 0.1 * jax.random.normal(k2, (cout,), jnp.float32)
    beta = 0.1 * jax.random.normal(k3, (cout,), jnp.float32)
    mean = 0.1 * jax.random.normal(k4, (cout,), jnp.float32)
    var = jnp.abs(jax.random.normal(k5, (cout,), jnp.float32)) + 0.5
    scale = gamma / jnp.sqrt(var + 1e-5)
    return ((w * scale[None, :]).astype(jnp.float32),
            (beta - mean * scale).astype(jnp.float32))


def init_cell_params(key, c, genotype):
    keys = jax.random.split(key, len(genotype) + 1)
    pre = _make_relu_conv_bn_params(keys[0], c, c, 1)   # preprocess0: ReLUConvBN(C,C,1,1,0)
    op_params = []
    for (name, _), k in zip(genotype, keys[1:]):
        if name == "conv_1x1":
            op_params.append(_make_relu_conv_bn_params(k, c, c, 1))
        elif name == "conv_3x3":
            op_params.append(_make_relu_conv_bn_params(k, c, c, 3))
        else:
            op_params.append(None)
    return {"pre": pre, "ops": op_params}


# ----------------------------------------------------------------------------
# Pure-JAX reference (independent pad/im2col formulation) for correctness check
# ----------------------------------------------------------------------------
def _ref_relu_conv_bn(x_nchw, w, b, ksize):
    n, c, h, ww = x_nchw.shape
    xr = jnp.maximum(x_nchw, 0.0)
    if ksize == 3:
        xp = jnp.pad(xr, ((0, 0), (0, 0), (1, 1), (1, 1)))
        cols = [xp[:, :, dy:dy + h, dx:dx + ww]
                for dy in range(3) for dx in range(3)]
        xr = jnp.concatenate(cols, axis=1)                 # tap outer, cin inner
    y = jnp.einsum("nkhw,ko->nohw", xr, w,
                   precision=jax.lax.Precision.HIGHEST)
    return y + b[None, :, None, None]


def _ref_avg_pool_3x3(x_nchw):
    n, c, h, ww = x_nchw.shape
    xp = jnp.pad(x_nchw, ((0, 0), (0, 0), (1, 1), (1, 1)))
    s = sum(xp[:, :, dy:dy + h, dx:dx + ww] for dy in range(3) for dx in range(3))
    op = jnp.pad(jnp.ones((1, 1, h, ww), jnp.float32),
                 ((0, 0), (0, 0), (1, 1), (1, 1)))
    cnt = sum(op[:, :, dy:dy + h, dx:dx + ww] for dy in range(3) for dx in range(3))
    return s / cnt                                         # count_include_pad=False


def cell_mif_reference(x_nchw, params, genotype, concat):
    op_names, indices = zip(*genotype)
    steps = len(op_names) // 2 + 1

    def apply_ref(name, x, p):
        if name == "skip_connect":
            return x
        if name == "conv_1x1":
            return _ref_relu_conv_bn(x, p[0], p[1], 1)
        if name == "conv_3x3":
            return _ref_relu_conv_bn(x, p[0], p[1], 3)
        if name == "avg_pool_3x3":
            return _ref_avg_pool_3x3(x)
        raise ValueError(name)

    states = [_ref_relu_conv_bn(x_nchw, *params["pre"], 1)]
    for i in range(steps):
        if i == 0:
            s = apply_ref(op_names[0], states[indices[0]], params["ops"][0])
        else:
            h1 = apply_ref(op_names[2 * i - 1], states[indices[2 * i - 1]],
                           params["ops"][2 * i - 1])
            h2 = apply_ref(op_names[2 * i], states[indices[2 * i]],
                           params["ops"][2 * i])
            s = h1 + h2
        states.append(s)
    return jnp.concatenate([states[i] for i in concat], axis=1)


if __name__ == "__main__":
    N, C, H, W = 2, 4, 16, 16
    key = jax.random.PRNGKey(0)
    kx, kp = jax.random.split(key)
    x = jax.random.normal(kx, (N, C, H, W), jnp.float32)

    # Synthetic deterministic genotype (f-branch): 5 ops, 3 steps, concat 3 states.
    genotype_f = [("conv_3x3", 0), ("conv_1x1", 0), ("skip_connect", 1),
                  ("conv_3x3", 1), ("avg_pool_3x3", 2)]
    f_cat = (1, 2, 3)

    params = init_cell_params(kp, C, genotype_f)

    fwd = jax.jit(functools.partial(cell_mif_forward,
                                    genotype=genotype_f, concat=f_cat))
    out = jax.block_until_ready(fwd(x, params))

    assert out.shape == (N, C * len(f_cat), H, W), out.shape
    assert bool(jnp.all(jnp.isfinite(out)))

    # Correctness against an independent pure-JAX reference of the same cell.
    ref = jax.block_until_ready(cell_mif_reference(x, params, genotype_f, f_cat))
    np.testing.assert_allclose(np.asarray(out), np.asarray(ref),
                               rtol=1e-4, atol=1e-4)
    print("KERNEL_OK")
</pallas_src>

<mosaic_0001>
module attributes {stable_mosaic.version = 11 : i64} {
  func.func @kernel(%arg0: i32, %arg1: memref<3x256xf32, #tpu.memory_space<vmem>>, %arg2: memref<1x4x256xf32, #tpu.memory_space<vmem>>, %arg3: memref<4x5xf32, #tpu.memory_space<vmem>>, %arg4: memref<4x37xf32, #tpu.memory_space<vmem>>, %arg5: memref<4x5xf32, #tpu.memory_space<vmem>>, %arg6: memref<4x37xf32, #tpu.memory_space<vmem>>, %arg7: memref<1x12x256xf32, #tpu.memory_space<vmem>>, %arg8: memref<4x4x256xf32, #tpu.memory_space<vmem>>, %arg9: memref<4x512xf32, #tpu.memory_space<vmem>>, %arg10: memref<9x4x256xf32, #tpu.memory_space<vmem>>) attributes {dimension_semantics = [#tpu.dimension_semantics<parallel>], iteration_bounds = array<i64: 2>, scalar_prefetch = 0 : i64, scratch_operands = 3 : i64, tpu.core_type = #tpu.core_type<tc>, window_params = [{pipeline_mode = #tpu.pipeline_mode<synchronous>, transform_indices = @transform_0, window_bounds = array<i64: 3, 256>}, {transform_indices = @transform_1, window_bounds = array<i64: 1, 4, 256>}, {pipeline_mode = #tpu.pipeline_mode<synchronous>, transform_indices = @transform_2, window_bounds = array<i64: 4, 5>}, {pipeline_mode = #tpu.pipeline_mode<synchronous>, transform_indices = @transform_3, window_bounds = array<i64: 4, 37>}, {pipeline_mode = #tpu.pipeline_mode<synchronous>, transform_indices = @transform_4, window_bounds = array<i64: 4, 5>}, {pipeline_mode = #tpu.pipeline_mode<synchronous>, transform_indices = @transform_5, window_bounds = array<i64: 4, 37>}, {transform_indices = @transform_6, window_bounds = array<i64: 1, 12, 256>}]} {
    %cst = arith.constant 0.000000e+00 : f32
    %0 = vector.broadcast %cst : f32 to vector<4x128xf32>
    %c0 = arith.constant 0 : index
    %c0_0 = arith.constant 0 : index
    %1 = vector.load %arg9[%c0, %c0_0] : memref<4x512xf32, #tpu.memory_space<vmem>>, vector<4x128xf32>
    tpu.vector_store %arg9[%c0, %c0_0], %0 {strides = array<i32>} : memref<4x512xf32, #tpu.memory_space<vmem>>, vector<4x128xf32>,
    %cst_1 = arith.constant 0.000000e+00 : f32
    %2 = vector.broadcast %cst_1 : f32 to vector<4x128xf32>
    %c0_2 = arith.constant 0 : index
    %c384 = arith.constant 384 : index
    %3 = vector.load %arg9[%c0_2, %c384] : memref<4x512xf32, #tpu.memory_space<vmem>>, vector<4x128xf32>
    tpu.vector_store %arg9[%c0_2, %c384], %2 {strides = array<i32>} : memref<4x512xf32, #tpu.memory_space<vmem>>, vector<4x128xf32>,
    %c0_3 = arith.constant 0 : index
    %c0_4 = arith.constant 0 : index
    %4 = vector.load %arg1[%c0_3, %c0_4] : memref<3x256xf32, #tpu.memory_space<vmem>>, vector<1x256xf32>
    %c1 = arith.constant 1 : index
    %c0_5 = arith.constant 0 : index
    %5 = vector.load %arg1[%c1, %c0_5] : memref<3x256xf32, #tpu.memory_space<vmem>>, vector<1x256xf32>
    %c2 = arith.constant 2 : index
    %c0_6 = arith.constant 0 : index
    %6 = vector.load %arg1[%c2, %c0_6] : memref<3x256xf32, #tpu.memory_space<vmem>>, vector<1x256xf32>
    %c0_7 = arith.constant 0 : index
    %c0_8 = arith.constant 0 : index
    %c0_9 = arith.constant 0 : index
    %7 = vector.load %arg2[%c0_7, %c0_8, %c0_9] : memref<1x4x256xf32, #tpu.memory_space<vmem>>, vector<1x4x256xf32>
    %8 = vector.shape_cast %7 : vector<1x4x256xf32> to vector<4x256xf32>
    %cst_10 = arith.constant 0.000000e+00 : f32
    %9 = vector.broadcast %cst_10 : f32 to vector<4x256xf32>
    %10 = arith.maximumf %8, %9 : vector<4x256xf32>
    %c0_11 = arith.constant 0 : index
    %c0_12 = arith.constant 0 : index
    %c0_13 = arith.constant 0 : index
    %11 = vector.load %arg10[%c0_11, %c0_12, %c0_13] : memref<9x4x256xf32, #tpu.memory_space<vmem>>, vector<1x4x256xf32>
    %12 = vector.shape_cast %11 : vector<1x4x256xf32> to vector<4x256xf32>
    %13 = vector.shape_cast %10 : vector<4x256xf32> to vector<1x4x256xf32>
    tpu.vector_store %arg10[%c0_11, %c0_12, %c0_13], %13 {strides = array<i32>} : memref<9x4x256xf32, #tpu.memory_space<vmem>>, vector<1x4x256xf32>,
    %c0_14 = arith.constant 0 : index
    %c4 = arith.constant 4 : index
    %14 = vector.load %arg3[%c0_14, %c4] : memref<4x5xf32, #tpu.memory_space<vmem>>, vector<4x1xf32>
    %c0_15 = arith.constant 0 : index
    %c0_16 = arith.constant 0 : index
    %15 = vector.load %arg3[%c0_15, %c0_16] : memref<4x5xf32, #tpu.memory_space<vmem>>, vector<4x1xf32>
    %c0_17 = arith.constant 0 : index
    %c1_18 = arith.constant 1 : index
    %16 = vector.load %arg3[%c0_17, %c1_18] : memref<4x5xf32, #tpu.memory_space<vmem>>, vector<4x1xf32>
    %c0_19 = arith.constant 0 : index
    %c2_20 = arith.constant 2 : index
    %17 = vector.load %arg3[%c0_19, %c2_20] : memref<4x5xf32, #tpu.memory_space<vmem>>, vector<4x1xf32>
    %c0_21 = arith.constant 0 : index
    %c3 = arith.constant 3 : index
    %18 = vector.load %arg3[%c0_21, %c3] : memref<4x5xf32, #tpu.memory_space<vmem>>, vector<4x1xf32>
    %c0_22 = arith.constant 0 : index
    %c0_23 = arith.constant 0 : index
    %c0_24 = arith.constant 0 : index
    %19 = vector.load %arg10[%c0_22, %c0_23, %c0_24] : memref<9x4x256xf32, #tpu.memory_space<vmem>>, vector<1x1x256xf32>
    %20 = vector.shape_cast %19 : vector<1x1x256xf32> to vector<1x256xf32>
    %21 = vector.broadcast %15 : vector<4x1xf32> to vector<4x256xf32>
    %22 = vector.broadcast %20 : vector<1x256xf32> to vector<4x256xf32>
    %23 = arith.mulf %21, %22 : vector<4x256xf32>
    %c0_25 = arith.constant 0 : index
    %c1_26 = arith.constant 1 : index
    %c0_27 = arith.constant 0 : index
    %24 = vector.load %arg10[%c0_25, %c1_26, %c0_27] : memref<9x4x256xf32, #tpu.memory_space<vmem>>, vector<1x1x256xf32>
    %25 = vector.shape_cast %24 : vector<1x1x256xf32> to vector<1x256xf32>
    %26 = vector.broadcast %16 : vector<4x1xf32> to vector<4x256xf32>
    %27 = vector.broadcast %25 : vector<1x256xf32> to vector<4x256xf32>
    %28 = arith.mulf %26, %27 : vector<4x256xf32>
    %c0_28 = arith.constant 0 : index
    %c2_29 = arith.constant 2 : index
    %c0_30 = arith.constant 0 : index
    %29 = vector.load %arg10[%c0_28, %c2_29, %c0_30] : memref<9x4x256xf32, #tpu.memory_space<vmem>>, vector<1x1x256xf32>
    %30 = vector.shape_cast %29 : vector<1x1x256xf32> to vector<1x256xf32>
    %31 = vector.broadcast %17 : vector<4x1xf32> to vector<4x256xf32>
    %32 = vector.broadcast %30 : vector<1x256xf32> to vector<4x256xf32>
    %33 = arith.mulf %31, %32 : vector<4x256xf32>
    %c0_31 = arith.constant 0 : index
    %c3_32 = arith.constant 3 : index
    %c0_33 = arith.constant 0 : index
    %34 = vector.load %arg10[%c0_31, %c3_32, %c0_33] : memref<9x4x256xf32, #tpu.memory_space<vmem>>, vector<1x1x256xf32>
    %35 = vector.shape_cast %34 : vector<1x1x256xf32> to vector<1x256xf32>
    %36 = vector.broadcast %18 : vector<4x1xf32> to vector<4x256xf32>
    %37 = vector.broadcast %35 : vector<1x256xf32> to vector<4x256xf32>
    %38 = arith.mulf %36, %37 : vector<4x256xf32>
    %39 = arith.addf %23, %28 : vector<4x256xf32>
    %40 = arith.addf %33, %38 : vector<4x256xf32>
    %41 = arith.addf %39, %40 : vector<4x256xf32>
    %42 = vector.broadcast %14 : vector<4x1xf32> to vector<4x256xf32>
    %43 = arith.addf %41, %42 : vector<4x256xf32>
    %c0_34 = arith.constant 0 : index
    %c0_35 = arith.constant 0 : index
    %c0_36 = arith.constant 0 : index
    %44 = vector.load %arg8[%c0_34, %c0_35, %c0_36] : memref<4x4x256xf32, #tpu.memory_space<vmem>>, vector<1x4x256xf32>
    %45 = vector.shape_cast %44 : vector<1x4x256xf32> to vector<4x256xf32>
    %46 = vector.shape_cast %43 : vector<4x256xf32> to vector<1x4x256xf32>
    tpu.vector_store %arg8[%c0_34, %c0_35, %c0_36], %46 {strides = array<i32>} : memref<4x4x256xf32, #tpu.memory_space<vmem>>, vector<1x4x256xf32>,
    %c0_37 = arith.constant 0 : index
    %c0_38 = arith.constant 0 : index
    %c0_39 = arith.constant 0 : index
    %47 = vector.load %arg8[%c0_37, %c0_38, %c0_39] : memref<4x4x256xf32, #tpu.memory_space<vmem>>, vector<1x4x256xf32>
    %48 = vector.shape_cast %47 : vector<1x4x256xf32> to vector<4x256xf32>
    %cst_40 = arith.constant 0.000000e+00 : f32
    %49 = vector.broadcast %cst_40 : f32 to vector<4x256xf32>
    %50 = arith.maximumf %48, %49 : vector<4x256xf32>
    %c0_41 = arith.constant 0 : index
    %c128 = arith.constant 128 : index
    %51 = vector.load %arg9[%c0_41, %c128] : memref<4x512xf32, #tpu.memory_space<vmem>>, vector<4x256xf32>
    tpu.vector_store %arg9[%c0_41, %c128], %50 {strides = array<i32>} : memref<4x512xf32, #tpu.memory_space<vmem>>, vector<4x256xf32>,
    %c0_42 = arith.constant 0 : index
    %c111 = arith.constant 111 : index
    %52 = vector.load %arg9[%c0_42, %c111] : memref<4x512xf32, #tpu.memory_space<vmem>>, vector<4x256xf32>
    %53 = vector.broadcast %4 : vector<1x256xf32> to vector<4x256xf32>
    %54 = arith.mulf %52, %53 : vector<4x256xf32>
    %c0_43 = arith.constant 0 : index
    %c0_44 = arith.constant 0 : index
    %c0_45 = arith.constant 0 : index
    %55 = vector.load %arg10[%c0_43, %c0_44, %c0_45] : memref<9x4x256xf32, #tpu.memory_space<vmem>>, vector<1x4x256xf32>
    %56 = vector.shape_cast %55 : vector<1x4x256xf32> to vector<4x256xf32>
    %57 = vector.shape_cast %54 : vector<4x256xf32> to vector<1x4x256xf32>
    tpu.vector_store %arg10[%c0_43, %c0_44, %c0_45], %57 {strides = array<i32>} : memref<9x4x256xf32, #tpu.memory_space<vmem>>, vector<1x4x256xf32>,
    %c0_46 = arith.constant 0 : index
    %c112 = arith.constant 112 : index
    %58 = vector.load %arg9[%c0_46, %c112] : memref<4x512xf32, #tpu.memory_space<vmem>>, vector<4x256xf32>
    %c1_47 = arith.constant 1 : index
    %c0_48 = arith.constant 0 : index
    %c0_49 = arith.constant 0 : index
    %59 = vector.load %arg10[%c1_47, %c0_48, %c0_49] : memref<9x4x256xf32, #tpu.memory_space<vmem>>, vector<1x4x256xf32>
    %60 = vector.shape_cast %59 : vector<1x4x256xf32> to vector<4x256xf32>
    %61 = vector.shape_cast %58 : vector<4x256xf32> to vector<1x4x256xf32>
    tpu.vector_store %arg10[%c1_47, %c0_48, %c0_49], %61 {strides = array<i32>} : memref<9x4x256xf32, #tpu.memory_space<vmem>>, vector<1x4x256xf32>,
    %c0_50 = arith.constant 0 : index
    %c113 = arith.constant 113 : index
    %62 = vector.load %arg9[%c0_50, %c113] : memref<4x512xf32, #tpu.memory_space<vmem>>, vector<4x256xf32>
    %63 = vector.broadcast %5 : vector<1x256xf32> to vector<4x256xf32>
    %64 = arith.mulf %62, %63 : vector<4x256xf32>
    %c2_51 = arith.constant 2 : index
    %c0_52 = arith.constant 0 : index
    %c0_53 = arith.constant 0 : index
    %65 = vector.load %arg10[%c2_51, %c0_52, %c0_53] : memref<9x4x256xf32, #tpu.memory_space<vmem>>, vector<1x4x256xf32>
    %66 = vector.shape_cast %65 : vector<1x4x256xf32> to vector<4x256xf32>
    %67 = vector.shape_cast %64 : vector<4x256xf32> to vector<1x4x256xf32>
    tpu.vector_store %arg10[%c2_51, %c0_52, %c0_53], %67 {strides = array<i32>} : memref<9x4x256xf32, #tpu.memory_space<vmem>>, vector<1x4x256xf32>,
    %c0_54 = arith.constant 0 : index
    %c127 = arith.constant 127 : index
    %68 = vector.load %arg9[%c0_54, %c127] : memref<4x512xf32, #tpu.memory_space<vmem>>, vector<4x256xf32>
    %69 = vector.broadcast %4 : vector<1x256xf32> to vector<4x256xf32>
    %70 = arith.mulf %68, %69 : vector<4x256xf32>
    %c3_55 = arith.constant 3 : index
    %c0_56 = arith.constant 0 : index
    %c0_57 = arith.constant 0 : index
    %71 = vector.load %arg10[%c3_55, %c0_56, %c0_57] : memref<9x4x256xf32, #tpu.memory_space<vmem>>, vector<1x4x256xf32>
    %72 = vector.shape_cast %71 : vector<1x4x256xf32> to vector<4x256xf32>
    %73 = vector.shape_cast %70 : vector<4x256xf32> to vector<1x4x256xf32>
    tpu.vector_store %arg10[%c3_55, %c0_56, %c0_57], %73 {strides = array<i32>} : memref<9x4x256xf32, #tpu.memory_space<vmem>>, vector<1x4x256xf32>,
    %c0_58 = arith.constant 0 : index
    %c128_59 = arith.constant 128 : index
    %74 = vector.load %arg9[%c0_58, %c128_59] : memref<4x512xf32, #tpu.memory_space<vmem>>, vector<4x256xf32>
    %c4_60 = arith.constant 4 : index
    %c0_61 = arith.constant 0 : index
    %c0_62 = arith.constant 0 : index
    %75 = vector.load %arg10[%c4_60, %c0_61, %c0_62] : memref<9x4x256xf32, #tpu.memory_space<vmem>>, vector<1x4x256xf32>
    %76 = vector.shape_cast %75 : vector<1x4x256xf32> to vector<4x256xf32>
    %77 = vector.shape_cast %74 : vector<4x256xf32> to vector<1x4x256xf32>
    tpu.vector_store %arg10[%c4_60, %c0_61, %c0_62], %77 {strides = array<i32>} : memref<9x4x256xf32, #tpu.memory_space<vmem>>, vector<1x4x256xf32>,
    %c0_63 = arith.constant 0 : index
    %c129 = arith.constant 129 : index
    %78 = vector.load %arg9[%c0_63, %c129] : memref<4x512xf32, #tpu.memory_space<vmem>>, vector<4x256xf32>
    %79 = vector.broadcast %5 : vector<1x256xf32> to vector<4x256xf32>
    %80 = arith.mulf %78, %79 : vector<4x256xf32>
    %c5 = arith.constant 5 : index
    %c0_64 = arith.constant 0 : index
    %c0_65 = arith.constant 0 : index
    %81 = vector.load %arg10[%c5, %c0_64, %c0_65] : memref<9x4x256xf32, #tpu.memory_space<vmem>>, vector<1x4x256xf32>
    %82 = vector.shape_cast %81 : vector<1x4x256xf32> to vector<4x256xf32>
    %83 = vector.shape_cast %80 : vector<4x256xf32> to vector<1x4x256xf32>
    tpu.vector_store %arg10[%c5, %c0_64, %c0_65], %83 {strides = array<i32>} : memref<9x4x256xf32, #tpu.memory_space<vmem>>, vector<1x4x256xf32>,
    %c0_66 = arith.constant 0 : index
    %c143 = arith.constant 143 : index
    %84 = vector.load %arg9[%c0_66, %c143] : memref<4x512xf32, #tpu.memory_space<vmem>>, vector<4x256xf32>
    %85 = vector.broadcast %4 : vector<1x256xf32> to vector<4x256xf32>
    %86 = arith.mulf %84, %85 : vector<4x256xf32>
    %c6 = arith.constant 6 : index
    %c0_67 = arith.constant 0 : index
    %c0_68 = arith.constant 0 : index
    %87 = vector.load %arg10[%c6, %c0_67, %c0_68] : memref<9x4x256xf32, #tpu.memory_space<vmem>>, vector<1x4x256xf32>
    %88 = vector.shape_cast %87 : vector<1x4x256xf32> to vector<4x256xf32>
    %89 = vector.shape_cast %86 : vector<4x256xf32> to vector<1x4x256xf32>
    tpu.vector_store %arg10[%c6, %c0_67, %c0_68], %89 {strides = array<i32>} : memref<9x4x256xf32, #tpu.memory_space<vmem>>, vector<1x4x256xf32>,
    %c0_69 = arith.constant 0 : index
    %c144 = arith.constant 144 : index
    %90 = vector.load %arg9[%c0_69, %c144] : memref<4x512xf32, #tpu.memory_space<vmem>>, vector<4x256xf32>
    %c7 = arith.constant 7 : index
    %c0_70 = arith.constant 0 : index
    %c0_71 = arith.constant 0 : index
    %91 = vector.load %arg10[%c7, %c0_70, %c0_71] : memref<9x4x256xf32, #tpu.memory_space<vmem>>, vector<1x4x256xf32>
    %92 = vector.shape_cast %91 : vector<1x4x256xf32> to vector<4x256xf32>
    %93 = vector.shape_cast %90 : vector<4x256xf32> to vector<1x4x256xf32>
    tpu.vector_store %arg10[%c7, %c0_70, %c0_71], %93 {strides = array<i32>} : memref<9x4x256xf32, #tpu.memory_space<vmem>>, vector<1x4x256xf32>,
    %c0_72 = arith.constant 0 : index
    %c145 = arith.constant 145 : index
    %94 = vector.load %arg9[%c0_72, %c145] : memref<4x512xf32, #tpu.memory_space<vmem>>, vector<4x256xf32>
    %95 = vector.broadcast %5 : vector<1x256xf32> to vector<4x256xf32>
    %96 = arith.mulf %94, %95 : vector<4x256xf32>
    %c8 = arith.constant 8 : index
    %c0_73 = arith.constant 0 : index
    %c0_74 = arith.constant 0 : index
    %97 = vector.load %arg10[%c8, %c0_73, %c0_74] : memref<9x4x256xf32, #tpu.memory_space<vmem>>, vector<1x4x256xf32>
    %98 = vector.shape_cast %97 : vector<1x4x256xf32> to vector<4x256xf32>
    %99 = vector.shape_cast %96 : vector<4x256xf32> to vector<1x4x256xf32>
    tpu.vector_store %arg10[%c8, %c0_73, %c0_74], %99 {strides = array<i32>} : memref<9x4x256xf32, #tpu.memory_space<vmem>>, vector<1x4x256xf32>,
    %c0_75 = arith.constant 0 : index
    %c36 = arith.constant 36 : index
    %100 = vector.load %arg4[%c0_75, %c36] : memref<4x37xf32, #tpu.memory_space<vmem>>, vector<4x1xf32>
    %c0_76 = arith.constant 0 : index
    %c0_77 = arith.constant 0 : index
    %101 = vector.load %arg4[%c0_76, %c0_77] : memref<4x37xf32, #tpu.memory_space<vmem>>, vector<4x1xf32>
    %c0_78 = arith.constant 0 : index
    %c1_79 = arith.constant 1 : index
    %102 = vector.load %arg4[%c0_78, %c1_79] : memref<4x37xf32, #tpu.memory_space<vmem>>, vector<4x1xf32>
    %c0_80 = arith.constant 0 : index
    %c2_81 = arith.constant 2 : index
    %103 = vector.load %arg4[%c0_80, %c2_81] : memref<4x37xf32, #tpu.memory_space<vmem>>, vector<4x1xf32>
    %c0_82 = arith.constant 0 : index
    %c3_83 = arith.constant 3 : index
    %104 = vector.load %arg4[%c0_82, %c3_83] : memref<4x37xf32, #tpu.memory_space<vmem>>, vector<4x1xf32>
    %c0_84 = arith.constant 0 : index
    %c4_85 = arith.constant 4 : index
    %105 = vector.load %arg4[%c0_84, %c4_85] : memref<4x37xf32, #tpu.memory_space<vmem>>, vector<4x1xf32>
    %c0_86 = arith.constant 0 : index
    %c5_87 = arith.constant 5 : index
    %106 = vector.load %arg4[%c0_86, %c5_87] : memref<4x37xf32, #tpu.memory_space<vmem>>, vector<4x1xf32>
    %c0_88 = arith.constant 0 : index
    %c6_89 = arith.constant 6 : index
    %107 = vector.load %arg4[%c0_88, %c6_89] : memref<4x37xf32, #tpu.memory_space<vmem>>, vector<4x1xf32>
    %c0_90 = arith.constant 0 : index
    %c7_91 = arith.constant 7 : index
    %108 = vector.load %arg4[%c0_90, %c7_91] : memref<4x37xf32, #tpu.memory_space<vmem>>, vector<4x1xf32>
    %c0_92 = arith.constant 0 : index
    %c8_93 = arith.constant 8 : index
    %109 = vector.load %arg4[%c0_92, %c8_93] : memref<4x37xf32, #tpu.memory_space<vmem>>, vector<4x1xf32>
    %c0_94 = arith.constant 0 : index
    %c9 = arith.constant 9 : index
    %110 = vector.load %arg4[%c0_94, %c9] : memref<4x37xf32, #tpu.memory_space<vmem>>, vector<4x1xf32>
    %c0_95 = arith.constant 0 : index
    %c10 = arith.constant 10 : index
    %111 = vector.load %arg4[%c0_95, %c10] : memref<4x37xf32, #tpu.memory_space<vmem>>, vector<4x1xf32>
    %c0_96 = arith.constant 0 : index
    %c11 = arith.constant 11 : index
    %112 = vector.load %arg4[%c0_96, %c11] : memref<4x37xf32, #tpu.memory_space<vmem>>, vector<4x1xf32>
    %c0_97 = arith.constant 0 : index
    %c12 = arith.constant 12 : index
    %113 = vector.load %arg4[%c0_97, %c12] : memref<4x37xf32, #tpu.memory_space<vmem>>, vector<4x1xf32>
    %c0_98 = arith.constant 0 : index
    %c13 = arith.constant 13 : index
    %114 = vector.load %arg4[%c0_98, %c13] : memref<4x37xf32, #tpu.memory_space<vmem>>, vector<4x1xf32>
    %c0_99 = arith.constant 0 : index
    %c14 = arith.constant 14 : index
    %115 = vector.load %arg4[%c0_99, %c14] : memref<4x37xf32, #tpu.memory_space<vmem>>, vector<4x1xf32>
    %c0_100 = arith.constant 0 : index
    %c15 = arith.constant 15 : index
    %116 = vector.load %arg4[%c0_100, %c15] : memref<4x37xf32, #tpu.memory_space<vmem>>, vector<4x1xf32>
    %c0_101 = arith.constant 0 : index
    %c16 = arith.constant 16 : index
    %117 = vector.load %arg4[%c0_101, %c16] : memref<4x37xf32, #tpu.memory_space<vmem>>, vector<4x1xf32>
    %c0_102 = arith.constant 0 : index
    %c17 = arith.constant 17 : index
    %118 = vector.load %arg4[%c0_102, %c17] : memref<4x37xf32, #tpu.memory_space<vmem>>, vector<4x1xf32>
    %c0_103 = arith.constant 0 : index
    %c18 = arith.constant 18 : index
    %119 = vector.load %arg4[%c0_103, %c18] : memref<4x37xf32, #tpu.memory_space<vmem>>, vector<4x1xf32>
    %c0_104 = arith.constant 0 : index
    %c19 = arith.constant 19 : index
    %120 = vector.load %arg4[%c0_104, %c19] : memref<4x37xf32, #tpu.memory_space<vmem>>, vector<4x1xf32>
    %c0_105 = arith.constant 0 : index
    %c20 = arith.constant 20 : index
    %121 = vector.load %arg4[%c0_105, %c20] : memref<4x37xf32, #tpu.memory_space<vmem>>, vector<4x1xf32>
    %c0_106 = arith.constant 0 : index
    %c21 = arith.constant 21 : index
    %122 = vector.load %arg4[%c0_106, %c21] : memref<4x37xf32, #tpu.memory_space<vmem>>, vector<4x1xf32>
    %c0_107 = arith.constant 0 : index
    %c22 = arith.constant 22 : index
    %123 = vector.load %arg4[%c0_107, %c22] : memref<4x37xf32, #tpu.memory_space<vmem>>, vector<4x1xf32>
    %c0_108 = arith.constant 0 : index
    %c23 = arith.constant 23 : index
    %124 = vector.load %arg4[%c0_108, %c23] : memref<4x37xf32, #tpu.memory_space<vmem>>, vector<4x1xf32>
    %c0_109 = arith.constant 0 : index
    %c24 = arith.constant 24 : index
    %125 = vector.load %arg4[%c0_109, %c24] : memref<4x37xf32, #tpu.memory_space<vmem>>, vector<4x1xf32>
    %c0_110 = arith.constant 0 : index
    %c25 = arith.constant 25 : index
    %126 = vector.load %arg4[%c0_110, %c25] : memref<4x37xf32, #tpu.memory_space<vmem>>, vector<4x1xf32>
    %c0_111 = arith.constant 0 : index
    %c26 = arith.constant 26 : index
    %127 = vector.load %arg4[%c0_111, %c26] : memref<4x37xf32, #tpu.memory_space<vmem>>, vector<4x1xf32>
    %c0_112 = arith.constant 0 : index
    %c27 = arith.constant 27 : index
    %128 = vector.load %arg4[%c0_112, %c27] : memref<4x37xf32, #tpu.memory_space<vmem>>, vector<4x1xf32>
    %c0_113 = arith.constant 0 : index
    %c28 = arith.constant 28 : index
    %129 = vector.load %arg4[%c0_113, %c28] : memref<4x37xf32, #tpu.memory_space<vmem>>, vector<4x1xf32>
    %c0_114 = arith.constant 0 : index
    %c29 = arith.constant 29 : index
    %130 = vector.load %arg4[%c0_114, %c29] : memref<4x37xf32, #tpu.memory_space<vmem>>, vector<4x1xf32>
    %c0_115 = arith.constant 0 : index
    %c30 = arith.constant 30 : index
    %131 = vector.load %arg4[%c0_115, %c30] : memref<4x37xf32, #tpu.memory_space<vmem>>, vector<4x1xf32>
    %c0_116 = arith.constant 0 : index
    %c31 = arith.constant 31 : index
    %132 = vector.load %arg4[%c0_116, %c31] : memref<4x37xf32, #tpu.memory_space<vmem>>, vector<4x1xf32>
    %c0_117 = arith.constant 0 : index
    %c32 = arith.constant 32 : index
    %133 = vector.load %arg4[%c0_117, %c32] : memref<4x37xf32, #tpu.memory_space<vmem>>, vector<4x1xf32>
    %c0_118 = arith.constant 0 : index
    %c33 = arith.constant 33 : index
    %134 = vector.load %arg4[%c0_118, %c33] : memref<4x37xf32, #tpu.memory_space<vmem>>, vector<4x1xf32>
    %c0_119 = arith.constant 0 : index
    %c34 = arith.constant 34 : index
    %135 = vector.load %arg4[%c0_119, %c34] : memref<4x37xf32, #tpu.memory_space<vmem>>, vector<4x1xf32>
    %c0_120 = arith.constant 0 : index
    %c35 = arith.constant 35 : index
    %136 = vector.load %arg4[%c0_120, %c35] : memref<4x37xf32, #tpu.memory_space<vmem>>, vector<4x1xf32>
    %c0_121 = arith.constant 0 : index
    %c0_122 = arith.constant 0 : index
    %c0_123 = arith.constant 0 : index
    %137 = vector.load %arg10[%c0_121, %c0_122, %c0_123] : memref<9x4x256xf32, #tpu.memory_space<vmem>>, vector<1x1x256xf32>
    %138 = vector.shape_cast %137 : vector<1x1x256xf32> to vector<1x256xf32>
    %139 = vector.broadcast %101 : vector<4x1xf32> to vector<4x256xf32>
    %140 = vector.broadcast %138 : vector<1x256xf32> to vector<4x256xf32>
    %141 = arith.mulf %139, %140 : vector<4x256xf32>
    %c0_124 = arith.constant 0 : index
    %c1_125 = arith.constant 1 : index
    %c0_126 = arith.constant 0 : index
    %142 = vector.load %arg10[%c0_124, %c1_125, %c0_126] : memref<9x4x256xf32, #tpu.memory_space<vmem>>, vector<1x1x256xf32>
    %143 = vector.shape_cast %142 : vector<1x1x256xf32> to vector<1x256xf32>
    %144 = vector.broadcast %102 : vector<4x1xf32> to vector<4x256xf32>
    %145 = vector.broadcast %143 : vector<1x256xf32> to vector<4x256xf32>
    %146 = arith.mulf %144, %145 : vector<4x256xf32>
    %c0_127 = arith.constant 0 : index
    %c2_128 = arith.constant 2 : index
    %c0_129 = arith.constant 0 : index
    %147 = vector.load %arg10[%c0_127, %c2_128, %c0_129] : memref<9x4x256xf32, #tpu.memory_space<vmem>>, vector<1x1x256xf32>
    %148 = vector.shape_cast %147 : vector<1x1x256xf32> to vector<1x256xf32>
    %149 = vector.broadcast %103 : vector<4x1xf32> to vector<4x256xf32>
    %150 = vector.broadcast %148 : vector<1x256xf32> to vector<4x256xf32>
    %151 = arith.mulf %149, %150 : vector<4x256xf32>
    %c0_130 = arith.constant 0 : index
    %c3_131 = arith.constant 3 : index
    %c0_132 = arith.constant 0 : index
    %152 = vector.load %arg10[%c0_130, %c3_131, %c0_132] : memref<9x4x256xf32, #tpu.memory_space<vmem>>, vector<1x1x256xf32>
    %153 = vector.shape_cast %152 : vector<1x1x256xf32> to vector<1x256xf32>
    %154 = vector.broadcast %104 : vector<4x1xf32> to vector<4x256xf32>
    %155 = vector.broadcast %153 : vector<1x256xf32> to vector<4x256xf32>
    %156 = arith.mulf %154, %155 : vector<4x256xf32>
    %c1_133 = arith.constant 1 : index
    %c0_134 = arith.constant 0 : index
    %c0_135 = arith.constant 0 : index
    %157 = vector.load %arg10[%c1_133, %c0_134, %c0_135] : memref<9x4x256xf32, #tpu.memory_space<vmem>>, vector<1x1x256xf32>
    %158 = vector.shape_cast %157 : vector<1x1x256xf32> to vector<1x256xf32>
    %159 = vector.broadcast %105 : vector<4x1xf32> to vector<4x256xf32>
    %160 = vector.broadcast %158 : vector<1x256xf32> to vector<4x256xf32>
    %161 = arith.mulf %159, %160 : vector<4x256xf32>
    %162 = arith.addf %141, %161 : vector<4x256xf32>
    %c1_136 = arith.constant 1 : index
    %c1_137 = arith.constant 1 : index
    %c0_138 = arith.constant 0 : index
    %163 = vector.load %arg10[%c1_136, %c1_137, %c0_138] : memref<9x4x256xf32, #tpu.memory_space<vmem>>, vector<1x1x256xf32>
    %164 = vector.shape_cast %163 : vector<1x1x256xf32> to vector<1x256xf32>
    %165 = vector.broadcast %106 : vector<4x1xf32> to vector<4x256xf32>
    %166 = vector.broadcast %164 : vector<1x256xf32> to vector<4x256xf32>
    %167 = arith.mulf %165, %166 : vector<4x256xf32>
    %168 = arith.addf %146, %167 : vector<4x256xf32>
    %c1_139 = arith.constant 1 : index
    %c2_140 = arith.constant 2 : index
    %c0_141 = arith.constant 0 : index
    %169 = vector.load %arg10[%c1_139, %c2_140, %c0_141] : memref<9x4x256xf32, #tpu.memory_space<vmem>>, vector<1x1x256xf32>
    %170 = vector.shape_cast %169 : vector<1x1x256xf32> to vector<1x256xf32>
    %171 = vector.broadcast %107 : vector<4x1xf32> to vector<4x256xf32>
    %172 = vector.broadcast %170 : vector<1x256xf32> to vector<4x256xf32>
    %173 = arith.mulf %171, %172 : vector<4x256xf32>
    %174 = arith.addf %151, %173 : vector<4x256xf32>
    %c1_142 = arith.constant 1 : index
    %c3_143 = arith.constant 3 : index
    %c0_144 = arith.constant 0 : index
    %175 = vector.load %arg10[%c1_142, %c3_143, %c0_144] : memref<9x4x256xf32, #tpu.memory_space<vmem>>, vector<1x1x256xf32>
    %176 = vector.shape_cast %175 : vector<1x1x256xf32> to vector<1x256xf32>
    %177 = vector.broadcast %108 : vector<4x1xf32> to vector<4x256xf32>
    %178 = vector.broadcast %176 : vector<1x256xf32> to vector<4x256xf32>
    %179 = arith.mulf %177, %178 : vector<4x256xf32>
    %180 = arith.addf %156, %179 : vector<4x256xf32>
    %c2_145 = arith.constant 2 : index
    %c0_146 = arith.constant 0 : index
    %c0_147 = arith.constant 0 : index
    %181 = vector.load %arg10[%c2_145, %c0_146, %c0_147] : memref<9x4x256xf32, #tpu.memory_space<vmem>>, vector<1x1x256xf32>
    %182 = vector.shape_cast %181 : vector<1x1x256xf32> to vector<1x256xf32>
    %183 = vector.broadcast %109 : vector<4x1xf32> to vector<4x256xf32>
    %184 = vector.broadcast %182 : vector<1x256xf32> to vector<4x256xf32>
    %185 = arith.mulf %183, %184 : vector<4x256xf32>
    %186 = arith.addf %162, %185 : vector<4x256xf32>
    %c2_148 = arith.constant 2 : index
    %c1_149 = arith.constant 1 : index
    %c0_150 = arith.constant 0 : index
    %187 = vector.load %arg10[%c2_148, %c1_149, %c0_150] : memref<9x4x256xf32, #tpu.memory_space<vmem>>, vector<1x1x256xf32>
    %188 = vector.shape_cast %187 : vector<1x1x256xf32> to vector<1x256xf32>
    %189 = vector.broadcast %110 : vector<4x1xf32> to vector<4x256xf32>
    %190 = vector.broadcast %188 : vector<1x256xf32> to vector<4x256xf32>
    %191 = arith.mulf %189, %190 : vector<4x256xf32>
    %192 = arith.addf %168, %191 : vector<4x256xf32>
    %c2_151 = arith.constant 2 : index
    %c2_152 = arith.constant 2 : index
    %c0_153 = arith.constant 0 : index
    %193 = vector.load %arg10[%c2_151, %c2_152, %c0_153] : memref<9x4x256xf32, #tpu.memory_space<vmem>>, vector<1x1x256xf32>
    %194 = vector.shape_cast %193 : vector<1x1x256xf32> to vector<1x256xf32>
    %195 = vector.broadcast %111 : vector<4x1xf32> to vector<4x256xf32>
    %196 = vector.broadcast %194 : vector<1x256xf32> to vector<4x256xf32>
    %197 = arith.mulf %195, %196 : vector<4x256xf32>
    %198 = arith.addf %174, %197 : vector<4x256xf32>
    %c2_154 = arith.constant 2 : index
    %c3_155 = arith.constant 3 : index
    %c0_156 = arith.constant 0 : index
    %199 = vector.load %arg10[%c2_154, %c3_155, %c0_156] : memref<9x4x256xf32, #tpu.memory_space<vmem>>, vector<1x1x256xf32>
    %200 = vector.shape_cast %199 : vector<1x1x256xf32> to vector<1x256xf32>
    %201 = vector.broadcast %112 : vector<4x1xf32> to vector<4x256xf32>
    %202 = vector.broadcast %200 : vector<1x256xf32> to vector<4x256xf32>
    %203 = arith.mulf %201, %202 : vector<4x256xf32>
    %204 = arith.addf %180, %203 : vector<4x256xf32>
    %c3_157 = arith.constant 3 : index
    %c0_158 = arith.constant 0 : index
    %c0_159 = arith.constant 0 : index
    %205 = vector.load %arg10[%c3_157, %c0_158, %c0_159] : memref<9x4x256xf32, #tpu.memory_space<vmem>>, vector<1x1x256xf32>
    %206 = vector.shape_cast %205 : vector<1x1x256xf32> to vector<1x256xf32>
    %207 = vector.broadcast %113 : vector<4x1xf32> to vector<4x256xf32>
    %208 = vector.broadcast %206 : vector<1x256xf32> to vector<4x256xf32>
    %209 = arith.mulf %207, %208 : vector<4x256xf32>
    %210 = arith.addf %186, %209 : vector<4x256xf32>
    %c3_160 = arith.constant 3 : index
    %c1_161 = arith.constant 1 : index
    %c0_162 = arith.constant 0 : index
    %211 = vector.load %arg10[%c3_160, %c1_161, %c0_162] : memref<9x4x256xf32, #tpu.memory_space<vmem>>, vector<1x1x256xf32>
    %212 = vector.shape_cast %211 : vector<1x1x256xf32> to vector<1x256xf32>
    %213 = vector.broadcast %114 : vector<4x1xf32> to vector<4x256xf32>
    %214 = vector.broadcast %212 : vector<1x256xf32> to vector<4x256xf32>
    %215 = arith.mulf %213, %214 : vector<4x256xf32>
    %216 = arith.addf %192, %215 : vector<4x256xf32>
    %c3_163 = arith.constant 3 : index
    %c2_164 = arith.constant 2 : index
    %c0_165 = arith.constant 0 : index
    %217 = vector.load %arg10[%c3_163, %c2_164, %c0_165] : memref<9x4x256xf32, #tpu.memory_space<vmem>>, vector<1x1x256xf32>
    %218 = vector.shape_cast %217 : vector<1x1x256xf32> to vector<1x256xf32>
    %219 = vector.broadcast %115 : vector<4x1xf32> to vector<4x256xf32>
    %220 = vector.broadcast %218 : vector<1x256xf32> to vector<4x256xf32>
    %221 = arith.mulf %219, %220 : vector<4x256xf32>
    %222 = arith.addf %198, %221 : vector<4x256xf32>
    %c3_166 = arith.constant 3 : index
    %c3_167 = arith.constant 3 : index
    %c0_168 = arith.constant 0 : index
    %223 = vector.load %arg10[%c3_166, %c3_167, %c0_168] : memref<9x4x256xf32, #tpu.memory_space<vmem>>, vector<1x1x256xf32>
    %224 = vector.shape_cast %223 : vector<1x1x256xf32> to vector<1x256xf32>
    %225 = vector.broadcast %116 : vector<4x1xf32> to vector<4x256xf32>
    %226 = vector.broadcast %224 : vector<1x256xf32> to vector<4x256xf32>
    %227 = arith.mulf %225, %226 : vector<4x256xf32>
    %228 = arith.addf %204, %227 : vector<4x256xf32>
    %c4_169 = arith.constant 4 : index
    %c0_170 = arith.constant 0 : index
    %c0_171 = arith.constant 0 : index
    %229 = vector.load %arg10[%c4_169, %c0_170, %c0_171] : memref<9x4x256xf32, #tpu.memory_space<vmem>>, vector<1x1x256xf32>
    %230 = vector.shape_cast %229 : vector<1x1x256xf32> to vector<1x256xf32>
    %231 = vector.broadcast %117 : vector<4x1xf32> to vector<4x256xf32>
    %232 = vector.broadcast %230 : vector<1x256xf32> to vector<4x256xf32>
    %233 = arith.mulf %231, %232 : vector<4x256xf32>
    %234 = arith.addf %210, %233 : vector<4x256xf32>
    %c4_172 = arith.constant 4 : index
    %c1_173 = arith.constant 1 : index
    %c0_174 = arith.constant 0 : index
    %235 = vector.load %arg10[%c4_172, %c1_173, %c0_174] : memref<9x4x256xf32, #tpu.memory_space<vmem>>, vector<1x1x256xf32>
    %236 = vector.shape_cast %235 : vector<1x1x256xf32> to vector<1x256xf32>
    %237 = vector.broadcast %118 : vector<4x1xf32> to vector<4x256xf32>
    %238 = vector.broadcast %236 : vector<1x256xf32> to vector<4x256xf32>
    %239 = arith.mulf %237, %238 : vector<4x256xf32>
    %240 = arith.addf %216, %239 : vector<4x256xf32>
    %c4_175 = arith.constant 4 : index
    %c2_176 = arith.constant 2 : index
    %c0_177 = arith.constant 0 : index
    %241 = vector.load %arg10[%c4_175, %c2_176, %c0_177] : memref<9x4x256xf32, #tpu.memory_space<vmem>>, vector<1x1x256xf32>
    %242 = vector.shape_cast %241 : vector<1x1x256xf32> to vector<1x256xf32>
    %243 = vector.broadcast %119 : vector<4x1xf32> to vector<4x256xf32>
    %244 = vector.broadcast %242 : vector<1x256xf32> to vector<4x256xf32>
    %245 = arith.mulf %243, %244 : vector<4x256xf32>
    %246 = arith.addf %222, %245 : vector<4x256xf32>
    %c4_178 = arith.constant 4 : index
    %c3_179 = arith.constant 3 : index
    %c0_180 = arith.constant 0 : index
    %247 = vector.load %arg10[%c4_178, %c3_179, %c0_180] : memref<9x4x256xf32, #tpu.memory_space<vmem>>, vector<1x1x256xf32>
    %248 = vector.shape_cast %247 : vector<1x1x256xf32> to vector<1x256xf32>
    %249 = vector.broadcast %120 : vector<4x1xf32> to vector<4x256xf32>
    %250 = vector.broadcast %248 : vector<1x256xf32> to vector<4x256xf32>
    %251 = arith.mulf %249, %250 : vector<4x256xf32>
    %252 = arith.addf %228, %251 : vector<4x256xf32>
    %c5_181 = arith.constant 5 : index
    %c0_182 = arith.constant 0 : index
    %c0_183 = arith.constant 0 : index
    %253 = vector.load %arg10[%c5_181, %c0_182, %c0_183] : memref<9x4x256xf32, #tpu.memory_space<vmem>>, vector<1x1x256xf32>
    %254 = vector.shape_cast %253 : vector<1x1x256xf32> to vector<1x256xf32>
    %255 = vector.broadcast %121 : vector<4x1xf32> to vector<4x256xf32>
    %256 = vector.broadcast %254 : vector<1x256xf32> to vector<4x256xf32>
    %257 = arith.mulf %255, %256 : vector<4x256xf32>
    %258 = arith.addf %234, %257 : vector<4x256xf32>
    %c5_184 = arith.constant 5 : index
    %c1_185 = arith.constant 1 : index
    %c0_186 = arith.constant 0 : index
    %259 = vector.load %arg10[%c5_184, %c1_185, %c0_186] : memref<9x4x256xf32, #tpu.memory_space<vmem>>, vector<1x1x256xf32>
    %260 = vector.shape_cast %259 : vector<1x1x256xf32> to vector<1x256xf32>
    %261 = vector.broadcast %122 : vector<4x1xf32> to vector<4x256xf32>
    %262 = vector.broadcast %260 : vector<1x256xf32> to vector<4x256xf32>
    %263 = arith.mulf %261, %262 : vector<4x256xf32>
    %264 = arith.addf %240, %263 : vector<4x256xf32>
    %c5_187 = arith.constant 5 : index
    %c2_188 = arith.constant 2 : index
    %c0_189 = arith.constant 0 : index
    %265 = vector.load %arg10[%c5_187, %c2_188, %c0_189] : memref<9x4x256xf32, #tpu.memory_space<vmem>>, vector<1x1x256xf32>
    %266 = vector.shape_cast %265 : vector<1x1x256xf32> to vector<1x256xf32>
    %267 = vector.broadcast %123 : vector<4x1xf32> to vector<4x256xf32>
    %268 = vector.broadcast %266 : vector<1x256xf32> to vector<4x256xf32>
    %269 = arith.mulf %267, %268 : vector<4x256xf32>
    %270 = arith.addf %246, %269 : vector<4x256xf32>
    %c5_190 = arith.constant 5 : index
    %c3_191 = arith.constant 3 : index
    %c0_192 = arith.constant 0 : index
    %271 = vector.load %arg10[%c5_190, %c3_191, %c0_192] : memref<9x4x256xf32, #tpu.memory_space<vmem>>, vector<1x1x256xf32>
    %272 = vector.shape_cast %271 : vector<1x1x256xf32> to vector<1x256xf32>
    %273 = vector.broadcast %124 : vector<4x1xf32> to vector<4x256xf32>
    %274 = vector.broadcast %272 : vector<1x256xf32> to vector<4x256xf32>
    %275 = arith.mulf %273, %274 : vector<4x256xf32>
    %276 = arith.addf %252, %275 : vector<4x256xf32>
    %c6_193 = arith.constant 6 : index
    %c0_194 = arith.constant 0 : index
    %c0_195 = arith.constant 0 : index
    %277 = vector.load %arg10[%c6_193, %c0_194, %c0_195] : memref<9x4x256xf32, #tpu.memory_space<vmem>>, vector<1x1x256xf32>
    %278 = vector.shape_cast %277 : vector<1x1x256xf32> to vector<1x256xf32>
    %279 = vector.broadcast %125 : vector<4x1xf32> to vector<4x256xf32>
    %280 = vector.broadcast %278 : vector<1x256xf32> to vector<4x256xf32>
    %281 = arith.mulf %279, %280 : vector<4x256xf32>
    %282 = arith.addf %258, %281 : vector<4x256xf32>
    %c6_196 = arith.constant 6 : index
    %c1_197 = arith.constant 1 : index
    %c0_198 = arith.constant 0 : index
    %283 = vector.load %arg10[%c6_196, %c1_197, %c0_198] : memref<9x4x256xf32, #tpu.memory_space<vmem>>, vector<1x1x256xf32>
    %284 = vector.shape_cast %283 : vector<1x1x256xf32> to vector<1x256xf32>
    %285 = vector.broadcast %126 : vector<4x1xf32> to vector<4x256xf32>
    %286 = vector.broadcast %284 : vector<1x256xf32> to vector<4x256xf32>
    %287 = arith.mulf %285, %286 : vector<4x256xf32>
    %288 = arith.addf %264, %287 : vector<4x256xf32>
    %c6_199 = arith.constant 6 : index
    %c2_200 = arith.constant 2 : index
    %c0_201 = arith.constant 0 : index
    %289 = vector.load %arg10[%c6_199, %c2_200, %c0_201] : memref<9x4x256xf32, #tpu.memory_space<vmem>>, vector<1x1x256xf32>
    %290 = vector.shape_cast %289 : vector<1x1x256xf32> to vector<1x256xf32>
    %291 = vector.broadcast %127 : vector<4x1xf32> to vector<4x256xf32>
    %292 = vector.broadcast %290 : vector<1x256xf32> to vector<4x256xf32>
    %293 = arith.mulf %291, %292 : vector<4x256xf32>
    %294 = arith.addf %270, %293 : vector<4x256xf32>
    %c6_202 = arith.constant 6 : index
    %c3_203 = arith.constant 3 : index
    %c0_204 = arith.constant 0 : index
    %295 = vector.load %arg10[%c6_202, %c3_203, %c0_204] : memref<9x4x256xf32, #tpu.memory_space<vmem>>, vector<1x1x256xf32>
    %296 = vector.shape_cast %295 : vector<1x1x256xf32> to vector<1x256xf32>
    %297 = vector.broadcast %128 : vector<4x1xf32> to vector<4x256xf32>
    %298 = vector.broadcast %296 : vector<1x256xf32> to vector<4x256xf32>
    %299 = arith.mulf %297, %298 : vector<4x256xf32>
    %300 = arith.addf %276, %299 : vector<4x256xf32>
    %c7_205 = arith.constant 7 : index
    %c0_206 = arith.constant 0 : index
    %c0_207 = arith.constant 0 : index
    %301 = vector.load %arg10[%c7_205, %c0_206, %c0_207] : memref<9x4x256xf32, #tpu.memory_space<vmem>>, vector<1x1x256xf32>
    %302 = vector.shape_cast %301 : vector<1x1x256xf32> to vector<1x256xf32>
    %303 = vector.broadcast %129 : vector<4x1xf32> to vector<4x256xf32>
    %304 = vector.broadcast %302 : vector<1x256xf32> to vector<4x256xf32>
    %305 = arith.mulf %303, %304 : vector<4x256xf32>
    %306 = arith.addf %282, %305 : vector<4x256xf32>
    %c7_208 = arith.constant 7 : index
    %c1_209 = arith.constant 1 : index
    %c0_210 = arith.constant 0 : index
    %307 = vector.load %arg10[%c7_208, %c1_209, %c0_210] : memref<9x4x256xf32, #tpu.memory_space<vmem>>, vector<1x1x256xf32>
    %308 = vector.shape_cast %307 : vector<1x1x256xf32> to vector<1x256xf32>
    %309 = vector.broadcast %130 : vector<4x1xf32> to vector<4x256xf32>
    %310 = vector.broadcast %308 : vector<1x256xf32> to vector<4x256xf32>
    %311 = arith.mulf %309, %310 : vector<4x256xf32>
    %312 = arith.addf %288, %311 : vector<4x256xf32>
    %c7_211 = arith.constant 7 : index
    %c2_212 = arith.constant 2 : index
    %c0_213 = arith.constant 0 : index
    %313 = vector.load %arg10[%c7_211, %c2_212, %c0_213] : memref<9x4x256xf32, #tpu.memory_space<vmem>>, vector<1x1x256xf32>
    %314 = vector.shape_cast %313 : vector<1x1x256xf32> to vector<1x256xf32>
    %315 = vector.broadcast %131 : vector<4x1xf32> to vector<4x256xf32>
    %316 = vector.broadcast %314 : vector<1x256xf32> to vector<4x256xf32>
    %317 = arith.mulf %315, %316 : vector<4x256xf32>
    %318 = arith.addf %294, %317 : vector<4x256xf32>
    %c7_214 = arith.constant 7 : index
    %c3_215 = arith.constant 3 : index
    %c0_216 = arith.constant 0 : index
    %319 = vector.load %arg10[%c7_214, %c3_215, %c0_216] : memref<9x4x256xf32, #tpu.memory_space<vmem>>, vector<1x1x256xf32>
    %320 = vector.shape_cast %319 : vector<1x1x256xf32> to vector<1x256xf32>
    %321 = vector.broadcast %132 : vector<4x1xf32> to vector<4x256xf32>
    %322 = vector.broadcast %320 : vector<1x256xf32> to vector<4x256xf32>
    %323 = arith.mulf %321, %322 : vector<4x256xf32>
    %324 = arith.addf %300, %323 : vector<4x256xf32>
    %c8_217 = arith.constant 8 : index
    %c0_218 = arith.constant 0 : index
    %c0_219 = arith.constant 0 : index
    %325 = vector.load %arg10[%c8_217, %c0_218, %c0_219] : memref<9x4x256xf32, #tpu.memory_space<vmem>>, vector<1x1x256xf32>
    %326 = vector.shape_cast %325 : vector<1x1x256xf32> to vector<1x256xf32>
    %327 = vector.broadcast %133 : vector<4x1xf32> to vector<4x256xf32>
    %328 = vector.broadcast %326 : vector<1x256xf32> to vector<4x256xf32>
    %329 = arith.mulf %327, %328 : vector<4x256xf32>
    %330 = arith.addf %306, %329 : vector<4x256xf32>
    %c8_220 = arith.constant 8 : index
    %c1_221 = arith.constant 1 : index
    %c0_222 = arith.constant 0 : index
    %331 = vector.load %arg10[%c8_220, %c1_221, %c0_222] : memref<9x4x256xf32, #tpu.memory_space<vmem>>, vector<1x1x256xf32>
    %332 = vector.shape_cast %331 : vector<1x1x256xf32> to vector<1x256xf32>
    %333 = vector.broadcast %134 : vector<4x1xf32> to vector<4x256xf32>
    %334 = vector.broadcast %332 : vector<1x256xf32> to vector<4x256xf32>
    %335 = arith.mulf %333, %334 : vector<4x256xf32>
    %336 = arith.addf %312, %335 : vector<4x256xf32>
    %c8_223 = arith.constant 8 : index
    %c2_224 = arith.constant 2 : index
    %c0_225 = arith.constant 0 : index
    %337 = vector.load %arg10[%c8_223, %c2_224, %c0_225] : memref<9x4x256xf32, #tpu.memory_space<vmem>>, vector<1x1x256xf32>
    %338 = vector.shape_cast %337 : vector<1x1x256xf32> to vector<1x256xf32>
    %339 = vector.broadcast %135 : vector<4x1xf32> to vector<4x256xf32>
    %340 = vector.broadcast %338 : vector<1x256xf32> to vector<4x256xf32>
    %341 = arith.mulf %339, %340 : vector<4x256xf32>
    %342 = arith.addf %318, %341 : vector<4x256xf32>
    %c8_226 = arith.constant 8 : index
    %c3_227 = arith.constant 3 : index
    %c0_228 = arith.constant 0 : index
    %343 = vector.load %arg10[%c8_226, %c3_227, %c0_228] : memref<9x4x256xf32, #tpu.memory_space<vmem>>, vector<1x1x256xf32>
    %344 = vector.shape_cast %343 : vector<1x1x256xf32> to vector<1x256xf32>
    %345 = vector.broadcast %136 : vector<4x1xf32> to vector<4x256xf32>
    %346 = vector.broadcast %344 : vector<1x256xf32> to vector<4x256xf32>
    %347 = arith.mulf %345, %346 : vector<4x256xf32>
    %348 = arith.addf %324, %347 : vector<4x256xf32>
    %349 = arith.addf %330, %336 : vector<4x256xf32>
    %350 = arith.addf %342, %348 : vector<4x256xf32>
    %351 = arith.addf %349, %350 : vector<4x256xf32>
    %352 = vector.broadcast %100 : vector<4x1xf32> to vector<4x256xf32>
    %353 = arith.addf %351, %352 : vector<4x256xf32>
    %c1_229 = arith.constant 1 : index
    %c0_230 = arith.constant 0 : index
    %c0_231 = arith.constant 0 : index
    %354 = vector.load %arg8[%c1_229, %c0_230, %c0_231] : memref<4x4x256xf32, #tpu.memory_space<vmem>>, vector<1x4x256xf32>
    %355 = vector.shape_cast %354 : vector<1x4x256xf32> to vector<4x256xf32>
    %356 = vector.shape_cast %353 : vector<4x256xf32> to vector<1x4x256xf32>
    tpu.vector_store %arg8[%c1_229, %c0_230, %c0_231], %356 {strides = array<i32>} : memref<4x4x256xf32, #tpu.memory_space<vmem>>, vector<1x4x256xf32>,
    %c0_232 = arith.constant 0 : index
    %c0_233 = arith.constant 0 : index
    %c0_234 = arith.constant 0 : index
    %357 = vector.load %arg8[%c0_232, %c0_233, %c0_234] : memref<4x4x256xf32, #tpu.memory_space<vmem>>, vector<1x4x256xf32>
    %358 = vector.shape_cast %357 : vector<1x4x256xf32> to vector<4x256xf32>
    %cst_235 = arith.constant 0.000000e+00 : f32
    %359 = vector.broadcast %cst_235 : f32 to vector<4x256xf32>
    %360 = arith.maximumf %358, %359 : vector<4x256xf32>
    %c0_236 = arith.constant 0 : index
    %c0_237 = arith.constant 0 : index
    %c0_238 = arith.constant 0 : index
    %361 = vector.load %arg10[%c0_236, %c0_237, %c0_238] : memref<9x4x256xf32, #tpu.memory_space<vmem>>, vector<1x4x256xf32>
    %362 = vector.shape_cast %361 : vector<1x4x256xf32> to vector<4x256xf32>
    %363 = vector.shape_cast %360 : vector<4x256xf32> to vector<1x4x256xf32>
    tpu.vector_store %arg10[%c0_236, %c0_237, %c0_238], %363 {strides = array<i32>} : memref<9x4x256xf32, #tpu.memory_space<vmem>>, vector<1x4x256xf32>,
    %c0_239 = arith.constant 0 : index
    %c4_240 = arith.constant 4 : index
    %364 = vector.load %arg5[%c0_239, %c4_240] : memref<4x5xf32, #tpu.memory_space<vmem>>, vector<4x1xf32>
    %c0_241 = arith.constant 0 : index
    %c0_242 = arith.constant 0 : index
    %365 = vector.load %arg5[%c0_241, %c0_242] : memref<4x5xf32, #tpu.memory_space<vmem>>, vector<4x1xf32>
    %c0_243 = arith.constant 0 : index
    %c1_244 = arith.constant 1 : index
    %366 = vector.load %arg5[%c0_243, %c1_244] : memref<4x5xf32, #tpu.memory_space<vmem>>, vector<4x1xf32>
    %c0_245 = arith.constant 0 : index
    %c2_246 = arith.constant 2 : index
    %367 = vector.load %arg5[%c0_245, %c2_246] : memref<4x5xf32, #tpu.memory_space<vmem>>, vector<4x1xf32>
    %c0_247 = arith.constant 0 : index
    %c3_248 = arith.constant 3 : index
    %368 = vector.load %arg5[%c0_247, %c3_248] : memref<4x5xf32, #tpu.memory_space<vmem>>, vector<4x1xf32>
    %c0_249 = arith.constant 0 : index
    %c0_250 = arith.constant 0 : index
    %c0_251 = arith.constant 0 : index
    %369 = vector.load %arg10[%c0_249, %c0_250, %c0_251] : memref<9x4x256xf32, #tpu.memory_space<vmem>>, vector<1x1x256xf32>
    %370 = vector.shape_cast %369 : vector<1x1x256xf32> to vector<1x256xf32>
    %371 = vector.broadcast %365 : vector<4x1xf32> to vector<4x256xf32>
    %372 = vector.broadcast %370 : vector<1x256xf32> to vector<4x256xf32>
    %373 = arith.mulf %371, %372 : vector<4x256xf32>
    %c0_252 = arith.constant 0 : index
    %c1_253 = arith.constant 1 : index
    %c0_254 = arith.constant 0 : index
    %374 = vector.load %arg10[%c0_252, %c1_253, %c0_254] : memref<9x4x256xf32, #tpu.memory_space<vmem>>, vector<1x1x256xf32>
    %375 = vector.shape_cast %374 : vector<1x1x256xf32> to vector<1x256xf32>
    %376 = vector.broadcast %366 : vector<4x1xf32> to vector<4x256xf32>
    %377 = vector.broadcast %375 : vector<1x256xf32> to vector<4x256xf32>
    %378 = arith.mulf %376, %377 : vector<4x256xf32>
    %c0_255 = arith.constant 0 : index
    %c2_256 = arith.constant 2 : index
    %c0_257 = arith.constant 0 : index
    %379 = vector.load %arg10[%c0_255, %c2_256, %c0_257] : memref<9x4x256xf32, #tpu.memory_space<vmem>>, vector<1x1x256xf32>
    %380 = vector.shape_cast %379 : vector<1x1x256xf32> to vector<1x256xf32>
    %381 = vector.broadcast %367 : vector<4x1xf32> to vector<4x256xf32>
    %382 = vector.broadcast %380 : vector<1x256xf32> to vector<4x256xf32>
    %383 = arith.mulf %381, %382 : vector<4x256xf32>
    %c0_258 = arith.constant 0 : index
    %c3_259 = arith.constant 3 : index
    %c0_260 = arith.constant 0 : index
    %384 = vector.load %arg10[%c0_258, %c3_259, %c0_260] : memref<9x4x256xf32, #tpu.memory_space<vmem>>, vector<1x1x256xf32>
    %385 = vector.shape_cast %384 : vector<1x1x256xf32> to vector<1x256xf32>
    %386 = vector.broadcast %368 : vector<4x1xf32> to vector<4x256xf32>
    %387 = vector.broadcast %385 : vector<1x256xf32> to vector<4x256xf32>
    %388 = arith.mulf %386, %387 : vector<4x256xf32>
    %389 = arith.addf %373, %378 : vector<4x256xf32>
    %390 = arith.addf %383, %388 : vector<4x256xf32>
    %391 = arith.addf %389, %390 : vector<4x256xf32>
    %392 = vector.broadcast %364 : vector<4x1xf32> to vector<4x256xf32>
    %393 = arith.addf %391, %392 : vector<4x256xf32>
    %c2_261 = arith.constant 2 : index
    %c0_262 = arith.constant 0 : index
    %c0_263 = arith.constant 0 : index
    %394 = vector.load %arg8[%c2_261, %c0_262, %c0_263] : memref<4x4x256xf32, #tpu.memory_space<vmem>>, vector<1x4x256xf32>
    %395 = vector.shape_cast %394 : vector<1x4x256xf32> to vector<4x256xf32>
    %396 = vector.shape_cast %393 : vector<4x256xf32> to vector<1x4x256xf32>
    tpu.vector_store %arg8[%c2_261, %c0_262, %c0_263], %396 {strides = array<i32>} : memref<4x4x256xf32, #tpu.memory_space<vmem>>, vector<1x4x256xf32>,
    %c1_264 = arith.constant 1 : index
    %c0_265 = arith.constant 0 : index
    %c0_266 = arith.constant 0 : index
    %397 = vector.load %arg8[%c1_264, %c0_265, %c0_266] : memref<4x4x256xf32, #tpu.memory_space<vmem>>, vector<1x4x256xf32>
    %398 = vector.shape_cast %397 : vector<1x4x256xf32> to vector<4x256xf32>
    %c2_267 = arith.constant 2 : index
    %c0_268 = arith.constant 0 : index
    %c0_269 = arith.constant 0 : index
    %399 = vector.load %arg8[%c2_267, %c0_268, %c0_269] : memref<4x4x256xf32, #tpu.memory_space<vmem>>, vector<1x4x256xf32>
    %400 = vector.shape_cast %399 : vector<1x4x256xf32> to vector<4x256xf32>
    %401 = arith.addf %400, %398 : vector<4x256xf32>
    %c2_270 = arith.constant 2 : index
    %c0_271 = arith.constant 0 : index
    %c0_272 = arith.constant 0 : index
    %402 = vector.load %arg8[%c2_270, %c0_271, %c0_272] : memref<4x4x256xf32, #tpu.memory_space<vmem>>, vector<1x4x256xf32>
    %403 = vector.shape_cast %402 : vector<1x4x256xf32> to vector<4x256xf32>
    %404 = vector.shape_cast %401 : vector<4x256xf32> to vector<1x4x256xf32>
    tpu.vector_store %arg8[%c2_270, %c0_271, %c0_272], %404 {strides = array<i32>} : memref<4x4x256xf32, #tpu.memory_space<vmem>>, vector<1x4x256xf32>,
    %c1_273 = arith.constant 1 : index
    %c0_274 = arith.constant 0 : index
    %c0_275 = arith.constant 0 : index
    %405 = vector.load %arg8[%c1_273, %c0_274, %c0_275] : memref<4x4x256xf32, #tpu.memory_space<vmem>>, vector<1x4x256xf32>
    %406 = vector.shape_cast %405 : vector<1x4x256xf32> to vector<4x256xf32>
    %cst_276 = arith.constant 0.000000e+00 : f32
    %407 = vector.broadcast %cst_276 : f32 to vector<4x256xf32>
    %408 = arith.maximumf %406, %407 : vector<4x256xf32>
    %c0_277 = arith.constant 0 : index
    %c128_278 = arith.constant 128 : index
    %409 = vector.load %arg9[%c0_277, %c128_278] : memref<4x512xf32, #tpu.memory_space<vmem>>, vector<4x256xf32>
    tpu.vector_store %arg9[%c0_277, %c128_278], %408 {strides = array<i32>} : memref<4x512xf32, #tpu.memory_space<vmem>>, vector<4x256xf32>,
    %c0_279 = arith.constant 0 : index
    %c111_280 = arith.constant 111 : index
    %410 = vector.load %arg9[%c0_279, %c111_280] : memref<4x512xf32, #tpu.memory_space<vmem>>, vector<4x256xf32>
    %411 = vector.broadcast %4 : vector<1x256xf32> to vector<4x256xf32>
    %412 = arith.mulf %410, %411 : vector<4x256xf32>
    %c0_281 = arith.constant 0 : index
    %c0_282 = arith.constant 0 : index
    %c0_283 = arith.constant 0 : index
    %413 = vector.load %arg10[%c0_281, %c0_282, %c0_283] : memref<9x4x256xf32, #tpu.memory_space<vmem>>, vector<1x4x256xf32>
    %414 = vector.shape_cast %413 : vector<1x4x256xf32> to vector<4x256xf32>
    %415 = vector.shape_cast %412 : vector<4x256xf32> to vector<1x4x256xf32>
    tpu.vector_store %arg10[%c0_281, %c0_282, %c0_283], %415 {strides = array<i32>} : memref<9x4x256xf32, #tpu.memory_space<vmem>>, vector<1x4x256xf32>,
    %c0_284 = arith.constant 0 : index
    %c112_285 = arith.constant 112 : index
    %416 = vector.load %arg9[%c0_284, %c112_285] : memref<4x512xf32, #tpu.memory_space<vmem>>, vector<4x256xf32>
    %c1_286 = arith.constant 1 : index
    %c0_287 = arith.constant 0 : index
    %c0_288 = arith.constant 0 : index
    %417 = vector.load %arg10[%c1_286, %c0_287, %c0_288] : memref<9x4x256xf32, #tpu.memory_space<vmem>>, vector<1x4x256xf32>
    %418 = vector.shape_cast %417 : vector<1x4x256xf32> to vector<4x256xf32>
    %419 = vector.shape_cast %416 : vector<4x256xf32> to vector<1x4x256xf32>
    tpu.vector_store %arg10[%c1_286, %c0_287, %c0_288], %419 {strides = array<i32>} : memref<9x4x256xf32, #tpu.memory_space<vmem>>, vector<1x4x256xf32>,
    %c0_289 = arith.constant 0 : index
    %c113_290 = arith.constant 113 : index
    %420 = vector.load %arg9[%c0_289, %c113_290] : memref<4x512xf32, #tpu.memory_space<vmem>>, vector<4x256xf32>
    %421 = vector.broadcast %5 : vector<1x256xf32> to vector<4x256xf32>
    %422 = arith.mulf %420, %421 : vector<4x256xf32>
    %c2_291 = arith.constant 2 : index
    %c0_292 = arith.constant 0 : index
    %c0_293 = arith.constant 0 : index
    %423 = vector.load %arg10[%c2_291, %c0_292, %c0_293] : memref<9x4x256xf32, #tpu.memory_space<vmem>>, vector<1x4x256xf32>
    %424 = vector.shape_cast %423 : vector<1x4x256xf32> to vector<4x256xf32>
    %425 = vector.shape_cast %422 : vector<4x256xf32> to vector<1x4x256xf32>
    tpu.vector_store %arg10[%c2_291, %c0_292, %c0_293], %425 {strides = array<i32>} : memref<9x4x256xf32, #tpu.memory_space<vmem>>, vector<1x4x256xf32>,
    %c0_294 = arith.constant 0 : index
    %c127_295 = arith.constant 127 : index
    %426 = vector.load %arg9[%c0_294, %c127_295] : memref<4x512xf32, #tpu.memory_space<vmem>>, vector<4x256xf32>
    %427 = vector.broadcast %4 : vector<1x256xf32> to vector<4x256xf32>
    %428 = arith.mulf %426, %427 : vector<4x256xf32>
    %c3_296 = arith.constant 3 : index
    %c0_297 = arith.constant 0 : index
    %c0_298 = arith.constant 0 : index
    %429 = vector.load %arg10[%c3_296, %c0_297, %c0_298] : memref<9x4x256xf32, #tpu.memory_space<vmem>>, vector<1x4x256xf32>
    %430 = vector.shape_cast %429 : vector<1x4x256xf32> to vector<4x256xf32>
    %431 = vector.shape_cast %428 : vector<4x256xf32> to vector<1x4x256xf32>
    tpu.vector_store %arg10[%c3_296, %c0_297, %c0_298], %431 {strides = array<i32>} : memref<9x4x256xf32, #tpu.memory_space<vmem>>, vector<1x4x256xf32>,
    %c0_299 = arith.constant 0 : index
    %c128_300 = arith.constant 128 : index
    %432 = vector.load %arg9[%c0_299, %c128_300] : memref<4x512xf32, #tpu.memory_space<vmem>>, vector<4x256xf32>
    %c4_301 = arith.constant 4 : index
    %c0_302 = arith.constant 0 : index
    %c0_303 = arith.constant 0 : index
    %433 = vector.load %arg10[%c4_301, %c0_302, %c0_303] : memref<9x4x256xf32, #tpu.memory_space<vmem>>, vector<1x4x256xf32>
    %434 = vector.shape_cast %433 : vector<1x4x256xf32> to vector<4x256xf32>
    %435 = vector.shape_cast %432 : vector<4x256xf32> to vector<1x4x256xf32>
    tpu.vector_store %arg10[%c4_301, %c0_302, %c0_303], %435 {strides = array<i32>} : memref<9x4x256xf32, #tpu.memory_space<vmem>>, vector<1x4x256xf32>,
    %c0_304 = arith.constant 0 : index
    %c129_305 = arith.constant 129 : index
    %436 = vector.load %arg9[%c0_304, %c129_305] : memref<4x512xf32, #tpu.memory_space<vmem>>, vector<4x256xf32>
    %437 = vector.broadcast %5 : vector<1x256xf32> to vector<4x256xf32>
    %438 = arith.mulf %436, %437 : vector<4x256xf32>
    %c5_306 = arith.constant 5 : index
    %c0_307 = arith.constant 0 : index
    %c0_308 = arith.constant 0 : index
    %439 = vector.load %arg10[%c5_306, %c0_307, %c0_308] : memref<9x4x256xf32, #tpu.memory_space<vmem>>, vector<1x4x256xf32>
    %440 = vector.shape_cast %439 : vector<1x4x256xf32> to vector<4x256xf32>
    %441 = vector.shape_cast %438 : vector<4x256xf32> to vector<1x4x256xf32>
    tpu.vector_store %arg10[%c5_306, %c0_307, %c0_308], %441 {strides = array<i32>} : memref<9x4x256xf32, #tpu.memory_space<vmem>>, vector<1x4x256xf32>,
    %c0_309 = arith.constant 0 : index
    %c143_310 = arith.constant 143 : index
    %442 = vector.load %arg9[%c0_309, %c143_310] : memref<4x512xf32, #tpu.memory_space<vmem>>, vector<4x256xf32>
    %443 = vector.broadcast %4 : vector<1x256xf32> to vector<4x256xf32>
    %444 = arith.mulf %442, %443 : vector<4x256xf32>
    %c6_311 = arith.constant 6 : index
    %c0_312 = arith.constant 0 : index
    %c0_313 = arith.constant 0 : index
    %445 = vector.load %arg10[%c6_311, %c0_312, %c0_313] : memref<9x4x256xf32, #tpu.memory_space<vmem>>, vector<1x4x256xf32>
    %446 = vector.shape_cast %445 : vector<1x4x256xf32> to vector<4x256xf32>
    %447 = vector.shape_cast %444 : vector<4x256xf32> to vector<1x4x256xf32>
    tpu.vector_store %arg10[%c6_311, %c0_312, %c0_313], %447 {strides = array<i32>} : memref<9x4x256xf32, #tpu.memory_space<vmem>>, vector<1x4x256xf32>,
    %c0_314 = arith.constant 0 : index
    %c144_315 = arith.constant 144 : index
    %448 = vector.load %arg9[%c0_314, %c144_315] : memref<4x512xf32, #tpu.memory_space<vmem>>, vector<4x256xf32>
    %c7_316 = arith.constant 7 : index
    %c0_317 = arith.constant 0 : index
    %c0_318 = arith.constant 0 : index
    %449 = vector.load %arg10[%c7_316, %c0_317, %c0_318] : memref<9x4x256xf32, #tpu.memory_space<vmem>>, vector<1x4x256xf32>
    %450 = vector.shape_cast %449 : vector<1x4x256xf32> to vector<4x256xf32>
    %451 = vector.shape_cast %448 : vector<4x256xf32> to vector<1x4x256xf32>
    tpu.vector_store %arg10[%c7_316, %c0_317, %c0_318], %451 {strides = array<i32>} : memref<9x4x256xf32, #tpu.memory_space<vmem>>, vector<1x4x256xf32>,
    %c0_319 = arith.constant 0 : index
    %c145_320 = arith.constant 145 : index
    %452 = vector.load %arg9[%c0_319, %c145_320] : memref<4x512xf32, #tpu.memory_space<vmem>>, vector<4x256xf32>
    %453 = vector.broadcast %5 : vector<1x256xf32> to vector<4x256xf32>
    %454 = arith.mulf %452, %453 : vector<4x256xf32>
    %c8_321 = arith.constant 8 : index
    %c0_322 = arith.constant 0 : index
    %c0_323 = arith.constant 0 : index
    %455 = vector.load %arg10[%c8_321, %c0_322, %c0_323] : memref<9x4x256xf32, #tpu.memory_space<vmem>>, vector<1x4x256xf32>
    %456 = vector.shape_cast %455 : vector<1x4x256xf32> to vector<4x256xf32>
    %457 = vector.shape_cast %454 : vector<4x256xf32> to vector<1x4x256xf32>
    tpu.vector_store %arg10[%c8_321, %c0_322, %c0_323], %457 {strides = array<i32>} : memref<9x4x256xf32, #tpu.memory_space<vmem>>, vector<1x4x256xf32>,
    %c0_324 = arith.constant 0 : index
    %c36_325 = arith.constant 36 : index
    %458 = vector.load %arg6[%c0_324, %c36_325] : memref<4x37xf32, #tpu.memory_space<vmem>>, vector<4x1xf32>
    %c0_326 = arith.constant 0 : index
    %c0_327 = arith.constant 0 : index
    %459 = vector.load %arg6[%c0_326, %c0_327] : memref<4x37xf32, #tpu.memory_space<vmem>>, vector<4x1xf32>
    %c0_328 = arith.constant 0 : index
    %c1_329 = arith.constant 1 : index
    %460 = vector.load %arg6[%c0_328, %c1_329] : memref<4x37xf32, #tpu.memory_space<vmem>>, vector<4x1xf32>
    %c0_330 = arith.constant 0 : index
    %c2_331 = arith.constant 2 : index
    %461 = vector.load %arg6[%c0_330, %c2_331] : memref<4x37xf32, #tpu.memory_space<vmem>>, vector<4x1xf32>
    %c0_332 = arith.constant 0 : index
    %c3_333 = arith.constant 3 : index
    %462 = vector.load %arg6[%c0_332, %c3_333] : memref<4x37xf32, #tpu.memory_space<vmem>>, vector<4x1xf32>
    %c0_334 = arith.constant 0 : index
    %c4_335 = arith.constant 4 : index
    %463 = vector.load %arg6[%c0_334, %c4_335] : memref<4x37xf32, #tpu.memory_space<vmem>>, vector<4x1xf32>
    %c0_336 = arith.constant 0 : index
    %c5_337 = arith.constant 5 : index
    %464 = vector.load %arg6[%c0_336, %c5_337] : memref<4x37xf32, #tpu.memory_space<vmem>>, vector<4x1xf32>
    %c0_338 = arith.constant 0 : index
    %c6_339 = arith.constant 6 : index
    %465 = vector.load %arg6[%c0_338, %c6_339] : memref<4x37xf32, #tpu.memory_space<vmem>>, vector<4x1xf32>
    %c0_340 = arith.constant 0 : index
    %c7_341 = arith.constant 7 : index
    %466 = vector.load %arg6[%c0_340, %c7_341] : memref<4x37xf32, #tpu.memory_space<vmem>>, vector<4x1xf32>
    %c0_342 = arith.constant 0 : index
    %c8_343 = arith.constant 8 : index
    %467 = vector.load %arg6[%c0_342, %c8_343] : memref<4x37xf32, #tpu.memory_space<vmem>>, vector<4x1xf32>
    %c0_344 = arith.constant 0 : index
    %c9_345 = arith.constant 9 : index
    %468 = vector.load %arg6[%c0_344, %c9_345] : memref<4x37xf32, #tpu.memory_space<vmem>>, vector<4x1xf32>
    %c0_346 = arith.constant 0 : index
    %c10_347 = arith.constant 10 : index
    %469 = vector.load %arg6[%c0_346, %c10_347] : memref<4x37xf32, #tpu.memory_space<vmem>>, vector<4x1xf32>
    %c0_348 = arith.constant 0 : index
    %c11_349 = arith.constant 11 : index
    %470 = vector.load %arg6[%c0_348, %c11_349] : memref<4x37xf32, #tpu.memory_space<vmem>>, vector<4x1xf32>
    %c0_350 = arith.constant 0 : index
    %c12_351 = arith.constant 12 : index
    %471 = vector.load %arg6[%c0_350, %c12_351] : memref<4x37xf32, #tpu.memory_space<vmem>>, vector<4x1xf32>
    %c0_352 = arith.constant 0 : index
    %c13_353 = arith.constant 13 : index
    %472 = vector.load %arg6[%c0_352, %c13_353] : memref<4x37xf32, #tpu.memory_space<vmem>>, vector<4x1xf32>
    %c0_354 = arith.constant 0 : index
    %c14_355 = arith.constant 14 : index
    %473 = vector.load %arg6[%c0_354, %c14_355] : memref<4x37xf32, #tpu.memory_space<vmem>>, vector<4x1xf32>
    %c0_356 = arith.constant 0 : index
    %c15_357 = arith.constant 15 : index
    %474 = vector.load %arg6[%c0_356, %c15_357] : memref<4x37xf32, #tpu.memory_space<vmem>>, vector<4x1xf32>
    %c0_358 = arith.constant 0 : index
    %c16_359 = arith.constant 16 : index
    %475 = vector.load %arg6[%c0_358, %c16_359] : memref<4x37xf32, #tpu.memory_space<vmem>>, vector<4x1xf32>
    %c0_360 = arith.constant 0 : index
    %c17_361 = arith.constant 17 : index
    %476 = vector.load %arg6[%c0_360, %c17_361] : memref<4x37xf32, #tpu.memory_space<vmem>>, vector<4x1xf32>
    %c0_362 = arith.constant 0 : index
    %c18_363 = arith.constant 18 : index
    %477 = vector.load %arg6[%c0_362, %c18_363] : memref<4x37xf32, #tpu.memory_space<vmem>>, vector<4x1xf32>
    %c0_364 = arith.constant 0 : index
    %c19_365 = arith.constant 19 : index
    %478 = vector.load %arg6[%c0_364, %c19_365] : memref<4x37xf32, #tpu.memory_space<vmem>>, vector<4x1xf32>
    %c0_366 = arith.constant 0 : index
    %c20_367 = arith.constant 20 : index
    %479 = vector.load %arg6[%c0_366, %c20_367] : memref<4x37xf32, #tpu.memory_space<vmem>>, vector<4x1xf32>
    %c0_368 = arith.constant 0 : index
    %c21_369 = arith.constant 21 : index
    %480 = vector.load %arg6[%c0_368, %c21_369] : memref<4x37xf32, #tpu.memory_space<vmem>>, vector<4x1xf32>
    %c0_370 = arith.constant 0 : index
    %c22_371 = arith.constant 22 : index
    %481 = vector.load %arg6[%c0_370, %c22_371] : memref<4x37xf32, #tpu.memory_space<vmem>>, vector<4x1xf32>
    %c0_372 = arith.constant 0 : index
    %c23_373 = arith.constant 23 : index
    %482 = vector.load %arg6[%c0_372, %c23_373] : memref<4x37xf32, #tpu.memory_space<vmem>>, vector<4x1xf32>
    %c0_374 = arith.constant 0 : index
    %c24_375 = arith.constant 24 : index
    %483 = vector.load %arg6[%c0_374, %c24_375] : memref<4x37xf32, #tpu.memory_space<vmem>>, vector<4x1xf32>
    %c0_376 = arith.constant 0 : index
    %c25_377 = arith.constant 25 : index
    %484 = vector.load %arg6[%c0_376, %c25_377] : memref<4x37xf32, #tpu.memory_space<vmem>>, vector<4x1xf32>
    %c0_378 = arith.constant 0 : index
    %c26_379 = arith.constant 26 : index
    %485 = vector.load %arg6[%c0_378, %c26_379] : memref<4x37xf32, #tpu.memory_space<vmem>>, vector<4x1xf32>
    %c0_380 = arith.constant 0 : index
    %c27_381 = arith.constant 27 : index
    %486 = vector.load %arg6[%c0_380, %c27_381] : memref<4x37xf32, #tpu.memory_space<vmem>>, vector<4x1xf32>
    %c0_382 = arith.constant 0 : index
    %c28_383 = arith.constant 28 : index
    %487 = vector.load %arg6[%c0_382, %c28_383] : memref<4x37xf32, #tpu.memory_space<vmem>>, vector<4x1xf32>
    %c0_384 = arith.constant 0 : index
    %c29_385 = arith.constant 29 : index
    %488 = vector.load %arg6[%c0_384, %c29_385] : memref<4x37xf32, #tpu.memory_space<vmem>>, vector<4x1xf32>
    %c0_386 = arith.constant 0 : index
    %c30_387 = arith.constant 30 : index
    %489 = vector.load %arg6[%c0_386, %c30_387] : memref<4x37xf32, #tpu.memory_space<vmem>>, vector<4x1xf32>
    %c0_388 = arith.constant 0 : index
    %c31_389 = arith.constant 31 : index
    %490 = vector.load %arg6[%c0_388, %c31_389] : memref<4x37xf32, #tpu.memory_space<vmem>>, vector<4x1xf32>
    %c0_390 = arith.constant 0 : index
    %c32_391 = arith.constant 32 : index
    %491 = vector.load %arg6[%c0_390, %c32_391] : memref<4x37xf32, #tpu.memory_space<vmem>>, vector<4x1xf32>
    %c0_392 = arith.constant 0 : index
    %c33_393 = arith.constant 33 : index
    %492 = vector.load %arg6[%c0_392, %c33_393] : memref<4x37xf32, #tpu.memory_space<vmem>>, vector<4x1xf32>
    %c0_394 = arith.constant 0 : index
    %c34_395 = arith.constant 34 : index
    %493 = vector.load %arg6[%c0_394, %c34_395] : memref<4x37xf32, #tpu.memory_space<vmem>>, vector<4x1xf32>
    %c0_396 = arith.constant 0 : index
    %c35_397 = arith.constant 35 : index
    %494 = vector.load %arg6[%c0_396, %c35_397] : memref<4x37xf32, #tpu.memory_space<vmem>>, vector<4x1xf32>
    %c0_398 = arith.constant 0 : index
    %c0_399 = arith.constant 0 : index
    %c0_400 = arith.constant 0 : index
    %495 = vector.load %arg10[%c0_398, %c0_399, %c0_400] : memref<9x4x256xf32, #tpu.memory_space<vmem>>, vector<1x1x256xf32>
    %496 = vector.shape_cast %495 : vector<1x1x256xf32> to vector<1x256xf32>
    %497 = vector.broadcast %459 : vector<4x1xf32> to vector<4x256xf32>
    %498 = vector.broadcast %496 : vector<1x256xf32> to vector<4x256xf32>
    %499 = arith.mulf %497, %498 : vector<4x256xf32>
    %c0_401 = arith.constant 0 : index
    %c1_402 = arith.constant 1 : index
    %c0_403 = arith.constant 0 : index
    %500 = vector.load %arg10[%c0_401, %c1_402, %c0_403] : memref<9x4x256xf32, #tpu.memory_space<vmem>>, vector<1x1x256xf32>
    %501 = vector.shape_cast %500 : vector<1x1x256xf32> to vector<1x256xf32>
    %502 = vector.broadcast %460 : vector<4x1xf32> to vector<4x256xf32>
    %503 = vector.broadcast %501 : vector<1x256xf32> to vector<4x256xf32>
    %504 = arith.mulf %502, %503 : vector<4x256xf32>
    %c0_404 = arith.constant 0 : index
    %c2_405 = arith.constant 2 : index
    %c0_406 = arith.constant 0 : index
    %505 = vector.load %arg10[%c0_404, %c2_405, %c0_406] : memref<9x4x256xf32, #tpu.memory_space<vmem>>, vector<1x1x256xf32>
    %506 = vector.shape_cast %505 : vector<1x1x256xf32> to vector<1x256xf32>
    %507 = vector.broadcast %461 : vector<4x1xf32> to vector<4x256xf32>
    %508 = vector.broadcast %506 : vector<1x256xf32> to vector<4x256xf32>
    %509 = arith.mulf %507, %508 : vector<4x256xf32>
    %c0_407 = arith.constant 0 : index
    %c3_408 = arith.constant 3 : index
    %c0_409 = arith.constant 0 : index
    %510 = vector.load %arg10[%c0_407, %c3_408, %c0_409] : memref<9x4x256xf32, #tpu.memory_space<vmem>>, vector<1x1x256xf32>
    %511 = vector.shape_cast %510 : vector<1x1x256xf32> to vector<1x256xf32>
    %512 = vector.broadcast %462 : vector<4x1xf32> to vector<4x256xf32>
    %513 = vector.broadcast %511 : vector<1x256xf32> to vector<4x256xf32>
    %514 = arith.mulf %512, %513 : vector<4x256xf32>
    %c1_410 = arith.constant 1 : index
    %c0_411 = arith.constant 0 : index
    %c0_412 = arith.constant 0 : index
    %515 = vector.load %arg10[%c1_410, %c0_411, %c0_412] : memref<9x4x256xf32, #tpu.memory_space<vmem>>, vector<1x1x256xf32>
    %516 = vector.shape_cast %515 : vector<1x1x256xf32> to vector<1x256xf32>
    %517 = vector.broadcast %463 : vector<4x1xf32> to vector<4x256xf32>
    %518 = vector.broadcast %516 : vector<1x256xf32> to vector<4x256xf32>
    %519 = arith.mulf %517, %518 : vector<4x256xf32>
    %520 = arith.addf %499, %519 : vector<4x256xf32>
    %c1_413 = arith.constant 1 : index
    %c1_414 = arith.constant 1 : index
    %c0_415 = arith.constant 0 : index
    %521 = vector.load %arg10[%c1_413, %c1_414, %c0_415] : memref<9x4x256xf32, #tpu.memory_space<vmem>>, vector<1x1x256xf32>
    %522 = vector.shape_cast %521 : vector<1x1x256xf32> to vector<1x256xf32>
    %523 = vector.broadcast %464 : vector<4x1xf32> to vector<4x256xf32>
    %524 = vector.broadcast %522 : vector<1x256xf32> to vector<4x256xf32>
    %525 = arith.mulf %523, %524 : vector<4x256xf32>
    %526 = arith.addf %504, %525 : vector<4x256xf32>
    %c1_416 = arith.constant 1 : index
    %c2_417 = arith.constant 2 : index
    %c0_418 = arith.constant 0 : index
    %527 = vector.load %arg10[%c1_416, %c2_417, %c0_418] : memref<9x4x256xf32, #tpu.memory_space<vmem>>, vector<1x1x256xf32>
    %528 = vector.shape_cast %527 : vector<1x1x256xf32> to vector<1x256xf32>
    %529 = vector.broadcast %465 : vector<4x1xf32> to vector<4x256xf32>
    %530 = vector.broadcast %528 : vector<1x256xf32> to vector<4x256xf32>
    %531 = arith.mulf %529, %530 : vector<4x256xf32>
    %532 = arith.addf %509, %531 : vector<4x256xf32>
    %c1_419 = arith.constant 1 : index
    %c3_420 = arith.constant 3 : index
    %c0_421 = arith.constant 0 : index
    %533 = vector.load %arg10[%c1_419, %c3_420, %c0_421] : memref<9x4x256xf32, #tpu.memory_space<vmem>>, vector<1x1x256xf32>
    %534 = vector.shape_cast %533 : vector<1x1x256xf32> to vector<1x256xf32>
    %535 = vector.broadcast %466 : vector<4x1xf32> to vector<4x256xf32>
    %536 = vector.broadcast %534 : vector<1x256xf32> to vector<4x256xf32>
    %537 = arith.mulf %535, %536 : vector<4x256xf32>
    %538 = arith.addf %514, %537 : vector<4x256xf32>
    %c2_422 = arith.constant 2 : index
    %c0_423 = arith.constant 0 : index
    %c0_424 = arith.constant 0 : index
    %539 = vector.load %arg10[%c2_422, %c0_423, %c0_424] : memref<9x4x256xf32, #tpu.memory_space<vmem>>, vector<1x1x256xf32>
    %540 = vector.shape_cast %539 : vector<1x1x256xf32> to vector<1x256xf32>
    %541 = vector.broadcast %467 : vector<4x1xf32> to vector<4x256xf32>
    %542 = vector.broadcast %540 : vector<1x256xf32> to vector<4x256xf32>
    %543 = arith.mulf %541, %542 : vector<4x256xf32>
    %544 = arith.addf %520, %543 : vector<4x256xf32>
    %c2_425 = arith.constant 2 : index
    %c1_426 = arith.constant 1 : index
    %c0_427 = arith.constant 0 : index
    %545 = vector.load %arg10[%c2_425, %c1_426, %c0_427] : memref<9x4x256xf32, #tpu.memory_space<vmem>>, vector<1x1x256xf32>
    %546 = vector.shape_cast %545 : vector<1x1x256xf32> to vector<1x256xf32>
    %547 = vector.broadcast %468 : vector<4x1xf32> to vector<4x256xf32>
    %548 = vector.broadcast %546 : vector<1x256xf32> to vector<4x256xf32>
    %549 = arith.mulf %547, %548 : vector<4x256xf32>
    %550 = arith.addf %526, %549 : vector<4x256xf32>
    %c2_428 = arith.constant 2 : index
    %c2_429 = arith.constant 2 : index
    %c0_430 = arith.constant 0 : index
    %551 = vector.load %arg10[%c2_428, %c2_429, %c0_430] : memref<9x4x256xf32, #tpu.memory_space<vmem>>, vector<1x1x256xf32>
    %552 = vector.shape_cast %551 : vector<1x1x256xf32> to vector<1x256xf32>
    %553 = vector.broadcast %469 : vector<4x1xf32> to vector<4x256xf32>
    %554 = vector.broadcast %552 : vector<1x256xf32> to vector<4x256xf32>
    %555 = arith.mulf %553, %554 : vector<4x256xf32>
    %556 = arith.addf %532, %555 : vector<4x256xf32>
    %c2_431 = arith.constant 2 : index
    %c3_432 = arith.constant 3 : index
    %c0_433 = arith.constant 0 : index
    %557 = vector.load %arg10[%c2_431, %c3_432, %c0_433] : memref<9x4x256xf32, #tpu.memory_space<vmem>>, vector<1x1x256xf32>
    %558 = vector.shape_cast %557 : vector<1x1x256xf32> to vector<1x256xf32>
    %559 = vector.broadcast %470 : vector<4x1xf32> to vector<4x256xf32>
    %560 = vector.broadcast %558 : vector<1x256xf32> to vector<4x256xf32>
    %561 = arith.mulf %559, %560 : vector<4x256xf32>
    %562 = arith.addf %538, %561 : vector<4x256xf32>
    %c3_434 = arith.constant 3 : index
    %c0_435 = arith.constant 0 : index
    %c0_436 = arith.constant 0 : index
    %563 = vector.load %arg10[%c3_434, %c0_435, %c0_436] : memref<9x4x256xf32, #tpu.memory_space<vmem>>, vector<1x1x256xf32>
    %564 = vector.shape_cast %563 : vector<1x1x256xf32> to vector<1x256xf32>
    %565 = vector.broadcast %471 : vector<4x1xf32> to vector<4x256xf32>
    %566 = vector.broadcast %564 : vector<1x256xf32> to vector<4x256xf32>
    %567 = arith.mulf %565, %566 : vector<4x256xf32>
    %568 = arith.addf %544, %567 : vector<4x256xf32>
    %c3_437 = arith.constant 3 : index
    %c1_438 = arith.constant 1 : index
    %c0_439 = arith.constant 0 : index
    %569 = vector.load %arg10[%c3_437, %c1_438, %c0_439] : memref<9x4x256xf32, #tpu.memory_space<vmem>>, vector<1x1x256xf32>
    %570 = vector.shape_cast %569 : vector<1x1x256xf32> to vector<1x256xf32>
    %571 = vector.broadcast %472 : vector<4x1xf32> to vector<4x256xf32>
    %572 = vector.broadcast %570 : vector<1x256xf32> to vector<4x256xf32>
    %573 = arith.mulf %571, %572 : vector<4x256xf32>
    %574 = arith.addf %550, %573 : vector<4x256xf32>
    %c3_440 = arith.constant 3 : index
    %c2_441 = arith.constant 2 : index
    %c0_442 = arith.constant 0 : index
    %575 = vector.load %arg10[%c3_440, %c2_441, %c0_442] : memref<9x4x256xf32, #tpu.memory_space<vmem>>, vector<1x1x256xf32>
    %576 = vector.shape_cast %575 : vector<1x1x256xf32> to vector<1x256xf32>
    %577 = vector.broadcast %473 : vector<4x1xf32> to vector<4x256xf32>
    %578 = vector.broadcast %576 : vector<1x256xf32> to vector<4x256xf32>
    %579 = arith.mulf %577, %578 : vector<4x256xf32>
    %580 = arith.addf %556, %579 : vector<4x256xf32>
    %c3_443 = arith.constant 3 : index
    %c3_444 = arith.constant 3 : index
    %c0_445 = arith.constant 0 : index
    %581 = vector.load %arg10[%c3_443, %c3_444, %c0_445] : memref<9x4x256xf32, #tpu.memory_space<vmem>>, vector<1x1x256xf32>
    %582 = vector.shape_cast %581 : vector<1x1x256xf32> to vector<1x256xf32>
    %583 = vector.broadcast %474 : vector<4x1xf32> to vector<4x256xf32>
    %584 = vector.broadcast %582 : vector<1x256xf32> to vector<4x256xf32>
    %585 = arith.mulf %583, %584 : vector<4x256xf32>
    %586 = arith.addf %562, %585 : vector<4x256xf32>
    %c4_446 = arith.constant 4 : index
    %c0_447 = arith.constant 0 : index
    %c0_448 = arith.constant 0 : index
    %587 = vector.load %arg10[%c4_446, %c0_447, %c0_448] : memref<9x4x256xf32, #tpu.memory_space<vmem>>, vector<1x1x256xf32>
    %588 = vector.shape_cast %587 : vector<1x1x256xf32> to vector<1x256xf32>
    %589 = vector.broadcast %475 : vector<4x1xf32> to vector<4x256xf32>
    %590 = vector.broadcast %588 : vector<1x256xf32> to vector<4x256xf32>
    %591 = arith.mulf %589, %590 : vector<4x256xf32>
    %592 = arith.addf %568, %591 : vector<4x256xf32>
    %c4_449 = arith.constant 4 : index
    %c1_450 = arith.constant 1 : index
    %c0_451 = arith.constant 0 : index
    %593 = vector.load %arg10[%c4_449, %c1_450, %c0_451] : memref<9x4x256xf32, #tpu.memory_space<vmem>>, vector<1x1x256xf32>
    %594 = vector.shape_cast %593 : vector<1x1x256xf32> to vector<1x256xf32>
    %595 = vector.broadcast %476 : vector<4x1xf32> to vector<4x256xf32>
    %596 = vector.broadcast %594 : vector<1x256xf32> to vector<4x256xf32>
    %597 = arith.mulf %595, %596 : vector<4x256xf32>
    %598 = arith.addf %574, %597 : vector<4x256xf32>
    %c4_452 = arith.constant 4 : index
    %c2_453 = arith.constant 2 : index
    %c0_454 = arith.constant 0 : index
    %599 = vector.load %arg10[%c4_452, %c2_453, %c0_454] : memref<9x4x256xf32, #tpu.memory_space<vmem>>, vector<1x1x256xf32>
    %600 = vector.shape_cast %599 : vector<1x1x256xf32> to vector<1x256xf32>
    %601 = vector.broadcast %477 : vector<4x1xf32> to vector<4x256xf32>
    %602 = vector.broadcast %600 : vector<1x256xf32> to vector<4x256xf32>
    %603 = arith.mulf %601, %602 : vector<4x256xf32>
    %604 = arith.addf %580, %603 : vector<4x256xf32>
    %c4_455 = arith.constant 4 : index
    %c3_456 = arith.constant 3 : index
    %c0_457 = arith.constant 0 : index
    %605 = vector.load %arg10[%c4_455, %c3_456, %c0_457] : memref<9x4x256xf32, #tpu.memory_space<vmem>>, vector<1x1x256xf32>
    %606 = vector.shape_cast %605 : vector<1x1x256xf32> to vector<1x256xf32>
    %607 = vector.broadcast %478 : vector<4x1xf32> to vector<4x256xf32>
    %608 = vector.broadcast %606 : vector<1x256xf32> to vector<4x256xf32>
    %609 = arith.mulf %607, %608 : vector<4x256xf32>
    %610 = arith.addf %586, %609 : vector<4x256xf32>
    %c5_458 = arith.constant 5 : index
    %c0_459 = arith.constant 0 : index
    %c0_460 = arith.constant 0 : index
    %611 = vector.load %arg10[%c5_458, %c0_459, %c0_460] : memref<9x4x256xf32, #tpu.memory_space<vmem>>, vector<1x1x256xf32>
    %612 = vector.shape_cast %611 : vector<1x1x256xf32> to vector<1x256xf32>
    %613 = vector.broadcast %479 : vector<4x1xf32> to vector<4x256xf32>
    %614 = vector.broadcast %612 : vector<1x256xf32> to vector<4x256xf32>
    %615 = arith.mulf %613, %614 : vector<4x256xf32>
    %616 = arith.addf %592, %615 : vector<4x256xf32>
    %c5_461 = arith.constant 5 : index
    %c1_462 = arith.constant 1 : index
    %c0_463 = arith.constant 0 : index
    %617 = vector.load %arg10[%c5_461, %c1_462, %c0_463] : memref<9x4x256xf32, #tpu.memory_space<vmem>>, vector<1x1x256xf32>
    %618 = vector.shape_cast %617 : vector<1x1x256xf32> to vector<1x256xf32>
    %619 = vector.broadcast %480 : vector<4x1xf32> to vector<4x256xf32>
    %620 = vector.broadcast %618 : vector<1x256xf32> to vector<4x256xf32>
    %621 = arith.mulf %619, %620 : vector<4x256xf32>
    %622 = arith.addf %598, %621 : vector<4x256xf32>
    %c5_464 = arith.constant 5 : index
    %c2_465 = arith.constant 2 : index
    %c0_466 = arith.constant 0 : index
    %623 = vector.load %arg10[%c5_464, %c2_465, %c0_466] : memref<9x4x256xf32, #tpu.memory_space<vmem>>, vector<1x1x256xf32>
    %624 = vector.shape_cast %623 : vector<1x1x256xf32> to vector<1x256xf32>
    %625 = vector.broadcast %481 : vector<4x1xf32> to vector<4x256xf32>
    %626 = vector.broadcast %624 : vector<1x256xf32> to vector<4x256xf32>
    %627 = arith.mulf %625, %626 : vector<4x256xf32>
    %628 = arith.addf %604, %627 : vector<4x256xf32>
    %c5_467 = arith.constant 5 : index
    %c3_468 = arith.constant 3 : index
    %c0_469 = arith.constant 0 : index
    %629 = vector.load %arg10[%c5_467, %c3_468, %c0_469] : memref<9x4x256xf32, #tpu.memory_space<vmem>>, vector<1x1x256xf32>
    %630 = vector.shape_cast %629 : vector<1x1x256xf32> to vector<1x256xf32>
    %631 = vector.broadcast %482 : vector<4x1xf32> to vector<4x256xf32>
    %632 = vector.broadcast %630 : vector<1x256xf32> to vector<4x256xf32>
    %633 = arith.mulf %631, %632 : vector<4x256xf32>
    %634 = arith.addf %610, %633 : vector<4x256xf32>
    %c6_470 = arith.constant 6 : index
    %c0_471 = arith.constant 0 : index
    %c0_472 = arith.constant 0 : index
    %635 = vector.load %arg10[%c6_470, %c0_471, %c0_472] : memref<9x4x256xf32, #tpu.memory_space<vmem>>, vector<1x1x256xf32>
    %636 = vector.shape_cast %635 : vector<1x1x256xf32> to vector<1x256xf32>
    %637 = vector.broadcast %483 : vector<4x1xf32> to vector<4x256xf32>
    %638 = vector.broadcast %636 : vector<1x256xf32> to vector<4x256xf32>
    %639 = arith.mulf %637, %638 : vector<4x256xf32>
    %640 = arith.addf %616, %639 : vector<4x256xf32>
    %c6_473 = arith.constant 6 : index
    %c1_474 = arith.constant 1 : index
    %c0_475 = arith.constant 0 : index
    %641 = vector.load %arg10[%c6_473, %c1_474, %c0_475] : memref<9x4x256xf32, #tpu.memory_space<vmem>>, vector<1x1x256xf32>
    %642 = vector.shape_cast %641 : vector<1x1x256xf32> to vector<1x256xf32>
    %643 = vector.broadcast %484 : vector<4x1xf32> to vector<4x256xf32>
    %644 = vector.broadcast %642 : vector<1x256xf32> to vector<4x256xf32>
    %645 = arith.mulf %643, %644 : vector<4x256xf32>
    %646 = arith.addf %622, %645 : vector<4x256xf32>
    %c6_476 = arith.constant 6 : index
    %c2_477 = arith.constant 2 : index
    %c0_478 = arith.constant 0 : index
    %647 = vector.load %arg10[%c6_476, %c2_477, %c0_478] : memref<9x4x256xf32, #tpu.memory_space<vmem>>, vector<1x1x256xf32>
    %648 = vector.shape_cast %647 : vector<1x1x256xf32> to vector<1x256xf32>
    %649 = vector.broadcast %485 : vector<4x1xf32> to vector<4x256xf32>
    %650 = vector.broadcast %648 : vector<1x256xf32> to vector<4x256xf32>
    %651 = arith.mulf %649, %650 : vector<4x256xf32>
    %652 = arith.addf %628, %651 : vector<4x256xf32>
    %c6_479 = arith.constant 6 : index
    %c3_480 = arith.constant 3 : index
    %c0_481 = arith.constant 0 : index
    %653 = vector.load %arg10[%c6_479, %c3_480, %c0_481] : memref<9x4x256xf32, #tpu.memory_space<vmem>>, vector<1x1x256xf32>
    %654 = vector.shape_cast %653 : vector<1x1x256xf32> to vector<1x256xf32>
    %655 = vector.broadcast %486 : vector<4x1xf32> to vector<4x256xf32>
    %656 = vector.broadcast %654 : vector<1x256xf32> to vector<4x256xf32>
    %657 = arith.mulf %655, %656 : vector<4x256xf32>
    %658 = arith.addf %634, %657 : vector<4x256xf32>
    %c7_482 = arith.constant 7 : index
    %c0_483 = arith.constant 0 : index
    %c0_484 = arith.constant 0 : index
    %659 = vector.load %arg10[%c7_482, %c0_483, %c0_484] : memref<9x4x256xf32, #tpu.memory_space<vmem>>, vector<1x1x256xf32>
    %660 = vector.shape_cast %659 : vector<1x1x256xf32> to vector<1x256xf32>
    %661 = vector.broadcast %487 : vector<4x1xf32> to vector<4x256xf32>
    %662 = vector.broadcast %660 : vector<1x256xf32> to vector<4x256xf32>
    %663 = arith.mulf %661, %662 : vector<4x256xf32>
    %664 = arith.addf %640, %663 : vector<4x256xf32>
    %c7_485 = arith.constant 7 : index
    %c1_486 = arith.constant 1 : index
    %c0_487 = arith.constant 0 : index
    %665 = vector.load %arg10[%c7_485, %c1_486, %c0_487] : memref<9x4x256xf32, #tpu.memory_space<vmem>>, vector<1x1x256xf32>
    %666 = vector.shape_cast %665 : vector<1x1x256xf32> to vector<1x256xf32>
    %667 = vector.broadcast %488 : vector<4x1xf32> to vector<4x256xf32>
    %668 = vector.broadcast %666 : vector<1x256xf32> to vector<4x256xf32>
    %669 = arith.mulf %667, %668 : vector<4x256xf32>
    %670 = arith.addf %646, %669 : vector<4x256xf32>
    %c7_488 = arith.constant 7 : index
    %c2_489 = arith.constant 2 : index
    %c0_490 = arith.constant 0 : index
    %671 = vector.load %arg10[%c7_488, %c2_489, %c0_490] : memref<9x4x256xf32, #tpu.memory_space<vmem>>, vector<1x1x256xf32>
    %672 = vector.shape_cast %671 : vector<1x1x256xf32> to vector<1x256xf32>
    %673 = vector.broadcast %489 : vector<4x1xf32> to vector<4x256xf32>
    %674 = vector.broadcast %672 : vector<1x256xf32> to vector<4x256xf32>
    %675 = arith.mulf %673, %674 : vector<4x256xf32>
    %676 = arith.addf %652, %675 : vector<4x256xf32>
    %c7_491 = arith.constant 7 : index
    %c3_492 = arith.constant 3 : index
    %c0_493 = arith.constant 0 : index
    %677 = vector.load %arg10[%c7_491, %c3_492, %c0_493] : memref<9x4x256xf32, #tpu.memory_space<vmem>>, vector<1x1x256xf32>
    %678 = vector.shape_cast %677 : vector<1x1x256xf32> to vector<1x256xf32>
    %679 = vector.broadcast %490 : vector<4x1xf32> to vector<4x256xf32>
    %680 = vector.broadcast %678 : vector<1x256xf32> to vector<4x256xf32>
    %681 = arith.mulf %679, %680 : vector<4x256xf32>
    %682 = arith.addf %658, %681 : vector<4x256xf32>
    %c8_494 = arith.constant 8 : index
    %c0_495 = arith.constant 0 : index
    %c0_496 = arith.constant 0 : index
    %683 = vector.load %arg10[%c8_494, %c0_495, %c0_496] : memref<9x4x256xf32, #tpu.memory_space<vmem>>, vector<1x1x256xf32>
    %684 = vector.shape_cast %683 : vector<1x1x256xf32> to vector<1x256xf32>
    %685 = vector.broadcast %491 : vector<4x1xf32> to vector<4x256xf32>
    %686 = vector.broadcast %684 : vector<1x256xf32> to vector<4x256xf32>
    %687 = arith.mulf %685, %686 : vector<4x256xf32>
    %688 = arith.addf %664, %687 : vector<4x256xf32>
    %c8_497 = arith.constant 8 : index
    %c1_498 = arith.constant 1 : index
    %c0_499 = arith.constant 0 : index
    %689 = vector.load %arg10[%c8_497, %c1_498, %c0_499] : memref<9x4x256xf32, #tpu.memory_space<vmem>>, vector<1x1x256xf32>
    %690 = vector.shape_cast %689 : vector<1x1x256xf32> to vector<1x256xf32>
    %691 = vector.broadcast %492 : vector<4x1xf32> to vector<4x256xf32>
    %692 = vector.broadcast %690 : vector<1x256xf32> to vector<4x256xf32>
    %693 = arith.mulf %691, %692 : vector<4x256xf32>
    %694 = arith.addf %670, %693 : vector<4x256xf32>
    %c8_500 = arith.constant 8 : index
    %c2_501 = arith.constant 2 : index
    %c0_502 = arith.constant 0 : index
    %695 = vector.load %arg10[%c8_500, %c2_501, %c0_502] : memref<9x4x256xf32, #tpu.memory_space<vmem>>, vector<1x1x256xf32>
    %696 = vector.shape_cast %695 : vector<1x1x256xf32> to vector<1x256xf32>
    %697 = vector.broadcast %493 : vector<4x1xf32> to vector<4x256xf32>
    %698 = vector.broadcast %696 : vector<1x256xf32> to vector<4x256xf32>
    %699 = arith.mulf %697, %698 : vector<4x256xf32>
    %700 = arith.addf %676, %699 : vector<4x256xf32>
    %c8_503 = arith.constant 8 : index
    %c3_504 = arith.constant 3 : index
    %c0_505 = arith.constant 0 : index
    %701 = vector.load %arg10[%c8_503, %c3_504, %c0_505] : memref<9x4x256xf32, #tpu.memory_space<vmem>>, vector<1x1x256xf32>
    %702 = vector.shape_cast %701 : vector<1x1x256xf32> to vector<1x256xf32>
    %703 = vector.broadcast %494 : vector<4x1xf32> to vector<4x256xf32>
    %704 = vector.broadcast %702 : vector<1x256xf32> to vector<4x256xf32>
    %705 = arith.mulf %703, %704 : vector<4x256xf32>
    %706 = arith.addf %682, %705 : vector<4x256xf32>
    %707 = arith.addf %688, %694 : vector<4x256xf32>
    %708 = arith.addf %700, %706 : vector<4x256xf32>
    %709 = arith.addf %707, %708 : vector<4x256xf32>
    %710 = vector.broadcast %458 : vector<4x1xf32> to vector<4x256xf32>
    %711 = arith.addf %709, %710 : vector<4x256xf32>
    %c0_506 = arith.constant 0 : index
    %c8_507 = arith.constant 8 : index
    %c0_508 = arith.constant 0 : index
    %712 = vector.load %arg7[%c0_506, %c8_507, %c0_508] : memref<1x12x256xf32, #tpu.memory_space<vmem>>, vector<1x4x256xf32>
    %713 = vector.shape_cast %712 : vector<1x4x256xf32> to vector<4x256xf32>
    %714 = vector.shape_cast %711 : vector<4x256xf32> to vector<1x4x256xf32>
    tpu.vector_store %arg7[%c0_506, %c8_507, %c0_508], %714 {strides = array<i32>} : memref<1x12x256xf32, #tpu.memory_space<vmem>>, vector<1x4x256xf32>,
    %c2_509 = arith.constant 2 : index
    %c0_510 = arith.constant 0 : index
    %c0_511 = arith.constant 0 : index
    %715 = vector.load %arg8[%c2_509, %c0_510, %c0_511] : memref<4x4x256xf32, #tpu.memory_space<vmem>>, vector<1x4x256xf32>
    %716 = vector.shape_cast %715 : vector<1x4x256xf32> to vector<4x256xf32>
    %c0_512 = arith.constant 0 : index
    %c128_513 = arith.constant 128 : index
    %717 = vector.load %arg9[%c0_512, %c128_513] : memref<4x512xf32, #tpu.memory_space<vmem>>, vector<4x256xf32>
    tpu.vector_store %arg9[%c0_512, %c128_513], %716 {strides = array<i32>} : memref<4x512xf32, #tpu.memory_space<vmem>>, vector<4x256xf32>,
    %c0_514 = arith.constant 0 : index
    %c111_515 = arith.constant 111 : index
    %718 = vector.load %arg9[%c0_514, %c111_515] : memref<4x512xf32, #tpu.memory_space<vmem>>, vector<4x256xf32>
    %719 = vector.broadcast %4 : vector<1x256xf32> to vector<4x256xf32>
    %720 = arith.mulf %718, %719 : vector<4x256xf32>
    %c0_516 = arith.constant 0 : index
    %c112_517 = arith.constant 112 : index
    %721 = vector.load %arg9[%c0_516, %c112_517] : memref<4x512xf32, #tpu.memory_space<vmem>>, vector<4x256xf32>
    %c0_518 = arith.constant 0 : index
    %c113_519 = arith.constant 113 : index
    %722 = vector.load %arg9[%c0_518, %c113_519] : memref<4x512xf32, #tpu.memory_space<vmem>>, vector<4x256xf32>
    %723 = vector.broadcast %5 : vector<1x256xf32> to vector<4x256xf32>
    %724 = arith.mulf %722, %723 : vector<4x256xf32>
    %c0_520 = arith.constant 0 : index
    %c127_521 = arith.constant 127 : index
    %725 = vector.load %arg9[%c0_520, %c127_521] : memref<4x512xf32, #tpu.memory_space<vmem>>, vector<4x256xf32>
    %726 = vector.broadcast %4 : vector<1x256xf32> to vector<4x256xf32>
    %727 = arith.mulf %725, %726 : vector<4x256xf32>
    %728 = arith.addf %720, %727 : vector<4x256xf32>
    %c0_522 = arith.constant 0 : index
    %c128_523 = arith.constant 128 : index
    %729 = vector.load %arg9[%c0_522, %c128_523] : memref<4x512xf32, #tpu.memory_space<vmem>>, vector<4x256xf32>
    %730 = arith.addf %721, %729 : vector<4x256xf32>
    %c0_524 = arith.constant 0 : index
    %c129_525 = arith.constant 129 : index
    %731 = vector.load %arg9[%c0_524, %c129_525] : memref<4x512xf32, #tpu.memory_space<vmem>>, vector<4x256xf32>
    %732 = vector.broadcast %5 : vector<1x256xf32> to vector<4x256xf32>
    %733 = arith.mulf %731, %732 : vector<4x256xf32>
    %734 = arith.addf %724, %733 : vector<4x256xf32>
    %c0_526 = arith.constant 0 : index
    %c143_527 = arith.constant 143 : index
    %735 = vector.load %arg9[%c0_526, %c143_527] : memref<4x512xf32, #tpu.memory_space<vmem>>, vector<4x256xf32>
    %736 = vector.broadcast %4 : vector<1x256xf32> to vector<4x256xf32>
    %737 = arith.mulf %735, %736 : vector<4x256xf32>
    %738 = arith.addf %728, %737 : vector<4x256xf32>
    %c0_528 = arith.constant 0 : index
    %c144_529 = arith.constant 144 : index
    %739 = vector.load %arg9[%c0_528, %c144_529] : memref<4x512xf32, #tpu.memory_space<vmem>>, vector<4x256xf32>
    %740 = arith.addf %730, %739 : vector<4x256xf32>
    %c0_530 = arith.constant 0 : index
    %c145_531 = arith.constant 145 : index
    %741 = vector.load %arg9[%c0_530, %c145_531] : memref<4x512xf32, #tpu.memory_space<vmem>>, vector<4x256xf32>
    %742 = vector.broadcast %5 : vector<1x256xf32> to vector<4x256xf32>
    %743 = arith.mulf %741, %742 : vector<4x256xf32>
    %744 = arith.addf %734, %743 : vector<4x256xf32>
    %745 = arith.addf %738, %740 : vector<4x256xf32>
    %746 = arith.addf %745, %744 : vector<4x256xf32>
    %747 = vector.broadcast %6 : vector<1x256xf32> to vector<4x256xf32>
    %748 = arith.mulf %746, %747 : vector<4x256xf32>
    %c0_532 = arith.constant 0 : index
    %c8_533 = arith.constant 8 : index
    %c0_534 = arith.constant 0 : index
    %749 = vector.load %arg7[%c0_532, %c8_533, %c0_534] : memref<1x12x256xf32, #tpu.memory_space<vmem>>, vector<1x4x256xf32>
    %750 = vector.shape_cast %749 : vector<1x4x256xf32> to vector<4x256xf32>
    %751 = arith.addf %750, %748 : vector<4x256xf32>
    %c0_535 = arith.constant 0 : index
    %c8_536 = arith.constant 8 : index
    %c0_537 = arith.constant 0 : index
    %752 = vector.load %arg7[%c0_535, %c8_536, %c0_537] : memref<1x12x256xf32, #tpu.memory_space<vmem>>, vector<1x4x256xf32>
    %753 = vector.shape_cast %752 : vector<1x4x256xf32> to vector<4x256xf32>
    %754 = vector.shape_cast %751 : vector<4x256xf32> to vector<1x4x256xf32>
    tpu.vector_store %arg7[%c0_535, %c8_536, %c0_537], %754 {strides = array<i32>} : memref<1x12x256xf32, #tpu.memory_space<vmem>>, vector<1x4x256xf32>,
    %c1_538 = arith.constant 1 : index
    %c0_539 = arith.constant 0 : index
    %c0_540 = arith.constant 0 : index
    %755 = vector.load %arg8[%c1_538, %c0_539, %c0_540] : memref<4x4x256xf32, #tpu.memory_space<vmem>>, vector<1x4x256xf32>
    %756 = vector.shape_cast %755 : vector<1x4x256xf32> to vector<4x256xf32>
    %c0_541 = arith.constant 0 : index
    %c0_542 = arith.constant 0 : index
    %c0_543 = arith.constant 0 : index
    %757 = vector.load %arg7[%c0_541, %c0_542, %c0_543] : memref<1x12x256xf32, #tpu.memory_space<vmem>>, vector<1x4x256xf32>
    %758 = vector.shape_cast %757 : vector<1x4x256xf32> to vector<4x256xf32>
    %759 = vector.shape_cast %756 : vector<4x256xf32> to vector<1x4x256xf32>
    tpu.vector_store %arg7[%c0_541, %c0_542, %c0_543], %759 {strides = array<i32>} : memref<1x12x256xf32, #tpu.memory_space<vmem>>, vector<1x4x256xf32>,
    %c2_544 = arith.constant 2 : index
    %c0_545 = arith.constant 0 : index
    %c0_546 = arith.constant 0 : index
    %760 = vector.load %arg8[%c2_544, %c0_545, %c0_546] : memref<4x4x256xf32, #tpu.memory_space<vmem>>, vector<1x4x256xf32>
    %761 = vector.shape_cast %760 : vector<1x4x256xf32> to vector<4x256xf32>
    %c0_547 = arith.constant 0 : index
    %c4_548 = arith.constant 4 : index
    %c0_549 = arith.constant 0 : index
    %762 = vector.load %arg7[%c0_547, %c4_548, %c0_549] : memref<1x12x256xf32, #tpu.memory_space<vmem>>, vector<1x4x256xf32>
    %763 = vector.shape_cast %762 : vector<1x4x256xf32> to vector<4x256xf32>
    %764 = vector.shape_cast %761 : vector<4x256xf32> to vector<1x4x256xf32>
    tpu.vector_store %arg7[%c0_547, %c4_548, %c0_549], %764 {strides = array<i32>} : memref<1x12x256xf32, #tpu.memory_space<vmem>>, vector<1x4x256xf32>,
    return
  }
  func.func @transform_0(%arg0: i32) -> (i32, i32) {
    %c0_i32 = arith.constant 0 : i32
    %c0_i32_0 = arith.constant 0 : i32
    %c0_i32_1 = arith.constant 0 : i32
    return %c0_i32, %c0_i32_0 : i32, i32
  }
  func.func @transform_1(%arg0: i32) -> (i32, i32, i32) {
    %c0_i32 = arith.constant 0 : i32
    %c0_i32_0 = arith.constant 0 : i32
    %c0_i32_1 = arith.constant 0 : i32
    return %arg0, %c0_i32, %c0_i32_0 : i32, i32, i32
  }
  func.func @transform_2(%arg0: i32) -> (i32, i32) {
    %c0_i32 = arith.constant 0 : i32
    %c0_i32_0 = arith.constant 0 : i32
    %c0_i32_1 = arith.constant 0 : i32
    return %c0_i32, %c0_i32_0 : i32, i32
  }
  func.func @transform_3(%arg0: i32) -> (i32, i32) {
    %c0_i32 = arith.constant 0 : i32
    %c0_i32_0 = arith.constant 0 : i32
    %c0_i32_1 = arith.constant 0 : i32
    return %c0_i32, %c0_i32_0 : i32, i32
  }
  func.func @transform_4(%arg0: i32) -> (i32, i32) {
    %c0_i32 = arith.constant 0 : i32
    %c0_i32_0 = arith.constant 0 : i32
    %c0_i32_1 = arith.constant 0 : i32
    return %c0_i32, %c0_i32_0 : i32, i32
  }
  func.func @transform_5(%arg0: i32) -> (i32, i32) {
    %c0_i32 = arith.constant 0 : i32
    %c0_i32_0 = arith.constant 0 : i32
    %c0_i32_1 = arith.constant 0 : i32
    return %c0_i32, %c0_i32_0 : i32, i32
  }
  func.func @transform_6(%arg0: i32) -> (i32, i32, i32) {
    %c0_i32 = arith.constant 0 : i32
    %c0_i32_0 = arith.constant 0 : i32
    %c0_i32_1 = arith.constant 0 : i32
    return %arg0, %c0_i32, %c0_i32_0 : i32, i32, i32
  }
}

</mosaic_0001>

<bundles_post_ra>
// kernel: cell_mif_forward.1
= control target key start
LH: loop header
LB: loop body
LE: loop exit
PB: predicated region body
PF: predicated region fallthrough
CT: control target
= control target key end

     0   :  { %s2769_s21 = smov 0   ;;  %s3801_s0 = inlined_call_operand.vmem [shape: f32[3,256], index: 0, kind: input, shape index: {}]   ;;  %s3802_s1 = inlined_call_operand.vmem [shape: f32[2,4,256], index: 1, kind: input, shape index: {}]   ;;  %s3803_s2 = inlined_call_operand.vmem [shape: f32[4,5], index: 2, kind: input, shape index: {}]   ;;  %s3804_s3 = inlined_call_operand.vmem [shape: f32[4,37], index: 3, kind: input, shape index: {}]   ;;  %s3805_s4 = inlined_call_operand.vmem [shape: f32[4,5], index: 4, kind: input, shape index: {}]   ;;  %s3806_s5 = inlined_call_operand.vmem [shape: f32[4,37], index: 5, kind: input, shape index: {}]   ;;  %s3807_s6 = inlined_call_operand.vmem [shape: f32[2,12,256], index: 6, kind: output, shape index: {}]  }
   0x1 LB: > { %s2522_s22 = sadd.s32 4294967295, %s2684_s21   ;;  %p2526_p0 = scmp.ge.s32.totalorder %s2684_s21, 1  ;;  %s2684_s21 = sphi %s2769_s21, %s16_s21  }
   0x2   : > { %p212_p1 = scmp.lt.s32.totalorder %s2684_s21, 3 }
   0x4   : > { %p213_p2 = pnand %p2526_p0, %p212_p1 }
   0x6   : > { %216 = sbr.rel (%p213_p2) target bundleno = 772 (0x304), region = 44 }
   0xb   : > { %v262_v0 = vld [vmem:[%s3803_s2] sm:$0xf]  ;;  %v3842_v1 = vmov 2   ;;  %v2687_v2 = vmov 1   ;;  %v270_v3 = vlaneseq  ;;  %v2688_v5 = vmov 0.0   ;;  %p242_p3 = scmp.lt.s32.totalorder %s2522_s22, 1 }
   0xc   : > { %2596 = vset.pattern.permute.xlu1 %v3842_v1  ;;  %2594 = vset.pattern.permute.xlu0 %v2687_v2  ;;  %253 = vst [vmem:[#allocation3 + $0xc] sm:$0xf] %v2688_v5  ;;  %252 = vst [vmem:[#allocation3] sm:$0xf] %v2688_v5  ;;  %v3840_v10 = vmov 3   ;;  %v2690_v11 = vmov 0  }
   0xd   : > { %304 = vperm.xlu1 %2596, %v262_v0   ;;  %285 = vperm.xlu0 %2594, %v262_v0   ;;  %v271_v4 = vshrl.u32 %v270_v3, 7  ;;  %v254_v6 = vld [vmem:[%s3801_s0] ss:$4 sm:$0x3]  ;;  %s3967_s22 = smov (!%p242_p3, %s2522_s22), 1  ;;  %v3843_v18 = vmov 4  }
   0xe   : > { %v2531_v9 = vld [vmem:[%s3801_s0 + $0x1] ss:$4 sm:$0x3]  ;;  %s2535_s29 = sshll.u32 %s3967_s22, 3  ;;  %s2692_s9 = smov 111   ;;  %v3837_v23 = vmov 6  }
   0xf   : > { %v2785_v7 = vsub.s32 0, %v271_v4  ;;  %v2787_v8 = vsub.s32 1, %v271_v4  ;;  %s246_s8 = scalar_lea.vmem %s3802_s1, %s2535_s29  ;;  %s2693_s10 = smov 127   ;;  %v2816_v22 = vld [vmem:[%s3804_s3] sm:$0xf]  ;;  %v3833_v24 = vmov 9  }
  0x10   : > { %v259_v17 = vld [vmem:[%s246_s8] sm:$0xff]  ;;  %s2694_s11 = smov 113   ;;  %s2695_s12 = smov 15   ;;  %v3839_v25 = vmov 5   ;;  %v3831_v26 = vmov 12   ;;  %v3841_v27 = vmov 7  }
  0x11   : > { %2597 = vset.pattern.permute.xlu1 %v3840_v10  ;;  %2595 = vset.pattern.permute.xlu0 %v2690_v11  ;;  %v365_v12 = vrot.slane %v254_v6, %v2785_v7  ;;  %v369_v13 = vrot.slane %v254_v6, %v2787_v8  ;;  %v416_v14 = vrot.slane %v2531_v9, %v2785_v7  ;;  %v260_v19 = vmax.f32 %v259_v17, 0.0  ;;  %s2696_s13 = smov 1   ;;  %s2697_s14 = smov 112  }
  0x12   : > { %323 = vperm.xlu1 %2597, %v262_v0   ;;  %266 = vperm.xlu0 %2595, %v262_v0   ;;  %v420_v15 = vrot.slane %v2531_v9, %v2787_v8  ;;  %s2698_s15 = smov 17   ;;  %v3829_v28 = vmov 15   ;;  %v3835_v29 = vmov 8   ;;  %v3827_v30 = vmov 18   ;;  %s2726_s18 = smov 16  }
  0x13   : > { %v370_v16 = vcombine.low %v365_v12, %v369_v13  ;;  %261 = vst [vmem:[#allocation4] sm:$0xff] %v260_v19  ;;  %v520_v21 = vld [vmem:[#allocation3 + $0xc] sm:$0xf]  ;;  %v3832_v31 = vmov 10   ;;  %v3823_v32 = vmov 21   ;;  %v3838_v33 = vmov 11  }
  0x14   : > { %v421_v20 = vcombine.low %v416_v14, %v420_v15  ;;  %v3819_v34 = vmov 24   ;;  %v3830_v35 = vmov 13   ;;  %v3815_v36 = vmov 27   ;;  %s2732_s23 = smov 96   ;;  %s2536_s24 = sshll.u32 %s3967_s22, 5 }
  0x15   : > { %v3836_v37 = vmov 14   ;;  %v3811_v38 = vmov 30   ;;  %v3828_v39 = vmov 16   ;;  %v3834_v40 = vmov 17   ;;  %s3351_s27 = scalar_lea.vmem %s3807_s6, %s2536_s24  ;;  %s2733_s7 = smov 126  }
  0x16   : > { %2598 = vset.pattern.permute.xlu1 %v3843_v18  ;;  %371 = vrot.lane.b32.xlu0 %v370_v16, %s2692_s9  ;;  %v3825_v41 = vmov 19   ;;  %v3826_v42 = vmov 20   ;;  %v3821_v43 = vmov 22   ;;  %v3824_v44 = vmov 23  }
  0x17   : > { %346 = vperm.xlu1 %2598, %v262_v0   ;;  %v3817_v45 = vmov 25   ;;  %v3822_v46 = vmov 26   ;;  %v3814_v47 = vmov 28   ;;  %v3820_v49 = vmov 29  }
  0x18   : > { %v3808_v63 = vmov 31   ;;  %vm425_vm0 = vcmask 924672   ;;  %vm374_vm1 = vcmask 908288   ;;  %vm465_vm2 = vcmask 7168  }
  0x19   : > { %vm450_vm3 = vcmask 1039360   ;;  %vm390_vm4 = vcmask 138240   ;;  %vm440_vm5 = vcmask 121856   ;;  %vm388_vm6 = vcmask 1043456  }
  0x1a   : > { %447 = vrot.lane.b32.xlu0 %v370_v16, %s2693_s10  ;;  %v283_v48 = vld [vmem:[#allocation4 + $0x1] ss:$4 sm:$0x3]  ;;  %v302_v50 = vld [vmem:[#allocation4 + $0x2] ss:$4 sm:$0x3] }
  0x1b   : > { %422 = vrot.lane.b32.xlu1 %v421_v20, %s2694_s11  ;;  %v321_v51 = vld [vmem:[#allocation4 + $0x3] ss:$4 sm:$0x3]  ;;  %v263_v52 = vld [vmem:[#allocation4] ss:$4 sm:$0x3]  ;;  %v292_v55 = vrot.slane %v283_v48, %v2785_v7  ;;  %v296_v56 = vrot.slane %v283_v48, %v2787_v8  ;;  %v311_v57 = vrot.slane %v302_v50, %v2785_v7  ;;  %v315_v58 = vrot.slane %v302_v50, %v2787_v8 }
  0x1c   : > { %2599 = vset.pattern.permute.xlu1 %v2687_v2  ;;  %v330_v59 = vrot.slane %v321_v51, %v2785_v7  ;;  %v334_v60 = vrot.slane %v321_v51, %v2787_v8  ;;  %v273_v61 = vrot.slane %v263_v52, %v2785_v7  ;;  %v277_v62 = vrot.slane %v263_v52, %v2787_v8 }
  0x1d   : > { %vm405_vm7 = vcmask 130048   ;;  %vm530_vm8 = vcmask 916480   ;;  %vm2330_vm9 = vcmask 785408   ;;  %vm2388_vm10 = vcmask 1031168  }
  0x1e   : > { %498 = vrot.lane.b32.xlu0 %v370_v16, %s2695_s12 }
  0x1f   : > { %475 = vrot.lane.b32.xlu1 %v421_v20, %s2696_s13 }
  0x22   : > { %525 = vrot.lane.b32.xlu0 %v520_v21, %s2697_s14 }
  0x23   : > { %537 = vrot.lane.b32.xlu1 %v421_v20, %s2698_s15 }
  0x26   : > { %562 = vperm.xlu0 %2595, %v2816_v22  }
  0x27   : > { %580 = vperm.xlu1 %2599, %v2816_v22  }
  0x2a   : > { %2601 = vset.pattern.permute.xlu0 %v3840_v10 }
  0x2b   : > { %2600 = vset.pattern.permute.xlu1 %v3842_v1  ;;  %616 = vperm.xlu0 %2601, %v2816_v22  }
  0x2c   : > { %598 = vperm.xlu1 %2600, %v2816_v22  }
  0x2f   : > { %2604 = vset.pattern.permute.xlu0 %v3837_v23 }
  0x30   : > { %2602 = vset.pattern.permute.xlu1 %v3843_v18  ;;  %676 = vperm.xlu0 %2604, %v2816_v22  }
  0x31   : > { %634 = vperm.xlu1 %2602, %v2816_v22  }
  0x34   : > { %2607 = vset.pattern.permute.xlu0 %v3833_v24 }
  0x35   : > { %2603 = vset.pattern.permute.xlu1 %v3839_v25  ;;  %738 = vperm.xlu0 %2607, %v2816_v22  }
  0x36   : > { %655 = vperm.xlu1 %2603, %v2816_v22  }
  0x39   : > { %2610 = vset.pattern.permute.xlu0 %v3831_v26 }
  0x3a   : > { %2605 = vset.pattern.permute.xlu1 %v3841_v27  ;;  %800 = vperm.xlu0 %2610, %v2816_v22  }
  0x3b   : > { %697 = vperm.xlu1 %2605, %v2816_v22  }
  0x3e   : > { %2613 = vset.pattern.permute.xlu0 %v3829_v28 }
  0x3f   : > { %2606 = vset.pattern.permute.xlu1 %v3835_v29  ;;  %863 = vperm.xlu0 %2613, %v2816_v22  }
  0x40   : > { %717 = vperm.xlu1 %2606, %v2816_v22  }
  0x43   : > { %2616 = vset.pattern.permute.xlu0 %v3827_v30 }
  0x44   : > { %2608 = vset.pattern.permute.xlu1 %v3832_v31  ;;  %925 = vperm.xlu0 %2616, %v2816_v22  }
  0x45   : > { %759 = vperm.xlu1 %2608, %v2816_v22  }
  0x48   : > { %2619 = vset.pattern.permute.xlu0 %v3823_v32 }
  0x49   : > { %2609 = vset.pattern.permute.xlu1 %v3838_v33  ;;  %987 = vperm.xlu0 %2619, %v2816_v22  }
  0x4a   : > { %780 = vperm.xlu1 %2609, %v2816_v22  }
  0x4d   : > { %2622 = vset.pattern.permute.xlu0 %v3819_v34 }
  0x4e   : > { %2611 = vset.pattern.permute.xlu1 %v3830_v35  ;;  %1049 = vperm.xlu0 %2622, %v2816_v22  }
  0x4f   : > { %821 = vperm.xlu1 %2611, %v2816_v22  }
  0x52   : > { %2625 = vset.pattern.permute.xlu0 %v3815_v36  ;;  %v1527_v36 = vld [vmem:[#allocation3 + $0xc] sm:$0xf] }
  0x53   : > { %2612 = vset.pattern.permute.xlu1 %v3836_v37  ;;  %1112 = vperm.xlu0 %2625, %v2816_v22  }
  0x54   : > { %842 = vperm.xlu1 %2612, %v2816_v22  }
  0x57   : > { %2628 = vset.pattern.permute.xlu0 %v3811_v38 }
  0x58   : > { %2614 = vset.pattern.permute.xlu1 %v3828_v39 }
  0x59   : > { %883 = vperm.xlu1 %2614, %v2816_v22  }
  0x5d   : > { %2615 = vset.pattern.permute.xlu1 %v3834_v40 }
  0x5e   : > { %904 = vperm.xlu1 %2615, %v2816_v22  }
  0x62   : > { %2617 = vset.pattern.permute.xlu1 %v3825_v41 }
  0x63   : > { %946 = vperm.xlu1 %2617, %v2816_v22  }
  0x67   : > { %2618 = vset.pattern.permute.xlu1 %v3826_v42 }
  0x68   : > { %966 = vperm.xlu1 %2618, %v2816_v22  }
  0x6c   : > { %2620 = vset.pattern.permute.xlu1 %v3821_v43 }
  0x6d   : > { %1008 = vperm.xlu1 %2620, %v2816_v22  }
  0x71   : > { %2621 = vset.pattern.permute.xlu1 %v3824_v44 }
  0x72   : > { %1029 = vperm.xlu1 %2621, %v2816_v22  }
  0x76   : > { %2623 = vset.pattern.permute.xlu1 %v3817_v45 }
  0x77   : > { %1070 = vperm.xlu1 %2623, %v2816_v22  }
  0x7b   : > { %2624 = vset.pattern.permute.xlu1 %v3822_v46 }
  0x7c   : > { %1091 = vperm.xlu1 %2624, %v2816_v22  }
  0x80   : > { %2626 = vset.pattern.permute.xlu1 %v3814_v47 }
  0x81   : > { %1132 = vperm.xlu1 %2626, %v2816_v22  }
  0x85   : > { %2627 = vset.pattern.permute.xlu1 %v3820_v49 }
  0x86   : > { %1153 = vperm.xlu1 %2627, %v2816_v22  }
  0x88   : > { %v305_v53 = vpop.permute.xlu1 %304  ;;  %v286_v54 = vpop.permute.xlu0 %285 }
  0x89   : > { %v299_v0 = vmul.f32 %v292_v55, %v286_v54  ;;  %v300_v3 = vmul.f32 %v296_v56, %v286_v54  ;;  %v318_v4 = vmul.f32 %v311_v57, %v305_v53  ;;  %v319_v5 = vmul.f32 %v315_v58, %v305_v53  ;;  %v497_v58 = vld [vmem:[#allocation3 + $0xc] sm:$0xf] }
  0x8a   : > { %2629 = vset.pattern.permute.xlu1 %v3808_v63 }
  0x8d   : > { %v324_v6 = vpop.permute.xlu1 %323  ;;  %v267_v9 = vpop.permute.xlu0 %266 }
  0x8e   : > { %v337_v12 = vmul.f32 %v330_v59, %v324_v6  ;;  %v338_v13 = vmul.f32 %v334_v60, %v324_v6  ;;  %v280_v14 = vmul.f32 %v273_v61, %v267_v9  ;;  %v281_v15 = vmul.f32 %v277_v62, %v267_v9  ;;  %v474_v61 = vld [vmem:[#allocation3 + $0xc] sm:$0xf] }
  0x90   : > { %v341_v16 = vadd.f32 %v337_v12, %v318_v4  ;;  %v342_v17 = vadd.f32 %v338_v13, %v319_v5  ;;  %v339_v19 = vadd.f32 %v299_v0, %v280_v14  ;;  %v340_v20 = vadd.f32 %v300_v3, %v281_v15  ;;  %v536_v4 = vld [vmem:[#allocation3 + $0xc] sm:$0xf] }
  0x91   : > { %v372_v21 = vpop.permute.xlu0 %371 }
  0x92   : > { %v347_v48 = vpop.permute.xlu1 %346  ;;  %v343_v50 = vadd.f32 %v341_v16, %v339_v19  ;;  %v344_v51 = vadd.f32 %v342_v17, %v340_v20  ;;  %v2901_v13 = vrot.slane %v372_v21, 4 }
  0x94   : > { %v349_v52 = vadd.f32 %v347_v48, %v343_v50  ;;  %v350_v63 = vadd.f32 %v347_v48, %v344_v51  ;;  %3872 = vst [vmem:[#allocation6_spill] sm:$0xff] %v2901_v13 }
  0x95   : > { %v448_v55 = vpop.permute.xlu0 %447 }
  0x96   : > { %v353_v54 = vcombine.low %v349_v52, %v350_v63  ;;  %v423_v56 = vpop.permute.xlu1 %422  ;;  %v2919_v51 = vrot.slane %v448_v55, 4  ;;  %v2926_v52 = vsel %vm374_vm1, %v2901_v13, %v372_v21 }
  0x97   : > { %v2906_v15 = vrot.slane %v423_v56, 4  ;;  %3876 = vst [vmem:[#allocation10_spill] sm:$0xff] %v2926_v52 }
  0x98   : > { %v2886_v53 = vmax.f32 %v353_v54, 0.0  ;;  %3875 = vst [vmem:[#allocation9_spill] sm:$0xff] %v2919_v51 }
  0x99   : > { %v499_v57 = vpop.permute.xlu0 %498  ;;  %3873 = vst [vmem:[#allocation7_spill] sm:$0xff] %v2906_v15  ;;  %v2913_v19 = vsel %vm425_vm0, %v2906_v15, %v423_v56 }
  0x9a   : > { %358 = vst [vmem:[#allocation3 + $0x4] sm:$0xff] %v2886_v53  ;;  %v2889_v59 = vrot.slane %v499_v57, 4  ;;  %v476_v60 = vpop.permute.xlu1 %475  ;;  %472 = vst [vmem:[#allocation4 + $0x20] sm:$0xff] %v2886_v53 }
  0x9b   : > { %v2892_v62 = vrot.slane %v476_v60, 4  ;;  %3874 = vst [vmem:[#allocation8_spill] sm:$0xff] %v2913_v19 }
  0x9c   : > { %3871 = vst [vmem:[#allocation5_spill] sm:$0xff] %v2889_v59  ;;  %v505_v0 = vmul.f32 %v2889_v59, %v497_v58 }
  0x9d   : > { %v482_v3 = vmul.f32 %v2892_v62, %v474_v61  ;;  %v2933_v58 = vsel %vm465_vm2, %v2892_v62, %v476_v60  ;;  %v2947_v60 = vsel %vm450_vm3, %v2919_v51, %v448_v55  ;;  %v2962_v55 = vsel %vm440_vm5, %v2889_v59, %v499_v57  ;;  %v526_v47 = vpop.permute.xlu0 %525 }
  0x9e   : > { %v538_v63 = vpop.permute.xlu1 %537  ;;  %510 = vrot.lane.b32.xlu0 %v505_v0, %s2694_s11  ;;  %3877 = vst [vmem:[#allocation11_spill] sm:$0xff] %v2933_v58  ;;  %3878 = vst [vmem:[#allocation12_spill] sm:$0xff] %v2947_v60  ;;  %v528_v23 = vrot.slane %v526_v47, 4 }
  0x9f   : > { %v2897_v5 = vrot.slane %v538_v63, 4  ;;  %487 = vrot.lane.b32.xlu1 %v482_v3, %s2693_s10  ;;  %v481_v3 = vmul.f32 %v2933_v58, %v2886_v53  ;;  %3881 = vst [vmem:[#allocation15_spill] sm:$0xff] %v2962_v55 }
  0xa1   : > { %v395_v6 = vld [vmem:[#allocation3 + $0x8] sm:$0xf]  ;;  %v544_v9 = vmul.f32 %v2897_v5, %v536_v4  ;;  %v394_v17 = vld [vmem:[#allocation3] sm:$0xff]  ;;  %v923_v25 = vld [vmem:[#allocation4 + $0x22] ss:$4 sm:$0x3] }
  0xa2   : > { %v360_v12 = vld [vmem:[#allocation3 + $0x8] sm:$0xf]  ;;  %400 = vrot.lane.b32.xlu0 %v395_v6, %s2726_s18  ;;  %v2904_v14 = vpop.permute.xlu1 %580  ;;  %v429_v48 = vmul.f32 %v2913_v19, %v394_v17  ;;  %v378_v61 = vmul.f32 %v394_v17, %v2926_v52  ;;  %v2951_v6 = vsel %vm390_vm4, %v2897_v5, %v538_v63  ;;  %v3809_v63 = vmov 33  }
  0xa3   : > { %549 = vrot.lane.b32.xlu1 %v544_v9, %s2692_s9  ;;  %v379_v16 = vmul.f32 %v2901_v13, %v360_v12  ;;  %v446_v50 = vld [vmem:[#allocation3 + $0x8] sm:$0xf]  ;;  %3879 = vst [vmem:[#allocation13_spill] sm:$0xff] %v2951_v6  ;;  %v454_v9 = vmul.f32 %v2947_v60, %v394_v17 }
  0xa4   : > { %v455_v54 = vmul.f32 %v2919_v51, %v446_v50  ;;  %v411_v0 = vld [vmem:[#allocation3 + $0x8] sm:$0xf]  ;;  %v3818_v50 = vmov 32  }
  0xa5   : > { %v430_v21 = vmul.f32 %v2906_v15, %v411_v0  ;;  %v1317_v0 = vld [vmem:[%s3805_s4] sm:$0xf] }
  0xa6   : > { %384 = vrot.lane.b32.xlu0 %v379_v16, %s2698_s15  ;;  %v543_v16 = vmul.f32 %v2951_v6, %v2886_v53 }
  0xa7   : > { %398 = vrot.lane.b32.xlu1 %v394_v17, %s2726_s18  ;;  %v2916_v20 = vpop.permute.xlu1 %598 }
  0xaa   : > { %433 = vrot.lane.b32.xlu0 %v429_v48, %s2695_s12  ;;  %v504_v48 = vmul.f32 %v2962_v55, %v2886_v53 }
  0xab   : > { %523 = vrot.lane.b32.xlu1 %v2886_v53, %s2697_s14 }
  0xac   : > { %v2929_v56 = vpop.permute.xlu1 %634 }
  0xae   : > { %460 = vrot.lane.b32.xlu0 %v455_v54, %s2696_s13  ;;  %v3812_v54 = vmov 36  }
  0xaf   : > { %382 = vrot.lane.b32.xlu1 %v378_v61, %s2698_s15 }
  0xb1   : > { %v2941_v4 = vpop.permute.xlu1 %655 }
  0xb2   : > { %485 = vrot.lane.b32.xlu0 %v481_v3, %s2693_s10  ;;  %v3810_v3 = vmov 34  }
  0xb3   : > { %435 = vrot.lane.b32.xlu1 %v430_v21, %s2695_s12  ;;  %v2986_v21 = vld [vmem:[#allocation3 + $0xc] sm:$0xf] }
  0xb4   : > { %3883 = vst [vmem:[#allocation17_spill] sm:$0xff] %v2986_v21 }
  0xb6   : > { %1174 = vperm.xlu0 %2628, %v2816_v22   ;;  %v2955_v12 = vpop.permute.xlu1 %697 }
  0xb7   : > { %3880 = vst [vmem:[#allocation14_spill] sm:$0xff] %v2955_v12  ;;  %458 = vrot.lane.b32.xlu1 %v454_v9, %s2696_s13  ;;  %v2307_v9 = vmul.f32 %v2986_v21, %v2892_v62 }
  0xba   : > { %547 = vrot.lane.b32.xlu0 %v543_v16, %s2692_s9 }
  0xbb   : > { %1195 = vperm.xlu1 %2629, %v2816_v22   ;;  %2631 = vset.pattern.permute.xlu0 %v3809_v63  ;;  %v2967_v17 = vpop.permute.xlu1 %717  ;;  %v3816_v63 = vmov 35  }
  0xbe   : > { %1236 = vperm.xlu0 %2631, %v2816_v22  }
  0xbf   : > { %508 = vrot.lane.b32.xlu1 %v504_v48, %s2694_s11  ;;  %v1497_v48 = vld [vmem:[#allocation3 + $0xc] sm:$0xf] }
  0xc0   : > { %2630 = vset.pattern.permute.xlu1 %v3818_v50  ;;  %v2974_v57 = vpop.permute.xlu1 %759 }
  0xc2   : > { %2634 = vset.pattern.permute.xlu0 %v3812_v54  ;;  %v1513_v54 = vld [vmem:[#allocation3 + $0xc] sm:$0xf] }
  0xc3   : > { %1303 = vperm.xlu0 %2634, %v2816_v22   ;;  %1215 = vperm.xlu1 %2630, %v2816_v22  }
  0xc5   : > { %v2979_v61 = vpop.permute.xlu1 %780 }
  0xc6   : > { %3882 = vst [vmem:[#allocation16_spill] sm:$0xff] %v2979_v61 }
  0xc7   : > { %2637 = vset.pattern.permute.xlu0 %v3842_v1  ;;  %2632 = vset.pattern.permute.xlu1 %v3810_v3  ;;  %v1499_v3 = vmul.f32 %v1497_v48, %v2889_v59  ;;  %v3007_v48 = vpop.permute.xlu0 %562  ;;  %v881_v1 = vld [vmem:[#allocation4 + $0x20] ss:$4 sm:$0x3] }
  0xc8   : > { %1357 = vperm.xlu0 %2637, %v1317_v0   ;;  %1257 = vperm.xlu1 %2632, %v2816_v22   ;;  %v894_v47 = vrot.slane %v881_v1, %v2787_v8 }
  0xca   : > { %v2991_v16 = vpop.permute.xlu1 %821 }
  0xcc   : > { %2312 = vrot.lane.b32.xlu0 %v2307_v9, %s2697_s14  ;;  %2633 = vset.pattern.permute.xlu1 %v3816_v63 }
  0xcd   : > { %1278 = vperm.xlu1 %2633, %v2816_v22   ;;  %2641 = vset.pattern.permute.xlu0 %v2687_v2  ;;  %v1529_v22 = vmul.f32 %v1527_v36, %v2897_v5 }
  0xcf   : > { %v2999_v38 = vpop.permute.xlu1 %842 }
  0xd0   : > { %1504 = vrot.lane.b32.xlu0 %v1499_v3, %s2694_s11  ;;  %v3011_v3 = vpop.permute.xlu0 %616 }
  0xd1   : > { %2635 = vset.pattern.permute.xlu1 %v2690_v11 }
  0xd2   : > { %1321 = vperm.xlu1 %2635, %v1317_v0  }
  0xd4   : > { %1518 = vrot.lane.b32.xlu0 %v1513_v54, %s2697_s14  ;;  %v3005_v9 = vpop.permute.xlu1 %883  ;;  %v1481_v54 = vld [vmem:[#allocation3 + $0xc] sm:$0xf] }
  0xd5   : > { %v1483_v45 = vmul.f32 %v1481_v54, %v2892_v62 }
  0xd6   : > { %2636 = vset.pattern.permute.xlu1 %v2687_v2  ;;  %v3016_v2 = vpop.permute.xlu0 %676 }
  0xd7   : > { %1339 = vperm.xlu1 %2636, %v1317_v0  }
  0xd8   : > { %1534 = vrot.lane.b32.xlu0 %v1529_v22, %s2692_s9 }
  0xd9   : > { %v3013_v63 = vpop.permute.xlu1 %904 }
  0xda   : > { %v3025_v50 = vpop.permute.xlu0 %738 }
  0xdb   : > { %2638 = vset.pattern.permute.xlu1 %v3840_v10 }
  0xdc   : > { %1375 = vperm.xlu1 %2638, %v1317_v0  }
  0xde   : > { %v3018_v36 = vpop.permute.xlu1 %946  ;;  %v3034_v62 = vpop.permute.xlu0 %800 }
  0xe0   : > { %2639 = vset.pattern.permute.xlu1 %v3843_v18 }
  0xe1   : > { %1398 = vperm.xlu1 %2639, %v1317_v0   ;;  %v2351_v0 = vmul.f32 %v2986_v21, %v2897_v5 }
  0xe3   : > { %v3023_v22 = vpop.permute.xlu1 %966 }
  0xe5   : > { %1488 = vrot.lane.b32.xlu1 %v1483_v45, %s2693_s10 }
  0xe6   : > { %2640 = vset.pattern.permute.xlu1 %v2690_v11  ;;  %v3038_v11 = vpop.permute.xlu0 %863 }
  0xe7   : > { %3885 = vst [vmem:[#allocation19_spill] sm:$0xff] %v3038_v11 }
  0xe8   : > { %v3032_v34 = vpop.permute.xlu1 %1008 }
  0xe9   : > { %2341 = vrot.lane.b32.xlu1 %v2986_v21, %s2732_s23  ;;  %v902_v21 = vld [vmem:[#allocation4 + $0x21] ss:$4 sm:$0x3] }
  0xea   : > { %v926_v49 = vpop.permute.xlu0 %925  ;;  %v911_v55 = vrot.slane %v902_v21, %v2785_v7  ;;  %v915_v58 = vrot.slane %v902_v21, %v2787_v8 }
  0xed   : > { %2356 = vrot.lane.b32.xlu1 %v2351_v0, %s2732_s23  ;;  %v3036_v45 = vpop.permute.xlu1 %1029 }
  0xee   : > { %3884 = vst [vmem:[#allocation18_spill] sm:$0xff] %v3036_v45  ;;  %v3042_v43 = vpop.permute.xlu0 %987 }
  0xf2   : > { %v3040_v54 = vpop.permute.xlu1 %1070  ;;  %v3046_v32 = vpop.permute.xlu0 %1049 }
  0xf6   : > { %v3050_v0 = vpop.permute.xlu0 %1112 }
  0xf7   : > { %v3044_v46 = vpop.permute.xlu1 %1091  ;;  %3886 = vst [vmem:[#allocation20_spill] sm:$0xff] %v3050_v0 }
  0xfc   : > { %v3048_v5 = vpop.permute.xlu1 %1132 }
 0x101   : > { %v3052_v44 = vpop.permute.xlu1 %1153 }
 0x110   : > { %v3054_v41 = vpop.permute.xlu0 %510 }
 0x111   : > { %v488_v42 = vpop.permute.xlu1 %487 }
 0x114   : > { %v401_v30 = vpop.permute.xlu0 %400 }
 0x115   : > { %v3056_v39 = vpop.permute.xlu1 %549  ;;  %v403_v26 = vrot.slane %v401_v30, 4 }
 0x118   : > { %v385_v28 = vpop.permute.xlu0 %384 }
 0x119   : > { %v399_v35 = vpop.permute.xlu1 %398  ;;  %v387_v59 = vrot.slane %v385_v28, 4 }
 0x11a   : > { %v402_v31 = vrot.slane %v399_v35, 4 }
 0x11c   : > { %v404_v24 = vsel %vm388_vm6, %v402_v31, %v403_v26  ;;  %v434_v40 = vpop.permute.xlu0 %433  ;;  %v932_v31 = vrot.slane %v923_v25, %v2785_v7 }
 0x11d   : > { %v406_v29 = vsel %vm405_vm7, %v399_v35, %v404_v24  ;;  %v524_v37 = vpop.permute.xlu1 %523  ;;  %v944_v24 = vld [vmem:[#allocation4 + $0x23] ss:$4 sm:$0x3]  ;;  %v936_v35 = vrot.slane %v923_v25, %v2787_v8  ;;  %v437_v25 = vrot.slane %v434_v40, 4 }
 0x11e   : > { %409 = vst [vmem:[#allocation4 + $0x8] sm:$0xff] %v406_v29  ;;  %v527_v33 = vrot.slane %v524_v37, 4  ;;  %v890_v29 = vrot.slane %v881_v1, %v2785_v7  ;;  %v953_v51 = vrot.slane %v944_v24, %v2785_v7  ;;  %v3071_v1 = vmul.f32 %v932_v31, %v926_v49 }
 0x11f   : > { %v3085_v31 = vmul.f32 %v894_v47, %v3005_v9 }
 0x120   : > { %v529_v10 = vsel %vm388_vm6, %v527_v33, %v528_v23  ;;  %v461_v27 = vpop.permute.xlu0 %460 }
 0x121   : > { %v531_v18 = vsel %vm530_vm8, %v524_v37, %v529_v10  ;;  %v383_v30 = vpop.permute.xlu1 %382  ;;  %v490_v10 = vrot.slane %v488_v42, 4 }
 0x122   : > { %534 = vst [vmem:[#allocation4 + $0x38] sm:$0xff] %v531_v18  ;;  %v386_v26 = vrot.slane %v383_v30, 4 }
 0x124   : > { %v389_v23 = vsel %vm388_vm6, %v386_v26, %v387_v59  ;;  %v486_v33 = vpop.permute.xlu0 %485  ;;  %v3073_v59 = vmul.f32 %v936_v35, %v926_v49  ;;  %v957_v26 = vrot.slane %v944_v24, %v2787_v8 }
 0x125   : > { %v391_v37 = vsel %vm390_vm4, %v383_v30, %v389_v23  ;;  %v489_v28 = vrot.slane %v486_v33, 4  ;;  %v436_v18 = vpop.permute.xlu1 %435  ;;  %v653_v6 = vld [vmem:[#allocation4 + $0x9] ss:$4 sm:$0x3] }
 0x126   : > { %393 = vst [vmem:[#allocation4] sm:$0xff] %v391_v37  ;;  %v438_v60 = vrot.slane %v436_v18, 4  ;;  %v632_v15 = vld [vmem:[#allocation4 + $0x8] ss:$4 sm:$0x3]  ;;  %v662_v21 = vrot.slane %v653_v6, %v2785_v7  ;;  %v666_v19 = vrot.slane %v653_v6, %v2787_v8  ;;  %v3082_v37 = vmul.f32 %v890_v29, %v3005_v9 }
 0x127   : > { %v491_v42 = vsel %vm388_vm6, %v489_v28, %v490_v10  ;;  %v641_v35 = vrot.slane %v632_v15, %v2785_v7  ;;  %v674_v10 = vld [vmem:[#allocation4 + $0xa] ss:$4 sm:$0x3]  ;;  %v645_v29 = vrot.slane %v632_v15, %v2787_v8  ;;  %v3094_v18 = vmul.f32 %v915_v58, %v3013_v63 }
 0x128   : > { %v492_v30 = vsel %vm450_vm3, %v486_v33, %v491_v42  ;;  %v439_v23 = vsel %vm388_vm6, %v437_v25, %v438_v60  ;;  %v3090_v33 = vmul.f32 %v911_v55, %v3013_v63  ;;  %v463_v60 = vrot.slane %v461_v27, 4 }
 0x129   : > { %495 = vst [vmem:[#allocation4 + $0x28] sm:$0xff] %v492_v30  ;;  %v441_v49 = vsel %vm440_vm5, %v434_v40, %v439_v23  ;;  %v459_v24 = vpop.permute.xlu1 %458  ;;  %v1151_v6 = vld [vmem:[#allocation4 + $0x39] ss:$4 sm:$0x3]  ;;  %v3097_v9 = vmul.f32 %v953_v51, %v3018_v36  ;;  %v3104_v55 = vmul.f32 %v957_v26, %v3018_v36  ;;  %v669_v15 = vmul.f32 %v662_v21, %v2941_v4 }
 0x12a   : > { %444 = vst [vmem:[#allocation4 + $0x10] sm:$0xff] %v441_v49  ;;  %v462_v28 = vrot.slane %v459_v24, 4  ;;  %v3101_v25 = vld [vmem:[#allocation4 + $0x3a] ss:$4 sm:$0x3]  ;;  %v670_v58 = vmul.f32 %v666_v19, %v2941_v4  ;;  %v1160_v49 = vrot.slane %v1151_v6, %v2785_v7  ;;  %v648_v40 = vmul.f32 %v641_v35, %v2929_v56 }
 0x12b   : > { %3887 = vst [vmem:[#allocation21_spill] sm:$0xff] %v3097_v9  ;;  %3888 = vst [vmem:[#allocation22_spill] sm:$0xff] %v3104_v55  ;;  %v3107_v42 = vld [vmem:[#allocation4 + $0x3b] ss:$4 sm:$0x3]  ;;  %v683_v36 = vrot.slane %v674_v10, %v2785_v7  ;;  %v1164_v21 = vrot.slane %v1151_v6, %v2787_v8  ;;  %v3121_v4 = vmul.f32 %v645_v29, %v2929_v56 }
 0x12c   : > { %v464_v27 = vsel %vm388_vm6, %v462_v28, %v463_v60  ;;  %v1130_v63 = vld [vmem:[#allocation4 + $0x38] ss:$4 sm:$0x3]  ;;  %v687_v28 = vrot.slane %v674_v10, %v2787_v8  ;;  %v1185_v6 = vrot.slane %v3101_v25, %v2787_v8  ;;  %v3138_v47 = vmul.f32 %v1160_v49, %v3052_v44 }
 0x12d   : > { %v596_v51 = vld [vmem:[#allocation4 + $0x2] ss:$4 sm:$0x3]  ;;  %v3111_v30 = vld [vmem:[#allocation4 + $0x3] ss:$4 sm:$0x3]  ;;  %v466_v23 = vsel %vm465_vm2, %v459_v24, %v464_v27  ;;  %v1139_v35 = vrot.slane %v1130_v63, %v2785_v7  ;;  %v3142_v13 = vmul.f32 %v683_v36, %v3016_v2  ;;  %v3147_v26 = vmul.f32 %v1164_v21, %v3052_v44 }
 0x12e   : > { %3889 = vst [vmem:[#allocation23_spill] sm:$0xff] %v3111_v30  ;;  %469 = vst [vmem:[#allocation4 + $0x18] sm:$0xff] %v466_v23  ;;  %v578_v60 = vld [vmem:[#allocation4 + $0x1] ss:$4 sm:$0x3]  ;;  %v1143_v23 = vrot.slane %v1130_v63, %v2787_v8  ;;  %v605_v56 = vrot.slane %v596_v51, %v2785_v7  ;;  %v609_v10 = vrot.slane %v596_v51, %v2787_v8 }
 0x12f   : > { %v559_v19 = vld [vmem:[#allocation4] ss:$4 sm:$0x3]  ;;  %v587_v24 = vrot.slane %v578_v60, %v2785_v7  ;;  %v591_v27 = vrot.slane %v578_v60, %v2787_v8  ;;  %v3152_v60 = vmul.f32 %v687_v28, %v3016_v2  ;;  %v3157_v36 = vmul.f32 %v1139_v35, %v3048_v5 }
 0x130   : > { %1316 = vst [vmem:[#allocation4] sm:$0xff] %v2886_v53  ;;  %v569_v53 = vrot.slane %v559_v19, %v2785_v7  ;;  %v3144_v52 = vld [vmem:[#allocation4 + $0x29] ss:$4 sm:$0x3]  ;;  %v3160_v45 = vmul.f32 %v1143_v23, %v3048_v5  ;;  %v573_v44 = vrot.slane %v559_v19, %v2787_v8  ;;  %v3164_v21 = vmul.f32 %v605_v56, %v2916_v20 }
 0x131   : > { %v1175_v29 = vpop.permute.xlu0 %1174  ;;  %v736_v63 = vld [vmem:[#allocation4 + $0x11] ss:$4 sm:$0x3]  ;;  %v715_v9 = vld [vmem:[#allocation4 + $0x10] ss:$4 sm:$0x3]  ;;  %v594_v49 = vmul.f32 %v587_v24, %v2904_v14  ;;  %v595_v0 = vmul.f32 %v591_v27, %v2904_v14  ;;  %v994_v14 = vrot.slane %v3144_v52, %v2785_v7 }
 0x132   : > { %v745_v51 = vrot.slane %v736_v63, %v2785_v7  ;;  %v749_v55 = vrot.slane %v736_v63, %v2787_v8  ;;  %3890 = vst [vmem:[#allocation24_spill] sm:$0xff] %v3157_v36  ;;  %3891 = vst [vmem:[#allocation25_spill] sm:$0xff] %v3160_v45  ;;  %v3167_v63 = vmul.f32 %v609_v10, %v2916_v20  ;;  %v3892_v45 = vrot.slane %v3056_v39, 4 }
 0x133   : > { %v576_v27 = vmul.f32 %v569_v53, %v3007_v48  ;;  %v724_v5 = vrot.slane %v715_v9, %v2785_v7  ;;  %v671_v11 = vadd.f32 %v669_v15, %v594_v49  ;;  %v672_v61 = vadd.f32 %v670_v58, %v595_v0 }
 0x134   : > { %v752_v20 = vmul.f32 %v745_v51, %v3025_v50  ;;  %v753_v56 = vmul.f32 %v749_v55, %v3025_v50  ;;  %v728_v53 = vrot.slane %v715_v9, %v2787_v8  ;;  %v577_v30 = vmul.f32 %v573_v44, %v3007_v48 }
 0x135   : > { %v548_v28 = vpop.permute.xlu0 %547  ;;  %v819_v24 = vld [vmem:[#allocation4 + $0x19] ss:$4 sm:$0x3]  ;;  %v798_v2 = vld [vmem:[#allocation4 + $0x18] ss:$4 sm:$0x3]  ;;  %v731_v51 = vmul.f32 %v724_v5, %v2967_v17  ;;  %v650_v15 = vadd.f32 %v648_v40, %v576_v27  ;;  %v998_v39 = vrot.slane %v3144_v52, %v2787_v8  ;;  %v3201_v40 = vmul.f32 %v1185_v6, %v1175_v29 }
 0x136   : > { %v551_v35 = vrot.slane %v548_v28, 4  ;;  %v1196_v23 = vpop.permute.xlu1 %1195  ;;  %v828_v10 = vrot.slane %v819_v24, %v2785_v7  ;;  %v832_v12 = vrot.slane %v819_v24, %v2787_v8  ;;  %v807_v0 = vrot.slane %v798_v2, %v2785_v7 }
 0x137   : > { %v754_v9 = vadd.f32 %v752_v20, %v671_v11  ;;  %v811_v49 = vrot.slane %v798_v2, %v2787_v8  ;;  %v732_v48 = vmul.f32 %v728_v53, %v2967_v17  ;;  %v733_v44 = vadd.f32 %v731_v51, %v650_v15  ;;  %v757_v11 = vld [vmem:[#allocation4 + $0x12] ss:$4 sm:$0x3]  ;;  %v840_v20 = vld [vmem:[#allocation4 + $0x1a] ss:$4 sm:$0x3] }
 0x138   : > { %v553_v36 = vsel %vm388_vm6, %v551_v35, %v3892_v45  ;;  %v835_v19 = vmul.f32 %v828_v10, %v2991_v16  ;;  %v836_v55 = vmul.f32 %v832_v12, %v2991_v16  ;;  %v755_v45 = vadd.f32 %v753_v56, %v672_v61 }
 0x139   : > { %v554_v50 = vsel %vm374_vm1, %v548_v28, %v553_v36  ;;  %v814_v36 = vmul.f32 %v807_v0, %v3034_v62  ;;  %v964_v28 = vld [vmem:[#allocation4 + $0x28] ss:$4 sm:$0x3]  ;;  %v3893_v12 = vrot.slane %v3101_v25, %v2785_v7  ;;  %v3894_v61 = vrot.slane %v3054_v41, 4  ;;  %v3210_v10 = vpop.permute.xlu0 %1236 }
 0x13a   : > { %557 = vst [vmem:[#allocation4 + $0x40] sm:$0xff] %v554_v50  ;;  %v509_v58 = vpop.permute.xlu1 %508  ;;  %v837_v27 = vadd.f32 %v835_v19, %v754_v9  ;;  %v838_v52 = vadd.f32 %v836_v55, %v755_v45  ;;  %v651_v17 = vadd.f32 %v3121_v4, %v577_v30  ;;  %v815_v5 = vmul.f32 %v811_v49, %v3034_v62  ;;  %v3225_v50 = vld [vmem:[#allocation4 + $0x2] ss:$4 sm:$0x3] }
 0x13b   : > { %v512_v24 = vrot.slane %v509_v58, 4  ;;  %v3199_v16 = vmul.f32 %v3893_v12, %v1175_v29  ;;  %v816_v35 = vadd.f32 %v814_v36, %v733_v44  ;;  %v1001_v25 = vmul.f32 %v994_v14, %v3042_v43 }
 0x13c   : > { %v973_v6 = vrot.slane %v964_v28, %v2785_v7  ;;  %v977_v29 = vrot.slane %v964_v28, %v2787_v8  ;;  %v3895_v41 = vrot.slane %v3107_v42, %v2785_v7  ;;  %v1002_v62 = vmul.f32 %v998_v39, %v3042_v43 }
 0x13d   : > { %v514_v2 = vsel %vm388_vm6, %v512_v24, %v3894_v61  ;;  %v734_v4 = vadd.f32 %v732_v48, %v651_v17  ;;  %v766_v53 = vrot.slane %v757_v11, %v2785_v7  ;;  %v920_v14 = vadd.f32 %v3090_v33, %v837_v27  ;;  %v1006_v24 = vld [vmem:[#allocation4 + $0x2a] ss:$4 sm:$0x3] }
 0x13e   : > { %v515_v56 = vsel %vm425_vm0, %v509_v58, %v514_v2  ;;  %v3214_v19 = vpop.permute.xlu1 %1215  ;;  %v3219_v30 = vmul.f32 %v3895_v41, %v1196_v23  ;;  %v921_v51 = vadd.f32 %v3094_v18, %v838_v52  ;;  %v770_v55 = vrot.slane %v757_v11, %v2787_v8 }
 0x13f   : > { %518 = vst [vmem:[#allocation4 + $0x30] sm:$0xff] %v515_v56  ;;  %v849_v15 = vrot.slane %v840_v20, %v2785_v7  ;;  %v817_v0 = vadd.f32 %v815_v5, %v734_v4  ;;  %v899_v58 = vadd.f32 %v3082_v37, %v816_v35  ;;  %v773_v9 = vmul.f32 %v766_v53, %v2974_v57 }
 0x140   : > { %v853_v43 = vrot.slane %v840_v20, %v2787_v8  ;;  %v3896_v39 = vrot.slane %v3107_v42, %v2787_v8  ;;  %v980_v33 = vmul.f32 %v973_v6, %v3023_v22  ;;  %v981_v18 = vmul.f32 %v977_v29, %v3023_v22  ;;  %v3249_v22 = vpop.permute.xlu0 %1303 }
 0x141   : > { %v692_v49 = vadd.f32 %v3142_v13, %v3164_v21  ;;  %v1234_v48 = vld [vmem:[#allocation4 + $0x41] ss:$4 sm:$0x3]  ;;  %v1364_v37 = vrot.slane %v3225_v50, %v2785_v7  ;;  %v1368_v44 = vrot.slane %v3225_v50, %v2787_v8  ;;  %v774_v36 = vmul.f32 %v770_v55, %v2974_v57  ;;  %v1213_v11 = vld [vmem:[#allocation4 + $0x40] ss:$4 sm:$0x3] }
 0x142   : > { %v3235_v45 = vmul.f32 %v3896_v39, %v1196_v23  ;;  %v856_v42 = vmul.f32 %v849_v15, %v2999_v38  ;;  %v1003_v28 = vadd.f32 %v1001_v25, %v920_v14  ;;  %v1004_v12 = vadd.f32 %v1002_v62, %v921_v51 }
 0x143   : > { %v3247_v23 = vpop.permute.xlu1 %1257  ;;  %v693_v13 = vadd.f32 %v3152_v60, %v3167_v63  ;;  %v775_v21 = vadd.f32 %v773_v9, %v692_v49  ;;  %v900_v27 = vadd.f32 %v3085_v31, %v817_v0  ;;  %v982_v52 = vadd.f32 %v980_v33, %v899_v58  ;;  %v1255_v49 = vld [vmem:[#allocation4 + $0x42] ss:$4 sm:$0x3] }
 0x144   : > { %v857_v61 = vmul.f32 %v853_v43, %v2999_v38  ;;  %v1015_v57 = vrot.slane %v1006_v24, %v2785_v7  ;;  %v1243_v2 = vrot.slane %v1234_v48, %v2785_v7  ;;  %v1019_v56 = vrot.slane %v1006_v24, %v2787_v8  ;;  %v1358_v9 = vpop.permute.xlu0 %1357 }
 0x145   : > { %v776_v35 = vadd.f32 %v774_v36, %v693_v13  ;;  %v858_v20 = vadd.f32 %v856_v42, %v775_v21  ;;  %v1247_v38 = vrot.slane %v1234_v48, %v2787_v8  ;;  %v1222_v29 = vrot.slane %v1213_v11, %v2785_v7 }
 0x146   : > { %v1068_v17 = vld [vmem:[#allocation4 + $0x31] ss:$4 sm:$0x3]  ;;  %v1047_v5 = vld [vmem:[#allocation4 + $0x30] ss:$4 sm:$0x3]  ;;  %v1250_v55 = vmul.f32 %v1243_v2, %v3210_v10  ;;  %v983_v15 = vadd.f32 %v981_v18, %v900_v27  ;;  %v1226_v58 = vrot.slane %v1213_v11, %v2787_v8  ;;  %v1022_v39 = vmul.f32 %v1015_v57, %v3032_v34 }
 0x147   : > { %v1077_v25 = vrot.slane %v1068_v17, %v2785_v7  ;;  %v1081_v60 = vrot.slane %v1068_v17, %v2787_v8  ;;  %v1056_v31 = vrot.slane %v1047_v5, %v2785_v7  ;;  %v1060_v63 = vrot.slane %v1047_v5, %v2787_v8  ;;  %v1089_v6 = vld [vmem:[#allocation4 + $0x32] ss:$4 sm:$0x3]  ;;  %v861_v2 = vld [vmem:[#allocation4 + $0x1b] ss:$4 sm:$0x3] }
 0x148   : > { %v859_v41 = vadd.f32 %v857_v61, %v776_v35  ;;  %v1098_v62 = vrot.slane %v1089_v6, %v2785_v7  ;;  %v3265_v4 = vpop.permute.xlu1 %1278  ;;  %v941_v50 = vadd.f32 %v3071_v1, %v858_v20  ;;  %v1102_v33 = vrot.slane %v1089_v6, %v2787_v8  ;;  %v3899_v20 = vld [vmem:[#allocation24_spill] sm:$0xff]  ;;  %v3902_v6 = vld [vmem:[#allocation14_spill] sm:$0xff] }
 0x149   : > { %v1084_v53 = vmul.f32 %v1077_v25, %v3040_v54  ;;  %v1085_v14 = vmul.f32 %v1081_v60, %v3040_v54  ;;  %v1063_v51 = vmul.f32 %v1056_v31, %v3046_v32  ;;  %v1064_v0 = vmul.f32 %v1060_v63, %v3046_v32  ;;  %v1027_v31 = vld [vmem:[#allocation4 + $0x2b] ss:$4 sm:$0x3] }
 0x14a   : > { %v942_v43 = vadd.f32 %v3073_v59, %v859_v41  ;;  %v1105_v54 = vmul.f32 %v1098_v62, %v3044_v46  ;;  %v1251_v1 = vmul.f32 %v1247_v38, %v3210_v10  ;;  %v1229_v18 = vmul.f32 %v1222_v29, %v3214_v19  ;;  %v695_v59 = vld [vmem:[#allocation4 + $0xb] ss:$4 sm:$0x3]  ;;  %v1110_v62 = vld [vmem:[#allocation4 + $0x33] ss:$4 sm:$0x3] }
 0x14b   : > { %v1086_v24 = vadd.f32 %v1084_v53, %v1003_v28  ;;  %v1087_v48 = vadd.f32 %v1085_v14, %v1004_v12  ;;  %v1065_v36 = vadd.f32 %v1063_v51, %v982_v52  ;;  %v3280_v32 = vmul.f32 %v1364_v37, %v1358_v9  ;;  %v778_v28 = vld [vmem:[#allocation4 + $0x13] ss:$4 sm:$0x3]  ;;  %v3903_v51 = vld [vmem:[#allocation16_spill] sm:$0xff] }
 0x14c   : > { %v1023_v42 = vmul.f32 %v1019_v56, %v3032_v34  ;;  %v1024_v13 = vadd.f32 %v1022_v39, %v941_v50  ;;  %v1066_v21 = vadd.f32 %v1064_v0, %v983_v15  ;;  %v1230_v27 = vmul.f32 %v1226_v58, %v3214_v19  ;;  %v3897_v19 = vld [vmem:[#allocation23_spill] sm:$0xff] }
 0x14d   : > { %v3284_v11 = vmul.f32 %v1368_v44, %v1358_v9  ;;  %v1264_v61 = vrot.slane %v1255_v49, %v2785_v7  ;;  %v3287_v12 = vpop.permute.xlu1 %1321  ;;  %v1106_v57 = vmul.f32 %v1102_v33, %v3044_v46  ;;  %v1268_v37 = vrot.slane %v1255_v49, %v2787_v8  ;;  %v3904_v58 = vld [vmem:[#allocation19_spill] sm:$0xff] }
 0x14e   : > { %v1025_v10 = vadd.f32 %v1023_v42, %v942_v43  ;;  %v1107_v52 = vadd.f32 %v1105_v54, %v1024_v13  ;;  %v1169_v34 = vadd.f32 %v3138_v47, %v1086_v24  ;;  %v1170_v17 = vadd.f32 %v3147_v26, %v1087_v48  ;;  %v3901_v26 = vld [vmem:[#allocation25_spill] sm:$0xff] }
 0x14f   : > { %v3898_v44 = vrot.slane %v3897_v19, %v2785_v7  ;;  %v704_v35 = vrot.slane %v695_v59, %v2785_v7  ;;  %v1148_v56 = vadd.f32 %v3899_v20, %v1065_v36  ;;  %v3900_v46 = vrot.slane %v3897_v19, %v2787_v8  ;;  %v1373_v20 = vld [vmem:[#allocation4 + $0x3] ss:$4 sm:$0x3] }
 0x150   : > { %v708_v60 = vrot.slane %v695_v59, %v2787_v8  ;;  %v787_v47 = vrot.slane %v778_v28, %v2785_v7  ;;  %v1149_v63 = vadd.f32 %v3901_v26, %v1066_v21  ;;  %v791_v29 = vrot.slane %v778_v28, %v2787_v8 }
 0x151   : > { %v630_v5 = vmul.f32 %v3898_v44, %v3011_v3  ;;  %v631_v25 = vmul.f32 %v3900_v46, %v3011_v3  ;;  %v711_v38 = vmul.f32 %v704_v35, %v3902_v6  ;;  %v870_v41 = vrot.slane %v861_v2, %v2785_v7  ;;  %v1318_v35 = vld [vmem:[#allocation4] ss:$4 sm:$0x3] }
 0x152   : > { %v1108_v53 = vadd.f32 %v1106_v57, %v1025_v10  ;;  %v712_v14 = vmul.f32 %v708_v60, %v3902_v6  ;;  %v794_v50 = vmul.f32 %v787_v47, %v3903_v51  ;;  %v874_v3 = vrot.slane %v861_v2, %v2787_v8  ;;  %v1340_v39 = vpop.permute.xlu1 %1339  ;;  %v1337_v57 = vld [vmem:[#allocation4 + $0x1] ss:$4 sm:$0x3] }
 0x153   : > { %v713_v15 = vadd.f32 %v711_v38, %v630_v5  ;;  %v795_v0 = vmul.f32 %v791_v29, %v3903_v51  ;;  %v877_v9 = vmul.f32 %v870_v41, %v3904_v58  ;;  %v1036_v43 = vrot.slane %v1027_v31, %v2785_v7 }
 0x154   : > { %v714_v33 = vadd.f32 %v712_v14, %v631_v25  ;;  %v878_v54 = vmul.f32 %v874_v3, %v3904_v58  ;;  %v1040_v49 = vrot.slane %v1027_v31, %v2787_v8  ;;  %v1119_v24 = vrot.slane %v1110_v62, %v2785_v7  ;;  %v3906_v25 = vld [vmem:[#allocation20_spill] sm:$0xff] }
 0x155   : > { %v1190_v48 = vadd.f32 %v3199_v16, %v1107_v52  ;;  %v1271_v36 = vmul.f32 %v1264_v61, %v3247_v23  ;;  %v796_v42 = vadd.f32 %v794_v50, %v713_v15  ;;  %v1123_v13 = vrot.slane %v1110_v62, %v2787_v8  ;;  %v3905_v16 = vld [vmem:[#allocation18_spill] sm:$0xff] }
 0x156   : > { %v1252_v59 = vadd.f32 %v1250_v55, %v1169_v34  ;;  %v1253_v21 = vadd.f32 %v1251_v1, %v1170_v17  ;;  %v1272_v28 = vmul.f32 %v1268_v37, %v3247_v23  ;;  %v797_v10 = vadd.f32 %v795_v0, %v714_v33  ;;  %v3907_v55 = vld [vmem:[#allocation21_spill] sm:$0xff]  ;;  %v1276_v17 = vld [vmem:[#allocation4 + $0x43] ss:$4 sm:$0x3] }
 0x157   : > { %v1231_v2 = vadd.f32 %v1229_v18, %v1148_v56  ;;  %v1232_v19 = vadd.f32 %v1230_v27, %v1149_v63  ;;  %v1191_v44 = vadd.f32 %v3201_v40, %v1108_v53  ;;  %v879_v5 = vadd.f32 %v877_v9, %v796_v42  ;;  %v1376_v27 = vpop.permute.xlu1 %1375  ;;  %v3908_v40 = vld [vmem:[#allocation22_spill] sm:$0xff] }
 0x158   : > { %v880_v46 = vadd.f32 %v878_v54, %v797_v10  ;;  %v1043_v52 = vmul.f32 %v1036_v43, %v3905_v16  ;;  %v1044_v61 = vmul.f32 %v1040_v49, %v3905_v16  ;;  %v1126_v60 = vmul.f32 %v1119_v24, %v3906_v25 }
 0x159   : > { %v962_v1 = vadd.f32 %v3907_v55, %v879_v5  ;;  %v1127_v23 = vmul.f32 %v1123_v13, %v3906_v25  ;;  %v1346_v37 = vrot.slane %v1337_v57, %v2785_v7  ;;  %v1350_v18 = vrot.slane %v1337_v57, %v2787_v8 }
 0x15a   : > { %v963_v34 = vadd.f32 %v3908_v40, %v880_v46  ;;  %v1328_v56 = vrot.slane %v1318_v35, %v2785_v7  ;;  %v1332_v47 = vrot.slane %v1318_v35, %v2787_v8  ;;  %v1382_v31 = vrot.slane %v1373_v20, %v2785_v7 }
 0x15b   : > { %v1045_v26 = vadd.f32 %v1043_v52, %v962_v1  ;;  %v1353_v63 = vmul.f32 %v1346_v37, %v1340_v39  ;;  %v1354_v6 = vmul.f32 %v1350_v18, %v1340_v39  ;;  %v1386_v38 = vrot.slane %v1373_v20, %v2787_v8  ;;  %v3910_v1 = vld [vmem:[#allocation6_spill] sm:$0xff]  ;;  %v3911_v37 = vld [vmem:[#allocation8_spill] sm:$0xff] }
 0x15c   : > { %v1273_v29 = vadd.f32 %v1271_v36, %v1190_v48  ;;  %v1046_v41 = vadd.f32 %v1044_v61, %v963_v34  ;;  %v1335_v62 = vmul.f32 %v1328_v56, %v3287_v12  ;;  %v1389_v53 = vmul.f32 %v1382_v31, %v1376_v27  ;;  %v1399_v10 = vpop.permute.xlu1 %1398  ;;  %v3913_v34 = vld [vmem:[#allocation12_spill] sm:$0xff]  ;;  %v3914_v56 = vld [vmem:[#allocation9_spill] sm:$0xff]  ;;  %v3915_v31 = vld [vmem:[#allocation11_spill] sm:$0xff] }
 0x15d   : > { %v1128_v14 = vadd.f32 %v1126_v60, %v1045_v26  ;;  %v1285_v51 = vrot.slane %v1276_v17, %v2785_v7  ;;  %v1336_v50 = vmul.f32 %v1332_v47, %v3287_v12  ;;  %v1390_v3 = vmul.f32 %v1386_v38, %v1376_v27  ;;  %v3909_v60 = vld [vmem:[#allocation10_spill] sm:$0xff]  ;;  %v3912_v27 = vld [vmem:[#allocation7_spill] sm:$0xff] }
 0x15e   : > { %v1129_v15 = vadd.f32 %v1127_v23, %v1046_v41  ;;  %v1289_v0 = vrot.slane %v1276_v17, %v2787_v8  ;;  %v1391_v58 = vadd.f32 %v1353_v63, %v1335_v62  ;;  %v1393_v9 = vadd.f32 %v1389_v53, %v3280_v32  ;;  %v3916_v63 = vld [vmem:[#allocation13_spill] sm:$0xff]  ;;  %v3917_v38 = vld [vmem:[#allocation15_spill] sm:$0xff]  ;;  %v3397_v53 = vld [vmem:[%s3806_s5] sm:$0xf] }
 0x15f   : > { %v1211_v43 = vadd.f32 %v3219_v30, %v1128_v14  ;;  %v1292_v39 = vmul.f32 %v1285_v51, %v3265_v4  ;;  %v1392_v33 = vadd.f32 %v1354_v6, %v1336_v50  ;;  %v1394_v54 = vadd.f32 %v1390_v3, %v3284_v11  ;;  %v2532_v14 = vld [vmem:[%s3801_s0 + $0x2] ss:$4 sm:$0x3] }
 0x160   : > { %v1274_v49 = vadd.f32 %v1272_v28, %v1191_v44  ;;  %v1212_v24 = vadd.f32 %v3235_v45, %v1129_v15  ;;  %v1293_v12 = vmul.f32 %v1289_v0, %v3265_v4  ;;  %v1395_v48 = vadd.f32 %v1393_v9, %v1391_v58 }
 0x161   : > { %v1296_v36 = vadd.f32 %v1252_v59, %v1231_v2  ;;  %v1294_v42 = vadd.f32 %v1292_v39, %v1211_v43  ;;  %v1396_v13 = vadd.f32 %v1394_v54, %v1392_v33  ;;  %v1297_v57 = vadd.f32 %v1253_v21, %v1232_v19 }
 0x162   : > { %v1295_v32 = vadd.f32 %v1293_v12, %v1212_v24  ;;  %v1401_v35 = vadd.f32 %v1399_v10, %v1395_v48  ;;  %v3918_v51 = vmov 4   ;;  %v3919_v50 = vmov 2  }
 0x163   : > { %v1298_v5 = vadd.f32 %v1294_v42, %v1273_v29  ;;  %v1402_v20 = vadd.f32 %v1399_v10, %v1396_v13  ;;  %v2398_v3 = vrot.slane %v2532_v14, %v2785_v7  ;;  %v2402_v15 = vrot.slane %v2532_v14, %v2787_v8  ;;  %v3929_v13 = vld [vmem:[#allocation5_spill] sm:$0xff] }
 0x164   : > { %v1299_v30 = vadd.f32 %v1295_v32, %v1274_v49  ;;  %v3920_v0 = vmov 7   ;;  %v3921_v58 = vmov 3   ;;  %v3922_v43 = vmov 5   ;;  %v3930_v10 = vld [vmem:[#allocation17_spill] sm:$0xff] }
 0x165   : > { %v1300_v46 = vadd.f32 %v1298_v5, %v1296_v36  ;;  %v1405_v44 = vcombine.low %v1401_v35, %v1402_v20  ;;  %v2403_v9 = vcombine.low %v2398_v3, %v2402_v15  ;;  %v3923_v39 = vmov 11  }
 0x166   : > { %v1301_v11 = vadd.f32 %v1299_v30, %v1297_v57  ;;  %v3924_v33 = vmov 6   ;;  %v3925_v54 = vmov 14   ;;  %v3926_v24 = vmov 8  }
 0x167   : > { %v1306_v28 = vadd.f32 %v3249_v22, %v1300_v46  ;;  %v3927_v48 = vmov 17   ;;  %v3928_v36 = vmov 9   ;;  %v2322_v57 = vmul.f32 %v3930_v10, %v3929_v13 }
 0x168   : > { %v1307_v45 = vadd.f32 %v3249_v22, %v1301_v11  ;;  %v3931_v32 = vmov 10   ;;  %v3932_v5 = vmov 12   ;;  %v3933_v30 = vmov 13   ;;  %v3451_v11 = vpop.permute.xlu0 %2312 }
 0x169   : > { %v3934_v35 = vmov 15   ;;  %v3935_v20 = vmov 16  }
 0x16a   : > { %v1310_v4 = vcombine.low %v1306_v28, %v1307_v45  ;;  %v2537_v59 = vcombine.low %v1307_v45, %v1307_v45  ;;  %v3936_v45 = vmov 18  }
 0x16c   : > { %v1414_v21 = vmax.f32 %v1310_v4, 0.0  ;;  %2436 = vst [vmem:[%s3351_s27 + $0x8] sm:$0xf] %v2537_v59  ;;  %2435 = vst [vmem:[%s3351_s27] sm:$0xf] %v1310_v4  ;;  %v3355_v2 = vadd.f32 %v1405_v44, %v1310_v4  ;;  %v1505_v44 = vpop.permute.xlu0 %1504  ;;  %v1489_v4 = vpop.permute.xlu1 %1488 }
 0x16e   : > { %1415 = vst [vmem:[#allocation3 + $0x4] sm:$0xff] %v1414_v21  ;;  %1479 = vst [vmem:[#allocation4 + $0x20] sm:$0xff] %v1414_v21  ;;  %v2439_v22 = vcombine.low %v3355_v2, %v3355_v2  ;;  %v1482_v26 = vmul.f32 %v1414_v21, %v3915_v31  ;;  %v1528_v6 = vmul.f32 %v1414_v21, %v3916_v63 }
 0x16f   : > { %2442 = vst [vmem:[%s3351_s27 + $0x8] sm:$0xf0] %v3355_v2  ;;  %v1498_v29 = vmul.f32 %v1414_v21, %v3917_v38  ;;  %v2306_v41 = vmul.f32 %v3355_v2, %v3915_v31  ;;  %v2350_v62 = vmul.f32 %v3355_v2, %v3916_v63  ;;  %v2321_v42 = vmul.f32 %v3355_v2, %v3917_v38 }
 0x170   : > { %2441 = vst [vmem:[%s3351_s27] sm:$0xf0] %v2439_v22  ;;  %v1519_v59 = vpop.permute.xlu0 %1518 }
 0x175   : > { %v1433_v19 = vld [vmem:[#allocation3 + $0x8] sm:$0xf]  ;;  %v1432_v16 = vld [vmem:[#allocation3] sm:$0xff] }
 0x176   : > { %v1417_v52 = vld [vmem:[#allocation3 + $0x8] sm:$0xf]  ;;  %1438 = vrot.lane.b32.xlu1 %v1433_v19, %s2726_s18  ;;  %1436 = vrot.lane.b32.xlu0 %v1432_v16, %s2726_s18  ;;  %v1418_v55 = vmul.f32 %v1432_v16, %v3909_v60  ;;  %v1448_v18 = vmul.f32 %v1432_v16, %v3911_v37  ;;  %v1464_v17 = vmul.f32 %v1432_v16, %v3913_v34 }
 0x177   : > { %v1447_v61 = vld [vmem:[#allocation3 + $0x8] sm:$0xf]  ;;  %v1419_v23 = vmul.f32 %v1417_v52, %v3910_v1 }
 0x178   : > { %v1463_v25 = vld [vmem:[#allocation3 + $0x8] sm:$0xf]  ;;  %v1449_v40 = vmul.f32 %v1447_v61, %v3912_v27 }
 0x179   : > { %2271 = vst [vmem:[#allocation3 + $0x4] sm:$0xff] %v3355_v2  ;;  %v1465_v47 = vmul.f32 %v1463_v25, %v3914_v56 }
 0x17a   : > { %1516 = vrot.lane.b32.xlu1 %v1414_v21, %s2697_s14  ;;  %1422 = vrot.lane.b32.xlu0 %v1418_v55, %s2698_s15  ;;  %v3457_v21 = vpop.permute.xlu1 %2341 }
 0x17e   : > { %1424 = vrot.lane.b32.xlu1 %v1419_v23, %s2698_s15  ;;  %1452 = vrot.lane.b32.xlu0 %v1448_v18, %s2695_s12  ;;  %v3459_v22 = vpop.permute.xlu1 %2356 }
 0x180   : > { %v3422_v49 = vld [vmem:[#allocation3] sm:$0xff]  ;;  %v3448_v46 = vld [vmem:[#allocation3 + $0x8] sm:$0xf] }
 0x181   : > { %v2278_v12 = vmul.f32 %v3422_v49, %v3913_v34  ;;  %v2279_v28 = vmul.f32 %v3448_v46, %v3914_v56 }
 0x182   : > { %1454 = vrot.lane.b32.xlu1 %v1449_v40, %s2695_s12  ;;  %1468 = vrot.lane.b32.xlu0 %v1464_v17, %s2696_s13  ;;  %v1521_v40 = vrot.slane %v1519_v59, 4 }
 0x186   : > { %1470 = vrot.lane.b32.xlu1 %v1465_v47, %s2696_s13  ;;  %1486 = vrot.lane.b32.xlu0 %v1482_v26, %s2693_s10 }
 0x18a   : > { %1532 = vrot.lane.b32.xlu1 %v1528_v6, %s2692_s9  ;;  %1502 = vrot.lane.b32.xlu0 %v1498_v29, %s2694_s11 }
 0x18e   : > { %2310 = vrot.lane.b32.xlu0 %v2306_v41, %s2697_s14  ;;  %2296 = vrot.lane.b32.xlu1 %v3355_v2, %s2697_s14 }
 0x192   : > { %2354 = vrot.lane.b32.xlu0 %v2350_v62, %s2732_s23  ;;  %2339 = vrot.lane.b32.xlu1 %v3355_v2, %s2732_s23  ;;  %v1535_v2 = vpop.permute.xlu0 %1534 }
 0x196   : > { %1564 = vperm.xlu0 %2641, %v3397_v53   ;;  %1546 = vperm.xlu1 %2640, %v3397_v53  }
 0x19a   : > { %2644 = vset.pattern.permute.xlu0 %v3918_v51  ;;  %2642 = vset.pattern.permute.xlu1 %v3919_v50 }
 0x19b   : > { %1618 = vperm.xlu0 %2644, %v3397_v53   ;;  %1582 = vperm.xlu1 %2642, %v3397_v53  }
 0x19f   : > { %2647 = vset.pattern.permute.xlu0 %v3920_v0  ;;  %2643 = vset.pattern.permute.xlu1 %v3921_v58  ;;  %v1491_v0 = vrot.slane %v1489_v4, 4 }
 0x1a0   : > { %1678 = vperm.xlu0 %2647, %v3397_v53   ;;  %1600 = vperm.xlu1 %2643, %v3397_v53  }
 0x1a4   : > { %2404 = vrot.lane.b32.xlu0 %v2403_v9, %s2692_s9  ;;  %2645 = vset.pattern.permute.xlu1 %v3922_v43 }
 0x1a5   : > { %1638 = vperm.xlu1 %2645, %v3397_v53   ;;  %2651 = vset.pattern.permute.xlu0 %v3923_v39 }
 0x1a8   : > { %1758 = vperm.xlu0 %2651, %v3397_v53  }
 0x1a9   : > { %2646 = vset.pattern.permute.xlu1 %v3924_v33 }
 0x1aa   : > { %1658 = vperm.xlu1 %2646, %v3397_v53  }
 0x1ac   : > { %2654 = vset.pattern.permute.xlu0 %v3925_v54 }
 0x1ad   : > { %1818 = vperm.xlu0 %2654, %v3397_v53  }
 0x1ae   : > { %2648 = vset.pattern.permute.xlu1 %v3926_v24 }
 0x1af   : > { %1698 = vperm.xlu1 %2648, %v3397_v53  }
 0x1b1   : > { %2282 = vrot.lane.b32.xlu0 %v2278_v12, %s2697_s14 }
 0x1b2   : > { %2657 = vset.pattern.permute.xlu0 %v3927_v48 }
 0x1b3   : > { %2649 = vset.pattern.permute.xlu1 %v3928_v36  ;;  %v1507_v36 = vrot.slane %v1505_v44, 4 }
 0x1b4   : > { %1718 = vperm.xlu1 %2649, %v3397_v53  }
 0x1b5   : > { %2325 = vrot.lane.b32.xlu0 %v2321_v42, %s2732_s23  ;;  %v1537_v42 = vrot.slane %v1535_v2, 4 }
 0x1b8   : > { %2327 = vrot.lane.b32.xlu1 %v2322_v57, %s2732_s23 }
 0x1b9   : > { %2650 = vset.pattern.permute.xlu1 %v3931_v32 }
 0x1bc   : > { %1738 = vperm.xlu1 %2650, %v3397_v53  }
 0x1c0   : > { %2652 = vset.pattern.permute.xlu1 %v3932_v5 }
 0x1c1   : > { %1778 = vperm.xlu1 %2652, %v3397_v53  }
 0x1c5   : > { %2653 = vset.pattern.permute.xlu1 %v3933_v30 }
 0x1c6   : > { %1798 = vperm.xlu1 %2653, %v3397_v53  }
 0x1ca   : > { %2655 = vset.pattern.permute.xlu1 %v3934_v35 }
 0x1cb   : > { %1838 = vperm.xlu1 %2655, %v3397_v53  }
 0x1cf   : > { %2656 = vset.pattern.permute.xlu1 %v3935_v20 }
 0x1d0   : > { %1858 = vperm.xlu1 %2656, %v3397_v53  }
 0x1d4   : > { %2284 = vrot.lane.b32.xlu1 %v2279_v28, %s2697_s14 }
 0x1d5   : > { %2658 = vset.pattern.permute.xlu1 %v3936_v45 }
 0x1e8   : > { %v1437_v19 = vpop.permute.xlu0 %1436  ;;  %v1439_v16 = vpop.permute.xlu1 %1438 }
 0x1e9   : > { %v1440_v52 = vrot.slane %v1437_v19, 4  ;;  %v1441_v61 = vrot.slane %v1439_v16, 4 }
 0x1eb   : > { %v1442_v25 = vsel %vm388_vm6, %v1440_v52, %v1441_v61 }
 0x1ec   : > { %v1443_v55 = vsel %vm405_vm7, %v1437_v19, %v1442_v25  ;;  %v1423_v23 = vpop.permute.xlu0 %1422  ;;  %v1517_v18 = vpop.permute.xlu1 %1516 }
 0x1ed   : > { %1445 = vst [vmem:[#allocation4 + $0x8] sm:$0xff] %v1443_v55  ;;  %v1520_v34 = vrot.slane %v1517_v18, 4  ;;  %v1426_v26 = vrot.slane %v1423_v23, 4 }
 0x1ef   : > { %v1522_v17 = vsel %vm388_vm6, %v1520_v34, %v1521_v40 }
 0x1f0   : > { %v1523_v56 = vsel %vm530_vm8, %v1517_v18, %v1522_v17  ;;  %v1453_v47 = vpop.permute.xlu0 %1452  ;;  %v1425_v31 = vpop.permute.xlu1 %1424  ;;  %v2276_v18 = vmul.f32 %v3422_v49, %v3911_v37  ;;  %v2277_v17 = vmul.f32 %v3448_v46, %v3912_v27 }
 0x1f1   : > { %1525 = vst [vmem:[#allocation4 + $0x38] sm:$0xff] %v1523_v56  ;;  %v1427_v63 = vrot.slane %v1425_v31, 4  ;;  %v1456_v62 = vrot.slane %v1453_v47, 4 }
 0x1f3   : > { %v1428_v6 = vsel %vm388_vm6, %v1426_v26, %v1427_v63 }
 0x1f4   : > { %v1429_v38 = vsel %vm390_vm4, %v1423_v23, %v1428_v6  ;;  %v1469_v29 = vpop.permute.xlu0 %1468  ;;  %v1455_v41 = vpop.permute.xlu1 %1454  ;;  %v1616_v27 = vld [vmem:[#allocation4 + $0x8] ss:$4 sm:$0x3] }
 0x1f5   : > { %1431 = vst [vmem:[#allocation4] sm:$0xff] %v1429_v38  ;;  %v1457_v14 = vrot.slane %v1455_v41, 4  ;;  %v1472_v58 = vrot.slane %v1469_v29, 4  ;;  %v1629_v41 = vrot.slane %v1616_v27, %v2787_v8 }
 0x1f7   : > { %v1458_v51 = vsel %vm388_vm6, %v1456_v62, %v1457_v14  ;;  %v3937_v14 = vmov 20  }
 0x1f8   : > { %v1459_v50 = vsel %vm440_vm5, %v1453_v47, %v1458_v51  ;;  %v1487_v3 = vpop.permute.xlu0 %1486  ;;  %v1471_v15 = vpop.permute.xlu1 %1470 }
 0x1f9   : > { %1461 = vst [vmem:[#allocation4 + $0x10] sm:$0xff] %v1459_v50  ;;  %v1490_v9 = vrot.slane %v1487_v3, 4  ;;  %v1473_v43 = vrot.slane %v1471_v15, 4 }
 0x1fb   : > { %v1492_v39 = vsel %vm388_vm6, %v1490_v9, %v1491_v0  ;;  %v1474_v33 = vsel %vm388_vm6, %v1472_v58, %v1473_v43  ;;  %v3938_v58 = vmov 19   ;;  %v1676_v9 = vld [vmem:[#allocation4 + $0xb] ss:$4 sm:$0x3] }
 0x1fc   : > { %v1493_v54 = vsel %vm450_vm3, %v1487_v3, %v1492_v39  ;;  %v1475_v24 = vsel %vm465_vm2, %v1469_v29, %v1474_v33  ;;  %v1503_v12 = vpop.permute.xlu0 %1502  ;;  %v1533_v48 = vpop.permute.xlu1 %1532  ;;  %v1543_v6 = vld [vmem:[#allocation4] ss:$4 sm:$0x3]  ;;  %v1625_v29 = vrot.slane %v1616_v27, %v2785_v7  ;;  %v1598_v43 = vld [vmem:[#allocation4 + $0x3] ss:$4 sm:$0x3] }
 0x1fd   : > { %1495 = vst [vmem:[#allocation4 + $0x28] sm:$0xff] %v1493_v54  ;;  %1477 = vst [vmem:[#allocation4 + $0x18] sm:$0xff] %v1475_v24  ;;  %v1506_v13 = vrot.slane %v1503_v12, 4  ;;  %v1536_v10 = vrot.slane %v1533_v48, 4  ;;  %v1557_v38 = vrot.slane %v1543_v6, %v2787_v8  ;;  %v1685_v54 = vrot.slane %v1676_v9, %v2785_v7 }
 0x1fe   : > { %v1689_v24 = vrot.slane %v1676_v9, %v2787_v8 }
 0x1ff   : > { %v1508_v57 = vsel %vm388_vm6, %v1506_v13, %v1507_v36  ;;  %v1538_v32 = vsel %vm388_vm6, %v1536_v10, %v1537_v42  ;;  %v1611_v42 = vrot.slane %v1598_v43, %v2787_v8 }
 0x200   : > { %v1509_v5 = vsel %vm425_vm0, %v1503_v12, %v1508_v57  ;;  %v1539_v30 = vsel %vm374_vm1, %v1533_v48, %v1538_v32  ;;  %v2311_v35 = vpop.permute.xlu0 %2310  ;;  %v2297_v20 = vpop.permute.xlu1 %2296  ;;  %v1607_v12 = vrot.slane %v1598_v43, %v2785_v7  ;;  %v1562_v48 = vld [vmem:[#allocation4 + $0x1] ss:$4 sm:$0x3]  ;;  %v3939_v32 = vmov 23  }
 0x201   : > { %1511 = vst [vmem:[#allocation4 + $0x30] sm:$0xff] %v1509_v5  ;;  %1541 = vst [vmem:[#allocation4 + $0x40] sm:$0xff] %v1539_v30  ;;  %v2298_v28 = vrot.slane %v2297_v20, 4  ;;  %v2314_v45 = vrot.slane %v2311_v35, 4  ;;  %v3940_v5 = vmov 21  }
 0x203   : > { %v2299_v44 = vsel %vm530_vm8, %v2298_v28, %v2297_v20  ;;  %v2303_v52 = vadd.f32 %v2298_v28, %v3448_v46  ;;  %v2315_v61 = vsel %vm530_vm8, %v2314_v45, %v2311_v35  ;;  %v2316_v25 = vsel %vm530_vm8, %v2314_v45, %v3451_v11  ;;  %v1636_v35 = vld [vmem:[#allocation4 + $0x9] ss:$4 sm:$0x3] }
 0x204   : > { %v2355_v4 = vpop.permute.xlu0 %2354  ;;  %v2340_v59 = vpop.permute.xlu1 %2339  ;;  %v2302_v16 = vadd.f32 %v2299_v44, %v3422_v49  ;;  %v2319_v31 = vadd.f32 %v2315_v61, %v2276_v18  ;;  %v2320_v11 = vadd.f32 %v2316_v25, %v2277_v17  ;;  %v1571_v28 = vrot.slane %v1562_v48, %v2785_v7  ;;  %v1580_v61 = vld [vmem:[#allocation4 + $0x2] ss:$4 sm:$0x3]  ;;  %v1656_v17 = vld [vmem:[#allocation4 + $0xa] ss:$4 sm:$0x3] }
 0x205   : > { %v2358_v2 = vrot.slane %v2355_v4, 4  ;;  %v2343_v19 = vrot.slane %v2340_v59, 4  ;;  %v1575_v44 = vrot.slane %v1562_v48, %v2787_v8  ;;  %v3942_v18 = vmov 22  }
 0x206   : > { %v1593_v27 = vrot.slane %v1580_v61, %v2787_v8  ;;  %v3945_v48 = vmov 32  }
 0x207   : > { %v2344_v55 = vsel %vm2330_vm9, %v2343_v19, %v2340_v59  ;;  %v2345_v23 = vsel %vm2330_vm9, %v2343_v19, %v3457_v21  ;;  %v2359_v56 = vsel %vm2330_vm9, %v2358_v2, %v2355_v4  ;;  %v2360_v47 = vsel %vm2330_vm9, %v2358_v2, %v3459_v22 }
 0x208   : > { %v2348_v40 = vadd.f32 %v2344_v55, %v2302_v16  ;;  %v2349_v34 = vadd.f32 %v2345_v23, %v2303_v52  ;;  %v2363_v21 = vadd.f32 %v2359_v56, %v2319_v31  ;;  %v2364_v26 = vadd.f32 %v2360_v47, %v2320_v11  ;;  %v1756_v16 = vld [vmem:[#allocation4 + $0x13] ss:$4 sm:$0x3] }
 0x209   : > { %v1553_v22 = vrot.slane %v1543_v6, %v2785_v7  ;;  %v1645_v2 = vrot.slane %v1636_v35, %v2785_v7  ;;  %v1649_v19 = vrot.slane %v1636_v35, %v2787_v8  ;;  %v3941_v23 = vmov 26  }
 0x20a   : > { %2369 = vrot.lane.b32.xlu0 %v2349_v34, %s2693_s10  ;;  %2367 = vrot.lane.b32.xlu1 %v2348_v40, %s2693_s10  ;;  %v1765_v56 = vrot.slane %v1756_v16, %v2785_v7  ;;  %v1769_v47 = vrot.slane %v1756_v16, %v2787_v8  ;;  %v1589_v31 = vrot.slane %v1580_v61, %v2785_v7  ;;  %v3947_v35 = vmov 35  }
 0x20b   : > { %v1665_v6 = vrot.slane %v1656_v17, %v2785_v7  ;;  %v3950_v16 = vmov 36  }
 0x20e   : > { %2383 = vrot.lane.b32.xlu0 %v2364_v26, %s2733_s7  ;;  %2381 = vrot.lane.b32.xlu1 %v2363_v21, %s2733_s7 }
 0x211   : > { %v1565_v37 = vpop.permute.xlu0 %1564  ;;  %v1547_v63 = vpop.permute.xlu1 %1546 }
 0x212   : > { %1878 = vperm.xlu0 %2657, %v3397_v53   ;;  %1898 = vperm.xlu1 %2658, %v3397_v53   ;;  %v1560_v50 = vmul.f32 %v1553_v22, %v1547_v63  ;;  %v1561_v3 = vmul.f32 %v1557_v38, %v1547_v63  ;;  %v1578_v52 = vmul.f32 %v1571_v28, %v1565_v37 }
 0x213   : > { %v1579_v55 = vmul.f32 %v1575_v44, %v1565_v37  ;;  %v1669_v38 = vrot.slane %v1656_v17, %v2787_v8  ;;  %v1776_v17 = vld [vmem:[#allocation4 + $0x18] ss:$4 sm:$0x3] }
 0x216   : > { %v1619_v62 = vpop.permute.xlu0 %1618  ;;  %2660 = vset.pattern.permute.xlu0 %v3937_v14  ;;  %v3502_v51 = vpop.permute.xlu1 %1582  ;;  %2659 = vset.pattern.permute.xlu1 %v3938_v58  ;;  %v3943_v14 = vmov 29  }
 0x217   : > { %v1632_v15 = vmul.f32 %v1625_v29, %v1619_v62  ;;  %v1633_v0 = vmul.f32 %v1629_v41, %v1619_v62  ;;  %1938 = vperm.xlu0 %2660, %v3397_v53   ;;  %1918 = vperm.xlu1 %2659, %v3397_v53   ;;  %v1596_v22 = vmul.f32 %v1589_v31, %v3502_v51 }
 0x219   : > { %v3507_v39 = vadd.f32 %v1632_v15, %v1560_v50  ;;  %v3509_v33 = vadd.f32 %v1633_v0, %v1561_v3  ;;  %v3944_v50 = vmov 24   ;;  %v1696_v15 = vld [vmem:[#allocation4 + $0x10] ss:$4 sm:$0x3]  ;;  %v1597_v0 = vmul.f32 %v1593_v27, %v3502_v51 }
 0x21b   : > { %v1679_v36 = vpop.permute.xlu0 %1678  ;;  %v1601_v13 = vpop.permute.xlu1 %1600  ;;  %2663 = vset.pattern.permute.xlu0 %v3939_v32  ;;  %2661 = vset.pattern.permute.xlu1 %v3940_v5 }
 0x21c   : > { %v1692_v10 = vmul.f32 %v1685_v54, %v1679_v36  ;;  %v1693_v57 = vmul.f32 %v1689_v24, %v1679_v36  ;;  %v1614_v30 = vmul.f32 %v1607_v12, %v1601_v13  ;;  %v1615_v20 = vmul.f32 %v1611_v42, %v1601_v13  ;;  %1998 = vperm.xlu0 %2663, %v3397_v53  }
 0x21d   : > { %1958 = vperm.xlu1 %2661, %v3397_v53   ;;  %v1705_v54 = vrot.slane %v1696_v15, %v2785_v7  ;;  %v1709_v24 = vrot.slane %v1696_v15, %v2787_v8  ;;  %v3946_v36 = vmov 25  }
 0x21e   : > { %v1694_v45 = vadd.f32 %v1692_v10, %v1614_v30  ;;  %v1695_v4 = vadd.f32 %v1693_v57, %v1615_v20  ;;  %v1716_v10 = vld [vmem:[#allocation4 + $0x11] ss:$4 sm:$0x3]  ;;  %v3948_v20 = vmov 27  }
 0x21f   : > { %v3521_v59 = vpop.permute.xlu0 %2404  ;;  %v1725_v32 = vrot.slane %v1716_v10, %v2785_v7  ;;  %v1729_v5 = vrot.slane %v1716_v10, %v2787_v8 }
 0x220   : > { %v1639_v25 = vpop.permute.xlu1 %1638  ;;  %2666 = vset.pattern.permute.xlu0 %v3941_v23 }
 0x221   : > { %2662 = vset.pattern.permute.xlu1 %v3942_v18  ;;  %v1652_v40 = vmul.f32 %v1645_v2, %v1639_v25  ;;  %v1653_v34 = vmul.f32 %v1649_v19, %v1639_v25  ;;  %2058 = vperm.xlu0 %2666, %v3397_v53   ;;  %v1816_v2 = vld [vmem:[#allocation4 + $0x1a] ss:$4 sm:$0x3]  ;;  %v3949_v19 = vmov 28  }
 0x222   : > { %1978 = vperm.xlu1 %2662, %v3397_v53   ;;  %v1825_v23 = vrot.slane %v1816_v2, %v2785_v7  ;;  %v1829_v18 = vrot.slane %v1816_v2, %v2787_v8 }
 0x223   : > { %v1654_v11 = vadd.f32 %v1652_v40, %v1578_v52  ;;  %v1655_v21 = vadd.f32 %v1653_v34, %v1579_v55  ;;  %v1759_v26 = vpop.permute.xlu0 %1758 }
 0x224   : > { %v1772_v37 = vmul.f32 %v1765_v56, %v1759_v26  ;;  %v1773_v63 = vmul.f32 %v1769_v47, %v1759_v26  ;;  %v1785_v26 = vrot.slane %v1776_v17, %v2785_v7 }
 0x225   : > { %v1659_v29 = vpop.permute.xlu1 %1658  ;;  %2669 = vset.pattern.permute.xlu0 %v3943_v14 }
 0x226   : > { %v3536_v41 = vadd.f32 %v1772_v37, %v1694_v45  ;;  %v3538_v62 = vadd.f32 %v1773_v63, %v1695_v4  ;;  %2664 = vset.pattern.permute.xlu1 %v3944_v50  ;;  %v1672_v3 = vmul.f32 %v1665_v6, %v1659_v29  ;;  %v1673_v58 = vmul.f32 %v1669_v38, %v1659_v29  ;;  %v1796_v29 = vld [vmem:[#allocation4 + $0x19] ss:$4 sm:$0x3] }
 0x227   : > { %2118 = vperm.xlu0 %2669, %v3397_v53   ;;  %2018 = vperm.xlu1 %2664, %v3397_v53   ;;  %v1789_v37 = vrot.slane %v1776_v17, %v2787_v8  ;;  %v1805_v15 = vrot.slane %v1796_v29, %v2785_v7 }
 0x228   : > { %v1674_v9 = vadd.f32 %v1672_v3, %v1596_v22  ;;  %v1675_v43 = vadd.f32 %v1673_v58, %v1597_v0  ;;  %v1819_v25 = vpop.permute.xlu0 %1818  ;;  %v3952_v3 = vmov 31   ;;  %v1809_v0 = vrot.slane %v1796_v29, %v2787_v8 }
 0x229   : > { %v1832_v56 = vmul.f32 %v1825_v23, %v1819_v25  ;;  %v1833_v47 = vmul.f32 %v1829_v18, %v1819_v25 }
 0x22a   : > { %v1699_v12 = vpop.permute.xlu1 %1698 }
 0x22b   : > { %2672 = vset.pattern.permute.xlu0 %v3945_v48  ;;  %2665 = vset.pattern.permute.xlu1 %v3946_v36  ;;  %v1712_v42 = vmul.f32 %v1705_v54, %v1699_v12  ;;  %v1713_v13 = vmul.f32 %v1709_v24, %v1699_v12  ;;  %v1836_v54 = vld [vmem:[#allocation4 + $0x1b] ss:$4 sm:$0x3]  ;;  %v3953_v48 = vmov 33  }
 0x22c   : > { %2178 = vperm.xlu0 %2672, %v3397_v53   ;;  %2038 = vperm.xlu1 %2665, %v3397_v53   ;;  %v1845_v36 = vrot.slane %v1836_v54, %v2785_v7 }
 0x22d   : > { %v1714_v51 = vadd.f32 %v1712_v42, %v3507_v39  ;;  %v1715_v57 = vadd.f32 %v1713_v13, %v3509_v33  ;;  %v1736_v33 = vld [vmem:[#allocation4 + $0x12] ss:$4 sm:$0x3]  ;;  %v1849_v42 = vrot.slane %v1836_v54, %v2787_v8 }
 0x22e   : > { %v1745_v52 = vrot.slane %v1736_v33, %v2785_v7  ;;  %v1749_v61 = vrot.slane %v1736_v33, %v2787_v8 }
 0x22f   : > { %v1719_v30 = vpop.permute.xlu1 %1718 }
 0x230   : > { %2675 = vset.pattern.permute.xlu0 %v3947_v35  ;;  %2667 = vset.pattern.permute.xlu1 %v3948_v20  ;;  %v1732_v28 = vmul.f32 %v1725_v32, %v1719_v30  ;;  %v1733_v45 = vmul.f32 %v1729_v5, %v1719_v30  ;;  %v3954_v30 = vmov 34  }
 0x231   : > { %2238 = vperm.xlu0 %2675, %v3397_v53   ;;  %2078 = vperm.xlu1 %2667, %v3397_v53  }
 0x232   : > { %v1734_v44 = vadd.f32 %v1732_v28, %v1654_v11  ;;  %v1735_v4 = vadd.f32 %v1733_v45, %v1655_v21  ;;  %v3951_v21 = vmov 30  }
 0x233   : > { %v3559_v39 = vpop.permute.xlu1 %2327 }
 0x235   : > { %2668 = vset.pattern.permute.xlu1 %v3949_v19  ;;  %2677 = vset.pattern.permute.xlu0 %v3950_v16 }
 0x236   : > { %2098 = vperm.xlu1 %2668, %v3397_v53  }
 0x237   : > { %v1739_v55 = vpop.permute.xlu1 %1738 }
 0x238   : > { %v1752_v40 = vmul.f32 %v1745_v52, %v1739_v55  ;;  %v1753_v34 = vmul.f32 %v1749_v61, %v1739_v55  ;;  %v2274_v55 = vmul.f32 %v3422_v49, %v3909_v60 }
 0x23a   : > { %v1754_v31 = vadd.f32 %v1752_v40, %v1674_v9  ;;  %v1755_v11 = vadd.f32 %v1753_v34, %v1675_v43  ;;  %2670 = vset.pattern.permute.xlu1 %v3951_v21 }
 0x23b   : > { %2138 = vperm.xlu1 %2670, %v3397_v53  }
 0x23c   : > { %v1779_v63 = vpop.permute.xlu1 %1778  ;;  %v3572_v6 = vadd.f32 %v1832_v56, %v1754_v31  ;;  %v3574_v27 = vadd.f32 %v1833_v47, %v1755_v11 }
 0x23d   : > { %v1792_v22 = vmul.f32 %v1785_v26, %v1779_v63  ;;  %v1793_v38 = vmul.f32 %v1789_v37, %v1779_v63  ;;  %v2406_v63 = vrot.slane %v3521_v59, 4 }
 0x23f   : > { %v1794_v14 = vadd.f32 %v1792_v22, %v1714_v51  ;;  %v1795_v50 = vadd.f32 %v1793_v38, %v1715_v57  ;;  %2671 = vset.pattern.permute.xlu1 %v3952_v3  ;;  %v1856_v57 = vld [vmem:[#allocation4 + $0x20] ss:$4 sm:$0x3]  ;;  %v2407_v3 = vsel %vm374_vm1, %v2406_v63, %v3521_v59 }
 0x240   : > { %2158 = vperm.xlu1 %2671, %v3397_v53   ;;  %v1865_v35 = vrot.slane %v1856_v57, %v2785_v7  ;;  %v1869_v20 = vrot.slane %v1856_v57, %v2787_v8  ;;  %v3634_v57 = vld [vmem:[#allocation4 + $0x23] ss:$4 sm:$0x3] }
 0x241   : > { %v1799_v58 = vpop.permute.xlu1 %1798 }
 0x242   : > { %v1812_v9 = vmul.f32 %v1805_v15, %v1799_v58  ;;  %v1813_v43 = vmul.f32 %v1809_v0, %v1799_v58 }
 0x244   : > { %v3580_v24 = vadd.f32 %v1812_v9, %v1734_v44  ;;  %v3582_v12 = vadd.f32 %v1813_v43, %v1735_v4  ;;  %2673 = vset.pattern.permute.xlu1 %v3953_v48 }
 0x245   : > { %2198 = vperm.xlu1 %2673, %v3397_v53  }
 0x246   : > { %v1839_v13 = vpop.permute.xlu1 %1838 }
 0x247   : > { %v1852_v10 = vmul.f32 %v1845_v36, %v1839_v13  ;;  %v1853_v51 = vmul.f32 %v1849_v42, %v1839_v13 }
 0x249   : > { %v3589_v32 = vadd.f32 %v1852_v10, %v3536_v41  ;;  %v3592_v5 = vadd.f32 %v1853_v51, %v3538_v62  ;;  %2674 = vset.pattern.permute.xlu1 %v3954_v30  ;;  %v2283_v62 = vpop.permute.xlu0 %2282  ;;  %v1876_v10 = vld [vmem:[#allocation4 + $0x21] ss:$4 sm:$0x3]  ;;  %v1896_v51 = vld [vmem:[#allocation4 + $0x22] ss:$4 sm:$0x3] }
 0x24a   : > { %2218 = vperm.xlu1 %2674, %v3397_v53   ;;  %v2286_v19 = vrot.slane %v2283_v62, 4  ;;  %v3636_v30 = vld [vmem:[#allocation4 + $0x39] ss:$4 sm:$0x3] }
 0x24b   : > { %v1859_v28 = vpop.permute.xlu1 %1858 }
 0x24c   : > { %v1872_v45 = vmul.f32 %v1865_v35, %v1859_v28  ;;  %v1873_v44 = vmul.f32 %v1869_v20, %v1859_v28  ;;  %v3640_v20 = vld [vmem:[#allocation4 + $0x38] ss:$4 sm:$0x3]  ;;  %v3642_v28 = vld [vmem:[#allocation4 + $0x3a] ss:$4 sm:$0x3] }
 0x24d   : > { %v2326_v61 = vpop.permute.xlu0 %2325 }
 0x24e   : > { %v3598_v4 = vadd.f32 %v1872_v45, %v1794_v14  ;;  %v3600_v33 = vadd.f32 %v1873_v44, %v1795_v50  ;;  %2676 = vset.pattern.permute.xlu1 %v3950_v16  ;;  %v2329_v23 = vrot.slane %v2326_v61, 4  ;;  %v2275_v16 = vmul.f32 %v3448_v46, %v3910_v1 }
 0x24f   : > { %2263 = vperm.xlu1 %2676, %v3397_v53   ;;  %v2285_v41 = vpop.permute.xlu1 %2284  ;;  %v1885_v45 = vrot.slane %v1876_v10, %v2785_v7  ;;  %v1889_v44 = vrot.slane %v1876_v10, %v2787_v8 }
 0x250   : > { %v2287_v2 = vrot.slane %v2285_v41, 4  ;;  %v2293_v56 = vadd.f32 %v2285_v41, %v2275_v16  ;;  %v2331_v31 = vsel %vm2330_vm9, %v2329_v23, %v2326_v61  ;;  %v2332_v1 = vsel %vm2330_vm9, %v2329_v23, %v3559_v39  ;;  %v3662_v16 = vld [vmem:[#allocation4 + $0x32] ss:$4 sm:$0x3] }
 0x251   : > { %v1905_v41 = vrot.slane %v1896_v51, %v2785_v7  ;;  %v1929_v61 = vrot.slane %v3634_v57, %v2787_v8  ;;  %v2125_v23 = vrot.slane %v3636_v30, %v2785_v7 }
 0x252   : > { %v2288_v52 = vsel %vm388_vm6, %v2286_v19, %v2287_v2  ;;  %v2336_v46 = vadd.f32 %v2332_v1, %v2293_v56  ;;  %v1936_v2 = vld [vmem:[#allocation4 + $0x28] ss:$4 sm:$0x3]  ;;  %v3648_v19 = vld [vmem:[#allocation4 + $0x3b] ss:$4 sm:$0x3] }
 0x253   : > { %v2289_v25 = vsel %vm530_vm8, %v2283_v62, %v2288_v52  ;;  %v1909_v62 = vrot.slane %v1896_v51, %v2787_v8  ;;  %v1925_v52 = vrot.slane %v3634_v57, %v2785_v7  ;;  %v2076_v51 = vld [vmem:[#allocation4 + $0x33] ss:$4 sm:$0x3] }
 0x254   : > { %v2292_v53 = vadd.f32 %v2289_v25, %v2274_v55  ;;  %v3654_v25 = vld [vmem:[#allocation4 + $0x2b] ss:$4 sm:$0x3]  ;;  %v1956_v55 = vld [vmem:[#allocation4 + $0x29] ss:$4 sm:$0x3] }
 0x255   : > { %v1965_v1 = vrot.slane %v1956_v55, %v2785_v7 }
 0x256   : > { %v2335_v37 = vadd.f32 %v2331_v31, %v2292_v53  ;;  %v2105_v53 = vrot.slane %v3640_v20, %v2785_v7  ;;  %v1945_v31 = vrot.slane %v1936_v2, %v2785_v7 }
 0x27c   : > { %v2370_v18 = vpop.permute.xlu0 %2369  ;;  %v2368_v40 = vpop.permute.xlu1 %2367 }
 0x27d   : > { %v2372_v34 = vrot.slane %v2370_v18, 4  ;;  %v2371_v17 = vrot.slane %v2368_v40, 4  ;;  %v2378_v14 = vadd.f32 %v2370_v18, %v2336_v46  ;;  %v1969_v46 = vrot.slane %v1956_v55, %v2787_v8 }
 0x27f   : > { %v2373_v47 = vsel %vm388_vm6, %v2371_v17, %v2372_v34  ;;  %v3664_v34 = vld [vmem:[#allocation4 + $0x2a] ss:$4 sm:$0x3]  ;;  %v2109_v17 = vrot.slane %v3640_v20, %v2787_v8 }
 0x280   : > { %v2374_v11 = vsel %vm450_vm3, %v2368_v40, %v2373_v47  ;;  %v2384_v21 = vpop.permute.xlu0 %2383  ;;  %v2382_v26 = vpop.permute.xlu1 %2381  ;;  %v3708_v47 = vld [vmem:[#allocation4 + $0x42] ss:$4 sm:$0x3] }
 0x281   : > { %v2386_v60 = vrot.slane %v2384_v21, 4  ;;  %v2385_v49 = vrot.slane %v2382_v26, 4  ;;  %v2377_v22 = vadd.f32 %v2374_v11, %v2335_v37  ;;  %v2393_v15 = vadd.f32 %v2384_v21, %v2378_v14  ;;  %v2016_v21 = vld [vmem:[#allocation4 + $0x30] ss:$4 sm:$0x3] }
 0x282   : > { %v1949_v11 = vrot.slane %v1936_v2, %v2787_v8 }
 0x283   : > { %v2387_v38 = vsel %vm388_vm6, %v2385_v49, %v2386_v60  ;;  %v2411_v9 = vmul.f32 %v2406_v63, %v2393_v15  ;;  %v2005_v49 = vrot.slane %v3654_v25, %v2785_v7  ;;  %v2009_v63 = vrot.slane %v3654_v25, %v2787_v8  ;;  %v3696_v15 = vld [vmem:[#allocation4 + $0x43] ss:$4 sm:$0x3] }
 0x284   : > { %v2389_v29 = vsel %vm2388_vm10, %v2382_v26, %v2387_v38  ;;  %v3676_v26 = vld [vmem:[#allocation4 + $0x40] ss:$4 sm:$0x3]  ;;  %v2065_v38 = vrot.slane %v3662_v16, %v2785_v7 }
 0x285   : > { %v2392_v50 = vadd.f32 %v2389_v29, %v2377_v22  ;;  %v2036_v22 = vld [vmem:[#allocation4 + $0x31] ss:$4 sm:$0x3]  ;;  %v2069_v29 = vrot.slane %v3662_v16, %v2787_v8 }
 0x286   : > { %v2045_v55 = vrot.slane %v2036_v22, %v2785_v7  ;;  %v2049_v16 = vrot.slane %v2036_v22, %v2787_v8  ;;  %v2089_v22 = vrot.slane %v2076_v51, %v2787_v8 }
 0x287   : > { %v2410_v0 = vmul.f32 %v2407_v3, %v2392_v50  ;;  %v1985_v50 = vrot.slane %v3664_v34, %v2785_v7  ;;  %v1989_v3 = vrot.slane %v3664_v34, %v2787_v8  ;;  %v3706_v34 = vld [vmem:[#allocation4 + $0x41] ss:$4 sm:$0x3] }
 0x288   : > { %v2205_v10 = vrot.slane %v3706_v34, %v2785_v7 }
 0x289   : > { %v2416_v58 = vcombine.high %v2410_v0, %v2410_v0  ;;  %2417 = vrot.lane.b32.xlu1 %v2410_v0, %s2698_s15  ;;  %v2025_v0 = vrot.slane %v2016_v21, %v2785_v7 }
 0x28b   : > { %2419 = vrot.lane.b32.xlu0 %v2416_v58, %s2698_s15  ;;  %v2029_v58 = vrot.slane %v2016_v21, %v2787_v8 }
 0x28d   : > { %2421 = vrot.lane.b32.xlu1 %v2411_v9, %s2698_s15  ;;  %v3622_v39 = vpop.permute.xlu1 %1898  ;;  %v1879_v36 = vpop.permute.xlu0 %1878 }
 0x28e   : > { %v1892_v2 = vmul.f32 %v1885_v45, %v1879_v36  ;;  %v1893_v25 = vmul.f32 %v1889_v44, %v1879_v36  ;;  %v1912_v21 = vmul.f32 %v1905_v41, %v3622_v39  ;;  %v1913_v56 = vmul.f32 %v1909_v62, %v3622_v39 }
 0x28f   : > { %v2085_v44 = vrot.slane %v2076_v51, %v2785_v7  ;;  %v2209_v41 = vrot.slane %v3706_v34, %v2787_v8 }
 0x290   : > { %v1894_v37 = vadd.f32 %v1892_v2, %v3580_v24  ;;  %v1914_v9 = vadd.f32 %v1912_v21, %v3572_v6  ;;  %v1915_v34 = vadd.f32 %v1913_v56, %v3574_v27 }
 0x292   : > { %v3624_v43 = vpop.permute.xlu1 %1918  ;;  %v1939_v42 = vpop.permute.xlu0 %1938 }
 0x293   : > { %v1952_v45 = vmul.f32 %v1945_v31, %v1939_v42  ;;  %v1953_v36 = vmul.f32 %v1949_v11, %v1939_v42  ;;  %v1895_v42 = vadd.f32 %v1893_v25, %v3582_v12  ;;  %v1932_v31 = vmul.f32 %v1925_v52, %v3624_v43 }
 0x294   : > { %v1933_v11 = vmul.f32 %v1929_v61, %v3624_v43 }
 0x295   : > { %v1954_v62 = vadd.f32 %v1952_v45, %v3598_v4  ;;  %v1955_v24 = vadd.f32 %v1953_v36, %v3600_v33  ;;  %v1934_v56 = vadd.f32 %v1932_v31, %v3589_v32 }
 0x297   : > { %v3638_v35 = vpop.permute.xlu0 %1998 }
 0x298   : > { %v3626_v54 = vpop.permute.xlu1 %1958  ;;  %v2012_v12 = vmul.f32 %v2005_v49, %v3638_v35  ;;  %v2013_v52 = vmul.f32 %v2009_v63, %v3638_v35 }
 0x299   : > { %v1972_v18 = vmul.f32 %v1965_v1, %v3626_v54  ;;  %v1973_v39 = vmul.f32 %v1969_v46, %v3626_v54  ;;  %v1935_v54 = vadd.f32 %v1933_v11, %v3592_v5  ;;  %v3961_v11 = vrot.slane %v3642_v28, %v2787_v8 }
 0x29b   : > { %v1974_v1 = vadd.f32 %v1972_v18, %v1894_v37  ;;  %v1975_v49 = vadd.f32 %v1973_v39, %v1895_v42  ;;  %v2015_v46 = vadd.f32 %v2013_v52, %v1935_v54 }
 0x29c   : > { %v2059_v14 = vpop.permute.xlu0 %2058 }
 0x29d   : > { %v3628_v48 = vpop.permute.xlu1 %1978  ;;  %v2072_v32 = vmul.f32 %v2065_v38, %v2059_v14 }
 0x29e   : > { %v1992_v4 = vmul.f32 %v1985_v50, %v3628_v48  ;;  %v1993_v33 = vmul.f32 %v1989_v3, %v3628_v48 }
 0x2a0   : > { %v1994_v18 = vadd.f32 %v1992_v4, %v1914_v9  ;;  %v1995_v37 = vadd.f32 %v1993_v33, %v1915_v34  ;;  %v3957_v9 = vrot.slane %v3676_v26, %v2787_v8 }
 0x2a2   : > { %v3630_v59 = vpop.permute.xlu1 %2018  ;;  %v2119_v51 = vpop.permute.xlu0 %2118  ;;  %v2074_v52 = vadd.f32 %v2072_v32, %v1994_v18 }
 0x2a3   : > { %v2032_v43 = vmul.f32 %v2025_v0, %v3630_v59  ;;  %v2033_v61 = vmul.f32 %v2029_v58, %v3630_v59  ;;  %v2073_v0 = vmul.f32 %v2069_v29, %v2059_v14  ;;  %v2132_v20 = vmul.f32 %v2125_v23, %v2119_v51 }
 0x2a4   : > { %v3959_v23 = vrot.slane %v3648_v19, %v2787_v8 }
 0x2a5   : > { %v2034_v58 = vadd.f32 %v2032_v43, %v1954_v62  ;;  %v2035_v50 = vadd.f32 %v2033_v61, %v1955_v24  ;;  %v2075_v43 = vadd.f32 %v2073_v0, %v1995_v37 }
 0x2a7   : > { %v3632_v13 = vpop.permute.xlu1 %2038  ;;  %v2179_v5 = vpop.permute.xlu0 %2178 }
 0x2a8   : > { %v2052_v6 = vmul.f32 %v2045_v55, %v3632_v13  ;;  %v2053_v27 = vmul.f32 %v2049_v16, %v3632_v13  ;;  %v2014_v13 = vadd.f32 %v2012_v12, %v1934_v56  ;;  %v2193_v55 = vmul.f32 %v3957_v9, %v2179_v5 }
 0x2aa   : > { %v2054_v2 = vadd.f32 %v2052_v6, %v1974_v1  ;;  %v2055_v48 = vadd.f32 %v2053_v27, %v1975_v49  ;;  %v3963_v27 = vrot.slane %v3696_v15, %v2787_v8  ;;  %v3964_v1 = vrot.slane %v3708_v47, %v2785_v7 }
 0x2ac   : > { %v3660_v40 = vpop.permute.xlu1 %2078  ;;  %v2134_v45 = vadd.f32 %v2132_v20, %v2054_v2  ;;  %v2239_v39 = vpop.permute.xlu0 %2238 }
 0x2ad   : > { %v2092_v3 = vmul.f32 %v2085_v44, %v3660_v40  ;;  %v2253_v56 = vmul.f32 %v3963_v27, %v2239_v39 }
 0x2af   : > { %v2094_v62 = vadd.f32 %v2092_v3, %v2014_v13 }
 0x2b1   : > { %v2099_v57 = vpop.permute.xlu1 %2098 }
 0x2b2   : > { %v2112_v35 = vmul.f32 %v2105_v53, %v2099_v57  ;;  %v2113_v59 = vmul.f32 %v2109_v17, %v2099_v57  ;;  %v2093_v53 = vmul.f32 %v2089_v22, %v3660_v40  ;;  %v3955_v17 = vrot.slane %v3636_v30, %v2787_v8 }
 0x2b3   : > { %v3956_v57 = vrot.slane %v3676_v26, %v2785_v7  ;;  %v3958_v40 = vrot.slane %v3648_v19, %v2785_v7  ;;  %v3960_v26 = vrot.slane %v3642_v28, %v2785_v7 }
 0x2b4   : > { %v2133_v38 = vmul.f32 %v3955_v17, %v2119_v51  ;;  %v2114_v29 = vadd.f32 %v2112_v35, %v2034_v58  ;;  %v2115_v14 = vadd.f32 %v2113_v59, %v2035_v50  ;;  %v2095_v42 = vadd.f32 %v2093_v53, %v2015_v46 }
 0x2b5   : > { %v2192_v25 = vmul.f32 %v3956_v57, %v2179_v5  ;;  %v3965_v35 = vrot.slane %v3708_v47, %v2787_v8 }
 0x2b6   : > { %v2139_v60 = vpop.permute.xlu1 %2138  ;;  %v2135_v36 = vadd.f32 %v2133_v38, %v2055_v48  ;;  %v2195_v24 = vadd.f32 %v2193_v55, %v2115_v14 }
 0x2b7   : > { %v2152_v31 = vmul.f32 %v3960_v26, %v2139_v60  ;;  %v2153_v51 = vmul.f32 %v3961_v11, %v2139_v60  ;;  %v2194_v34 = vadd.f32 %v2192_v25, %v2114_v29 }
 0x2b9   : > { %v2154_v60 = vadd.f32 %v2152_v31, %v2074_v52  ;;  %v2155_v33 = vadd.f32 %v2153_v51, %v2075_v43 }
 0x2bb   : > { %v2159_v63 = vpop.permute.xlu1 %2158 }
 0x2bc   : > { %v2172_v16 = vmul.f32 %v3958_v40, %v2159_v63  ;;  %v2173_v21 = vmul.f32 %v3959_v23, %v2159_v63 }
 0x2be   : > { %v2174_v61 = vadd.f32 %v2172_v16, %v2094_v62 }
 0x2c0   : > { %v2199_v30 = vpop.permute.xlu1 %2198 }
 0x2c1   : > { %v2212_v44 = vmul.f32 %v2205_v10, %v2199_v30  ;;  %v2213_v22 = vmul.f32 %v2209_v41, %v2199_v30  ;;  %v2175_v10 = vadd.f32 %v2173_v21, %v2095_v42  ;;  %v3962_v41 = vrot.slane %v3696_v15, %v2785_v7 }
 0x2c3   : > { %v2214_v19 = vadd.f32 %v2212_v44, %v2134_v45  ;;  %v2215_v12 = vadd.f32 %v2213_v22, %v2135_v36  ;;  %v2252_v6 = vmul.f32 %v3962_v41, %v2239_v39  ;;  %v2255_v13 = vadd.f32 %v2253_v56, %v2175_v10 }
 0x2c5   : > { %v2219_v54 = vpop.permute.xlu1 %2218  ;;  %v2256_v4 = vadd.f32 %v2214_v19, %v2194_v34  ;;  %v2257_v28 = vadd.f32 %v2215_v12, %v2195_v24  ;;  %v2254_v63 = vadd.f32 %v2252_v6, %v2174_v61 }
 0x2c6   : > { %v2232_v49 = vmul.f32 %v3964_v1, %v2219_v54  ;;  %v2233_v59 = vmul.f32 %v3965_v35, %v2219_v54 }
 0x2c8   : > { %v2234_v15 = vadd.f32 %v2232_v49, %v2154_v60  ;;  %v2235_v46 = vadd.f32 %v2233_v59, %v2155_v33 }
 0x2ca   : > { %v2258_v32 = vadd.f32 %v2254_v63, %v2234_v15  ;;  %v2259_v0 = vadd.f32 %v2255_v13, %v2235_v46  ;;  %v2264_v5 = vpop.permute.xlu1 %2263 }
 0x2cc   : > { %v2260_v58 = vadd.f32 %v2258_v32, %v2256_v4  ;;  %v2261_v50 = vadd.f32 %v2259_v0, %v2257_v28 }
 0x2ce   : > { %v2266_v2 = vadd.f32 %v2264_v5, %v2260_v58  ;;  %v2267_v7 = vadd.f32 %v2264_v5, %v2261_v50 }
 0x2d0   : > { %2268 = vst [vmem:[%s3351_s27 + $0x10] sm:$0xf] %v2266_v2  ;;  %2269 = vst [vmem:[%s3351_s27 + $0x18] sm:$0xf] %v2267_v7 }
 0x2d7   : > { %v2412_v47 = vld [vmem:[%s3351_s27 + $0x10] sm:$0xf]  ;;  %v2413_v53 = vld [vmem:[%s3351_s27 + $0x18] sm:$0xf] }
 0x2fb   : > { %v2418_v48 = vpop.permute.xlu1 %2417 }
 0x2fd   : > { %v2420_v8 = vpop.permute.xlu0 %2419 }
 0x2fe   : > { %v2423_v18 = vsel %vm390_vm4, %v2418_v48, %v2420_v8 }
 0x2ff   : > { %v2427_v37 = vadd.f32 %v2423_v18, %v2412_v47  ;;  %v2422_v3 = vpop.permute.xlu1 %2421 }
 0x300   : > { %v2424_v20 = vsel %vm390_vm4, %v2420_v8, %v2422_v3 }
 0x301   : > { %2429 = vst [vmem:[%s3351_s27 + $0x10] sm:$0xf] %v2427_v37  ;;  %v2428_v17 = vadd.f32 %v2424_v20, %v2413_v53 }
 0x303   : > { %2430 = vst [vmem:[%s3351_s27 + $0x18] sm:$0xf] %v2428_v17 }
 0x304 PF: > { %s16_s21 = sadd.s32 1, %s2684_s21  }
 0x305   : > { %p13_p4 = scmp.ge.s32.totalorder %s16_s21, 4  }
 0x307   :  { %15 = sbr.rel (!%p13_p4) target bundleno = 1 (0x1), region = 113 }

</bundles_post_ra>
